<compile_context>
chip_gen: v6e
topology: v6e:2x2x1
jax: 0.10.0
libtpu: 0.0.40
codegen_flags: <defaults>
</compile_context>

<pallas_src>
import functools

import numpy as np
import jax
import jax.numpy as jnp
from jax.experimental import pallas as pl
from jax.experimental.pallas import tpu as pltpu

# ----------------------------- model hyper-params (small, synthetic) ------
TEMPLATE_SIZE = 16
PATCH_SIZE = 8
IN_CHANS = 4
EMBED_DIM = 32
NUM_HEADS = 4
MLP_RATIO = 4
DEPTH = 2
OUTPUT_DIM = 4
LN_EPS = 1e-5  # torch.nn.LayerNorm default

NUM_PATCHES = (TEMPLATE_SIZE // PATCH_SIZE) ** 2          # 4
SEQ_LEN = NUM_PATCHES + 1                                  # 5 (cls token)
PATCH_DIM = IN_CHANS * PATCH_SIZE * PATCH_SIZE             # 256
HIDDEN_DIM = EMBED_DIM * MLP_RATIO                         # 128


# ----------------------------- in-kernel math helpers ----------------------
def _erf(x):
    # Abramowitz & Stegun 7.1.26 rational approximation (|err| < 1.5e-7),
    # built only from exp / mul / add / div so it lowers cleanly on Mosaic.
    a1, a2, a3, a4, a5 = 0.254829592, -0.284496736, 1.421413741, -1.453152027, 1.061405429
    p = 0.3275911
    s = jnp.where(x >= 0.0, 1.0, -1.0)
    ax = jnp.abs(x)
    t = 1.0 / (1.0 + p * ax)
    poly = ((((a5 * t + a4) * t + a3) * t + a2) * t + a1) * t
    return s * (1.0 - poly * jnp.exp(-ax * ax))


def _gelu(x):
    # exact (erf-based) GELU, matching torch.nn.GELU(approximate='none')
    return 0.5 * x * (1.0 + _erf(x * 0.7071067811865476))


def _layernorm(x, w, b, eps):
    mu = jnp.mean(x, axis=-1, keepdims=True)
    xc = x - mu
    var = jnp.mean(xc * xc, axis=-1, keepdims=True)
    return xc * jax.lax.rsqrt(var + eps) * w + b


# ----------------------------- fused Pallas kernel --------------------------
def _fused_kernel(
    patches_ref, pw_ref, pb_ref, cls_ref, pos_ref,
    ln1w_ref, ln1b_ref, qkvw_ref, qkvb_ref, projw_ref, projb_ref,
    ln2w_ref, ln2b_ref, fc1w_ref, fc1b_ref, fc2w_ref, fc2b_ref,
    normw_ref, normb_ref, headw_ref, headb_ref,
    out_ref,
    feat_ref, attn_ref,
    *, batch, depth, num_heads, seq_len, num_patches, eps,
):
    B, N, P = batch, seq_len, num_patches

    # ---- patch embed + cls token + positional embedding (all in VMEM) ------
    z_emb = (jnp.dot(patches_ref[...], pw_ref[...],
                     preferred_element_type=jnp.float32) + pb_ref[...])   # (B*P, D)
    cls_row = cls_ref[...]                                                # (1, D)
    pos = pos_ref[...]                                                    # (N, D)
    for b in range(B):
        feat_ref[b * N: b * N + 1, :] = cls_row + pos[0:1, :]
        feat_ref[b * N + 1: (b + 1) * N, :] = (
            z_emb[b * P: (b + 1) * P, :] + pos[1:N, :])

    d_model = feat_ref.shape[-1]
    dh = d_model // num_heads
    scale = dh ** -0.5

    # ---- transformer blocks (weights stacked along a leading depth axis) ---
    for d in range(depth):
        x = feat_ref[...]                                                 # (B*N, D)
        h = _layernorm(x, ln1w_ref[d], ln1b_ref[d], eps)
        qkv = (jnp.dot(h, qkvw_ref[d], preferred_element_type=jnp.float32)
               + qkvb_ref[d])                                             # (B*N, 3D)
        q = qkv[:, 0 * d_model: 1 * d_model]
        k = qkv[:, 1 * d_model: 2 * d_model]
        v = qkv[:, 2 * d_model: 3 * d_model]

        # per-(batch, head) attention; each head output goes straight into a
        # preallocated VMEM scratch at static offsets (no concat / relayout).
        for b in range(B):
            rs = slice(b * N, (b + 1) * N)
            for hd in range(num_heads):
                cs = slice(hd * dh, (hd + 1) * dh)
                qh, kh, vh = q[rs, cs], k[rs, cs], v[rs, cs]
                # q @ k^T without an explicit transpose
                s = jax.lax.dot_general(
                    qh, kh, (((1,), (1,)), ((), ())),
                    preferred_element_type=jnp.float32) * scale           # (N, N)
                s = s - jnp.max(s, axis=-1, keepdims=True)
                p = jnp.exp(s)
                p = p * pl.reciprocal(jnp.sum(p, axis=-1, keepdims=True),
                                      approx=True)
                attn_ref[rs, cs] = jnp.dot(p, vh,
                                           preferred_element_type=jnp.float32)

        attn = (jnp.dot(attn_ref[...], projw_ref[d],
                        preferred_element_type=jnp.float32) + projb_ref[d])
        x = x + attn

        hm = _layernorm(x, ln2w_ref[d], ln2b_ref[d], eps)
        hm = jnp.dot(hm, fc1w_ref[d], preferred_element_type=jnp.float32) + fc1b_ref[d]
        hm = _gelu(hm)
        hm = jnp.dot(hm, fc2w_ref[d], preferred_element_type=jnp.float32) + fc2b_ref[d]
        feat_ref[...] = x + hm

    # ---- final LayerNorm + linear head on the cls rows ----------------------
    x = feat_ref[...]
    nw, nb = normw_ref[...], normb_ref[...]
    hw, hb = headw_ref[...], headb_ref[...]
    for b in range(B):
        row = x[b * N: b * N + 1, :]                                      # (1, D)
        row = _layernorm(row, nw, nb, eps)
        out_ref[b: b + 1, :] = (
            jnp.dot(row, hw, preferred_element_type=jnp.float32) + hb)


# ----------------------------- wrapper ---------------------------------------
def preprocess_forward(z, params):
    B, C, H, W = z.shape
    hp, wp = H // PATCH_SIZE, W // PATCH_SIZE
    # Conv2d(kernel=stride=ps)-style patchify; flatten order (c, kh, kw).
    patches = z.reshape(B, C, hp, PATCH_SIZE, wp, PATCH_SIZE)
    patches = patches.transpose(0, 2, 4, 1, 3, 5).reshape(
        B * hp * wp, C * PATCH_SIZE * PATCH_SIZE)

    kern = functools.partial(
        _fused_kernel, batch=B, depth=DEPTH, num_heads=NUM_HEADS,
        seq_len=SEQ_LEN, num_patches=NUM_PATCHES, eps=LN_EPS)

    # Single gridless pallas_call: one launch, everything resident in VMEM.
    y = pl.pallas_call(
        kern,
        out_shape=jax.ShapeDtypeStruct((B, OUTPUT_DIM), jnp.float32),
        scratch_shapes=[
            pltpu.VMEM((B * SEQ_LEN, EMBED_DIM), jnp.float32),   # activations
            pltpu.VMEM((B * SEQ_LEN, EMBED_DIM), jnp.float32),   # attn head outs
        ],
    )(
        patches,
        params["patch_w"], params["patch_b"], params["cls_token"], params["pos_embed"],
        params["ln1_w"], params["ln1_b"], params["qkv_w"], params["qkv_b"],
        params["proj_w"], params["proj_b"], params["ln2_w"], params["ln2_b"],
        params["fc1_w"], params["fc1_b"], params["fc2_w"], params["fc2_b"],
        params["norm_w"], params["norm_b"], params["head_w"], params["head_b"],
    )
    # Lane-dense (B, OUTPUT_DIM) kernel output; split + sigmoid in the wrapper.
    color = y[:, : OUTPUT_DIM - 1]
    transparency = jax.nn.sigmoid(y[:, OUTPUT_DIM - 1])
    return color, transparency


# ----------------------------- deterministic parameter init -----------------
def get_sinusoid_encoding_table(n_position, d_hid, cls_token=False):
    pos = np.arange(n_position, dtype=np.float32)[:, None]
    i = np.arange(d_hid, dtype=np.float32)[None, :]
    angle = pos / np.power(10000.0, 2.0 * np.floor(i / 2.0) / d_hid)
    table = np.zeros((n_position, d_hid), dtype=np.float32)
    table[:, 0::2] = np.sin(angle[:, 0::2])
    table[:, 1::2] = np.cos(angle[:, 1::2])
    if cls_token:
        table = np.concatenate([np.zeros((1, d_hid), np.float32), table], axis=0)
    return table


def _trunc_normal(key, shape, std=0.02):
    return jax.random.truncated_normal(key, -2.0, 2.0, shape, jnp.float32) * std


def init_params(key):
    ks = iter(jax.random.split(key, 8 + 4 * DEPTH))
    params = {
        "patch_w": _trunc_normal(next(ks), (PATCH_DIM, EMBED_DIM)),
        "patch_b": jnp.zeros((1, EMBED_DIM), jnp.float32),
        "cls_token": _trunc_normal(next(ks), (1, EMBED_DIM)),
        "pos_embed": jnp.asarray(
            get_sinusoid_encoding_table(NUM_PATCHES, EMBED_DIM, cls_token=True)),
        "norm_w": jnp.ones((1, EMBED_DIM), jnp.float32),
        "norm_b": jnp.zeros((1, EMBED_DIM), jnp.float32),
        "head_w": _trunc_normal(next(ks), (EMBED_DIM, OUTPUT_DIM)),
        "head_b": jnp.zeros((1, OUTPUT_DIM), jnp.float32),
    }
    # Per-block parameters packed along a leading depth axis (fewer refs/DMAs).
    qkv_w, proj_w, fc1_w, fc2_w = [], [], [], []
    for _ in range(DEPTH):
        qkv_w.append(_trunc_normal(next(ks), (EMBED_DIM, 3 * EMBED_DIM)))
        proj_w.append(_trunc_normal(next(ks), (EMBED_DIM, EMBED_DIM)))
        fc1_w.append(_trunc_normal(next(ks), (EMBED_DIM, HIDDEN_DIM)))
        fc2_w.append(_trunc_normal(next(ks), (HIDDEN_DIM, EMBED_DIM)))
    params.update({
        "ln1_w": jnp.ones((DEPTH, 1, EMBED_DIM), jnp.float32),
        "ln1_b": jnp.zeros((DEPTH, 1, EMBED_DIM), jnp.float32),
        "qkv_w": jnp.stack(qkv_w),
        "qkv_b": jnp.zeros((DEPTH, 1, 3 * EMBED_DIM), jnp.float32),
        "proj_w": jnp.stack(proj_w),
        "proj_b": jnp.zeros((DEPTH, 1, EMBED_DIM), jnp.float32),
        "ln2_w": jnp.ones((DEPTH, 1, EMBED_DIM), jnp.float32),
        "ln2_b": jnp.zeros((DEPTH, 1, EMBED_DIM), jnp.float32),
        "fc1_w": jnp.stack(fc1_w),
        "fc1_b": jnp.zeros((DEPTH, 1, HIDDEN_DIM), jnp.float32),
        "fc2_w": jnp.stack(fc2_w),
        "fc2_b": jnp.zeros((DEPTH, 1, EMBED_DIM), jnp.float32),
    })
    return params


# ----------------------------- main ------------------------------------------
if __name__ == "__main__":
    key = jax.random.PRNGKey(0)
    k_params, k_input = jax.random.split(key)
    params = init_params(k_params)

    z = jax.random.normal(
        k_input, (2, IN_CHANS, TEMPLATE_SIZE, TEMPLATE_SIZE), jnp.float32)

    fwd = jax.jit(preprocess_forward)
    color, transparency = fwd(z, params)
    jax.block_until_ready((color, transparency))

    assert color.shape == (2, OUTPUT_DIM - 1)
    assert transparency.shape == (2,)
    assert bool(jnp.all(jnp.isfinite(color)))
    assert bool(jnp.all(jnp.isfinite(transparency)))
    print("KERNEL_OK")
</pallas_src>

<mosaic_0001>
module attributes {stable_mosaic.version = 11 : i64} {
  func.func @_fused_kernel(%arg0: memref<8x256xf32, #tpu.memory_space<vmem>>, %arg1: memref<256x32xf32, #tpu.memory_space<vmem>>, %arg2: memref<1x32xf32, #tpu.memory_space<vmem>>, %arg3: memref<1x32xf32, #tpu.memory_space<vmem>>, %arg4: memref<5x32xf32, #tpu.memory_space<vmem>>, %arg5: memref<2x1x32xf32, #tpu.memory_space<vmem>>, %arg6: memref<2x1x32xf32, #tpu.memory_space<vmem>>, %arg7: memref<2x32x96xf32, #tpu.memory_space<vmem>>, %arg8: memref<2x1x96xf32, #tpu.memory_space<vmem>>, %arg9: memref<2x32x32xf32, #tpu.memory_space<vmem>>, %arg10: memref<2x1x32xf32, #tpu.memory_space<vmem>>, %arg11: memref<2x1x32xf32, #tpu.memory_space<vmem>>, %arg12: memref<2x1x32xf32, #tpu.memory_space<vmem>>, %arg13: memref<2x32x128xf32, #tpu.memory_space<vmem>>, %arg14: memref<2x1x128xf32, #tpu.memory_space<vmem>>, %arg15: memref<2x128x32xf32, #tpu.memory_space<vmem>>, %arg16: memref<2x1x32xf32, #tpu.memory_space<vmem>>, %arg17: memref<1x32xf32, #tpu.memory_space<vmem>>, %arg18: memref<1x32xf32, #tpu.memory_space<vmem>>, %arg19: memref<32x4xf32, #tpu.memory_space<vmem>>, %arg20: memref<1x4xf32, #tpu.memory_space<vmem>>, %arg21: memref<2x4xf32, #tpu.memory_space<vmem>>, %arg22: memref<10x32xf32, #tpu.memory_space<vmem>>, %arg23: memref<10x32xf32, #tpu.memory_space<vmem>>) attributes {dimension_semantics = [], scalar_prefetch = 0 : i64, scratch_operands = 2 : i64, tpu.core_type = #tpu.core_type<tc>} {
    %c0 = arith.constant 0 : index
    %c0_0 = arith.constant 0 : index
    %0 = vector.load %arg0[%c0, %c0_0] : memref<8x256xf32, #tpu.memory_space<vmem>>, vector<8x256xf32>
    %c0_1 = arith.constant 0 : index
    %c0_2 = arith.constant 0 : index
    %1 = vector.load %arg1[%c0_1, %c0_2] : memref<256x32xf32, #tpu.memory_space<vmem>>, vector<256x32xf32>
    %cst = arith.constant dense<0.000000e+00> : vector<8x32xf32>
    %2 = tpu.matmul %0, %1, %cst {dimension_numbers = #tpu.dot_dimension_numbers<[1], [0], [0], [1], [0, 0, 1, 1], [], []>} : vector<8x256xf32>, vector<256x32xf32>, vector<8x32xf32> -> vector<8x32xf32>
    %c0_3 = arith.constant 0 : index
    %c0_4 = arith.constant 0 : index
    %3 = vector.load %arg2[%c0_3, %c0_4] : memref<1x32xf32, #tpu.memory_space<vmem>>, vector<1x32xf32>
    %4 = vector.broadcast %3 : vector<1x32xf32> to vector<8x32xf32>
    %5 = arith.addf %2, %4 : vector<8x32xf32>
    %c0_5 = arith.constant 0 : index
    %c0_6 = arith.constant 0 : index
    %6 = vector.load %arg3[%c0_5, %c0_6] : memref<1x32xf32, #tpu.memory_space<vmem>>, vector<1x32xf32>
    %c0_7 = arith.constant 0 : index
    %c0_8 = arith.constant 0 : index
    %7 = vector.load %arg4[%c0_7, %c0_8] : memref<5x32xf32, #tpu.memory_space<vmem>>, vector<5x32xf32>
    %8 = vector.extract_strided_slice %7 {offsets = [0, 0], sizes = [1, 32], strides = [1, 1]} : vector<5x32xf32> to vector<1x32xf32>
    %9 = arith.addf %6, %8 : vector<1x32xf32>
    %c0_9 = arith.constant 0 : index
    %c0_10 = arith.constant 0 : index
    %10 = vector.load %arg22[%c0_9, %c0_10] : memref<10x32xf32, #tpu.memory_space<vmem>>, vector<1x32xf32>
    tpu.vector_store %arg22[%c0_9, %c0_10], %9 {strides = array<i32>} : memref<10x32xf32, #tpu.memory_space<vmem>>, vector<1x32xf32>,
    %11 = vector.extract_strided_slice %5 {offsets = [0, 0], sizes = [4, 32], strides = [1, 1]} : vector<8x32xf32> to vector<4x32xf32>
    %12 = vector.extract_strided_slice %7 {offsets = [1, 0], sizes = [4, 32], strides = [1, 1]} : vector<5x32xf32> to vector<4x32xf32>
    %13 = arith.addf %11, %12 : vector<4x32xf32>
    %c1 = arith.constant 1 : index
    %c0_11 = arith.constant 0 : index
    %14 = vector.load %arg22[%c1, %c0_11] : memref<10x32xf32, #tpu.memory_space<vmem>>, vector<4x32xf32>
    tpu.vector_store %arg22[%c1, %c0_11], %13 {strides = array<i32>} : memref<10x32xf32, #tpu.memory_space<vmem>>, vector<4x32xf32>,
    %15 = vector.extract_strided_slice %7 {offsets = [0, 0], sizes = [1, 32], strides = [1, 1]} : vector<5x32xf32> to vector<1x32xf32>
    %16 = arith.addf %6, %15 : vector<1x32xf32>
    %c5 = arith.constant 5 : index
    %c0_12 = arith.constant 0 : index
    %17 = vector.load %arg22[%c5, %c0_12] : memref<10x32xf32, #tpu.memory_space<vmem>>, vector<1x32xf32>
    tpu.vector_store %arg22[%c5, %c0_12], %16 {strides = array<i32>} : memref<10x32xf32, #tpu.memory_space<vmem>>, vector<1x32xf32>,
    %18 = vector.extract_strided_slice %5 {offsets = [4, 0], sizes = [4, 32], strides = [1, 1]} : vector<8x32xf32> to vector<4x32xf32>
    %19 = vector.extract_strided_slice %7 {offsets = [1, 0], sizes = [4, 32], strides = [1, 1]} : vector<5x32xf32> to vector<4x32xf32>
    %20 = arith.addf %18, %19 : vector<4x32xf32>
    %c6 = arith.constant 6 : index
    %c0_13 = arith.constant 0 : index
    %21 = vector.load %arg22[%c6, %c0_13] : memref<10x32xf32, #tpu.memory_space<vmem>>, vector<4x32xf32>
    tpu.vector_store %arg22[%c6, %c0_13], %20 {strides = array<i32>} : memref<10x32xf32, #tpu.memory_space<vmem>>, vector<4x32xf32>,
    %c0_14 = arith.constant 0 : index
    %c0_15 = arith.constant 0 : index
    %22 = vector.load %arg22[%c0_14, %c0_15] : memref<10x32xf32, #tpu.memory_space<vmem>>, vector<10x32xf32>
    %c0_16 = arith.constant 0 : index
    %c0_17 = arith.constant 0 : index
    %c0_18 = arith.constant 0 : index
    %23 = vector.load %arg5[%c0_16, %c0_17, %c0_18] : memref<2x1x32xf32, #tpu.memory_space<vmem>>, vector<1x1x32xf32>
    %24 = vector.shape_cast %23 : vector<1x1x32xf32> to vector<1x32xf32>
    %c0_19 = arith.constant 0 : index
    %c0_20 = arith.constant 0 : index
    %c0_21 = arith.constant 0 : index
    %25 = vector.load %arg6[%c0_19, %c0_20, %c0_21] : memref<2x1x32xf32, #tpu.memory_space<vmem>>, vector<1x1x32xf32>
    %26 = vector.shape_cast %25 : vector<1x1x32xf32> to vector<1x32xf32>
    %cst_22 = arith.constant dense<0.000000e+00> : vector<10xf32>
    %27 = vector.multi_reduction <add>, %22, %cst_22 [1] : vector<10x32xf32> to vector<10xf32>
    %28 = vector.shape_cast %27 : vector<10xf32> to vector<10x1xf32>
    %cst_23 = arith.constant 3.200000e+01 : f32
    %29 = vector.broadcast %cst_23 : f32 to vector<10x1xf32>
    %30 = arith.divf %28, %29 : vector<10x1xf32>
    %31 = vector.broadcast %30 : vector<10x1xf32> to vector<10x32xf32>
    %32 = arith.subf %22, %31 : vector<10x32xf32>
    %33 = arith.mulf %32, %32 : vector<10x32xf32>
    %cst_24 = arith.constant dense<0.000000e+00> : vector<10xf32>
    %34 = vector.multi_reduction <add>, %33, %cst_24 [1] : vector<10x32xf32> to vector<10xf32>
    %35 = vector.shape_cast %34 : vector<10xf32> to vector<10x1xf32>
    %cst_25 = arith.constant 3.200000e+01 : f32
    %36 = vector.broadcast %cst_25 : f32 to vector<10x1xf32>
    %37 = arith.divf %35, %36 : vector<10x1xf32>
    %cst_26 = arith.constant 9.99999974E-6 : f32
    %38 = vector.broadcast %cst_26 : f32 to vector<10x1xf32>
    %39 = arith.addf %37, %38 : vector<10x1xf32>
    %40 = math.rsqrt %39 : vector<10x1xf32>
    %41 = vector.broadcast %40 : vector<10x1xf32> to vector<10x32xf32>
    %42 = arith.mulf %32, %41 : vector<10x32xf32>
    %43 = vector.broadcast %24 : vector<1x32xf32> to vector<10x32xf32>
    %44 = arith.mulf %42, %43 : vector<10x32xf32>
    %45 = vector.broadcast %26 : vector<1x32xf32> to vector<10x32xf32>
    %46 = arith.addf %44, %45 : vector<10x32xf32>
    %c0_27 = arith.constant 0 : index
    %c0_28 = arith.constant 0 : index
    %c0_29 = arith.constant 0 : index
    %47 = vector.load %arg7[%c0_27, %c0_28, %c0_29] : memref<2x32x96xf32, #tpu.memory_space<vmem>>, vector<1x32x96xf32>
    %48 = vector.shape_cast %47 : vector<1x32x96xf32> to vector<32x96xf32>
    %cst_30 = arith.constant dense<0.000000e+00> : vector<10x96xf32>
    %49 = tpu.matmul %46, %48, %cst_30 {dimension_numbers = #tpu.dot_dimension_numbers<[1], [0], [0], [1], [0, 0, 1, 1], [], []>} : vector<10x32xf32>, vector<32x96xf32>, vector<10x96xf32> -> vector<10x96xf32>
    %c0_31 = arith.constant 0 : index
    %c0_32 = arith.constant 0 : index
    %c0_33 = arith.constant 0 : index
    %50 = vector.load %arg8[%c0_31, %c0_32, %c0_33] : memref<2x1x96xf32, #tpu.memory_space<vmem>>, vector<1x1x96xf32>
    %51 = vector.shape_cast %50 : vector<1x1x96xf32> to vector<1x96xf32>
    %52 = vector.broadcast %51 : vector<1x96xf32> to vector<10x96xf32>
    %53 = arith.addf %49, %52 : vector<10x96xf32>
    %54 = vector.extract_strided_slice %53 {offsets = [0, 0], sizes = [10, 32], strides = [1, 1]} : vector<10x96xf32> to vector<10x32xf32>
    %55 = vector.extract_strided_slice %53 {offsets = [0, 32], sizes = [10, 32], strides = [1, 1]} : vector<10x96xf32> to vector<10x32xf32>
    %56 = vector.extract_strided_slice %53 {offsets = [0, 64], sizes = [10, 32], strides = [1, 1]} : vector<10x96xf32> to vector<10x32xf32>
    %57 = vector.extract_strided_slice %54 {offsets = [0, 0], sizes = [5, 8], strides = [1, 1]} : vector<10x32xf32> to vector<5x8xf32>
    %58 = vector.extract_strided_slice %55 {offsets = [0, 0], sizes = [5, 8], strides = [1, 1]} : vector<10x32xf32> to vector<5x8xf32>
    %59 = vector.extract_strided_slice %56 {offsets = [0, 0], sizes = [5, 8], strides = [1, 1]} : vector<10x32xf32> to vector<5x8xf32>
    %cst_34 = arith.constant dense<0.000000e+00> : vector<5x5xf32>
    %60 = tpu.matmul %57, %58, %cst_34 {dimension_numbers = #tpu.dot_dimension_numbers<[1], [1], [0], [0], [0, 0, 1, 0], [], []>} : vector<5x8xf32>, vector<5x8xf32>, vector<5x5xf32> -> vector<5x5xf32>
    %cst_35 = arith.constant 0.353553385 : f32
    %61 = vector.broadcast %cst_35 : f32 to vector<5x5xf32>
    %62 = arith.mulf %60, %61 : vector<5x5xf32>
    %cst_36 = arith.constant dense<0xFF800000> : vector<5xf32>
    %63 = vector.multi_reduction <maximumf>, %62, %cst_36 [1] : vector<5x5xf32> to vector<5xf32>
    %64 = vector.shape_cast %63 : vector<5xf32> to vector<5x1xf32>
    %65 = vector.broadcast %64 : vector<5x1xf32> to vector<5x5xf32>
    %66 = arith.subf %62, %65 : vector<5x5xf32>
    %67 = math.exp %66 : vector<5x5xf32>
    %cst_37 = arith.constant dense<0.000000e+00> : vector<5xf32>
    %68 = vector.multi_reduction <add>, %67, %cst_37 [1] : vector<5x5xf32> to vector<5xf32>
    %69 = vector.shape_cast %68 : vector<5xf32> to vector<5x1xf32>
    %70 = tpu.reciprocal %69 {approx = true} : vector<5x1xf32> -> vector<5x1xf32>
    %71 = vector.broadcast %70 : vector<5x1xf32> to vector<5x5xf32>
    %72 = arith.mulf %67, %71 : vector<5x5xf32>
    %cst_38 = arith.constant dense<0.000000e+00> : vector<5x8xf32>
    %73 = tpu.matmul %72, %59, %cst_38 {dimension_numbers = #tpu.dot_dimension_numbers<[1], [0], [0], [1], [0, 0, 1, 1], [], []>} : vector<5x5xf32>, vector<5x8xf32>, vector<5x8xf32> -> vector<5x8xf32>
    %c0_39 = arith.constant 0 : index
    %c0_40 = arith.constant 0 : index
    %74 = vector.load %arg23[%c0_39, %c0_40] : memref<10x32xf32, #tpu.memory_space<vmem>>, vector<5x8xf32>
    tpu.vector_store %arg23[%c0_39, %c0_40], %73 {strides = array<i32>} : memref<10x32xf32, #tpu.memory_space<vmem>>, vector<5x8xf32>,
    %75 = vector.extract_strided_slice %54 {offsets = [0, 8], sizes = [5, 8], strides = [1, 1]} : vector<10x32xf32> to vector<5x8xf32>
    %76 = vector.extract_strided_slice %55 {offsets = [0, 8], sizes = [5, 8], strides = [1, 1]} : vector<10x32xf32> to vector<5x8xf32>
    %77 = vector.extract_strided_slice %56 {offsets = [0, 8], sizes = [5, 8], strides = [1, 1]} : vector<10x32xf32> to vector<5x8xf32>
    %cst_41 = arith.constant dense<0.000000e+00> : vector<5x5xf32>
    %78 = tpu.matmul %75, %76, %cst_41 {dimension_numbers = #tpu.dot_dimension_numbers<[1], [1], [0], [0], [0, 0, 1, 0], [], []>} : vector<5x8xf32>, vector<5x8xf32>, vector<5x5xf32> -> vector<5x5xf32>
    %cst_42 = arith.constant 0.353553385 : f32
    %79 = vector.broadcast %cst_42 : f32 to vector<5x5xf32>
    %80 = arith.mulf %78, %79 : vector<5x5xf32>
    %cst_43 = arith.constant dense<0xFF800000> : vector<5xf32>
    %81 = vector.multi_reduction <maximumf>, %80, %cst_43 [1] : vector<5x5xf32> to vector<5xf32>
    %82 = vector.shape_cast %81 : vector<5xf32> to vector<5x1xf32>
    %83 = vector.broadcast %82 : vector<5x1xf32> to vector<5x5xf32>
    %84 = arith.subf %80, %83 : vector<5x5xf32>
    %85 = math.exp %84 : vector<5x5xf32>
    %cst_44 = arith.constant dense<0.000000e+00> : vector<5xf32>
    %86 = vector.multi_reduction <add>, %85, %cst_44 [1] : vector<5x5xf32> to vector<5xf32>
    %87 = vector.shape_cast %86 : vector<5xf32> to vector<5x1xf32>
    %88 = tpu.reciprocal %87 {approx = true} : vector<5x1xf32> -> vector<5x1xf32>
    %89 = vector.broadcast %88 : vector<5x1xf32> to vector<5x5xf32>
    %90 = arith.mulf %85, %89 : vector<5x5xf32>
    %cst_45 = arith.constant dense<0.000000e+00> : vector<5x8xf32>
    %91 = tpu.matmul %90, %77, %cst_45 {dimension_numbers = #tpu.dot_dimension_numbers<[1], [0], [0], [1], [0, 0, 1, 1], [], []>} : vector<5x5xf32>, vector<5x8xf32>, vector<5x8xf32> -> vector<5x8xf32>
    %c0_46 = arith.constant 0 : index
    %c8 = arith.constant 8 : index
    %92 = vector.load %arg23[%c0_46, %c8] : memref<10x32xf32, #tpu.memory_space<vmem>>, vector<5x8xf32>
    tpu.vector_store %arg23[%c0_46, %c8], %91 {strides = array<i32>} : memref<10x32xf32, #tpu.memory_space<vmem>>, vector<5x8xf32>,
    %93 = vector.extract_strided_slice %54 {offsets = [0, 16], sizes = [5, 8], strides = [1, 1]} : vector<10x32xf32> to vector<5x8xf32>
    %94 = vector.extract_strided_slice %55 {offsets = [0, 16], sizes = [5, 8], strides = [1, 1]} : vector<10x32xf32> to vector<5x8xf32>
    %95 = vector.extract_strided_slice %56 {offsets = [0, 16], sizes = [5, 8], strides = [1, 1]} : vector<10x32xf32> to vector<5x8xf32>
    %cst_47 = arith.constant dense<0.000000e+00> : vector<5x5xf32>
    %96 = tpu.matmul %93, %94, %cst_47 {dimension_numbers = #tpu.dot_dimension_numbers<[1], [1], [0], [0], [0, 0, 1, 0], [], []>} : vector<5x8xf32>, vector<5x8xf32>, vector<5x5xf32> -> vector<5x5xf32>
    %cst_48 = arith.constant 0.353553385 : f32
    %97 = vector.broadcast %cst_48 : f32 to vector<5x5xf32>
    %98 = arith.mulf %96, %97 : vector<5x5xf32>
    %cst_49 = arith.constant dense<0xFF800000> : vector<5xf32>
    %99 = vector.multi_reduction <maximumf>, %98, %cst_49 [1] : vector<5x5xf32> to vector<5xf32>
    %100 = vector.shape_cast %99 : vector<5xf32> to vector<5x1xf32>
    %101 = vector.broadcast %100 : vector<5x1xf32> to vector<5x5xf32>
    %102 = arith.subf %98, %101 : vector<5x5xf32>
    %103 = math.exp %102 : vector<5x5xf32>
    %cst_50 = arith.constant dense<0.000000e+00> : vector<5xf32>
    %104 = vector.multi_reduction <add>, %103, %cst_50 [1] : vector<5x5xf32> to vector<5xf32>
    %105 = vector.shape_cast %104 : vector<5xf32> to vector<5x1xf32>
    %106 = tpu.reciprocal %105 {approx = true} : vector<5x1xf32> -> vector<5x1xf32>
    %107 = vector.broadcast %106 : vector<5x1xf32> to vector<5x5xf32>
    %108 = arith.mulf %103, %107 : vector<5x5xf32>
    %cst_51 = arith.constant dense<0.000000e+00> : vector<5x8xf32>
    %109 = tpu.matmul %108, %95, %cst_51 {dimension_numbers = #tpu.dot_dimension_numbers<[1], [0], [0], [1], [0, 0, 1, 1], [], []>} : vector<5x5xf32>, vector<5x8xf32>, vector<5x8xf32> -> vector<5x8xf32>
    %c0_52 = arith.constant 0 : index
    %c16 = arith.constant 16 : index
    %110 = vector.load %arg23[%c0_52, %c16] : memref<10x32xf32, #tpu.memory_space<vmem>>, vector<5x8xf32>
    tpu.vector_store %arg23[%c0_52, %c16], %109 {strides = array<i32>} : memref<10x32xf32, #tpu.memory_space<vmem>>, vector<5x8xf32>,
    %111 = vector.extract_strided_slice %54 {offsets = [0, 24], sizes = [5, 8], strides = [1, 1]} : vector<10x32xf32> to vector<5x8xf32>
    %112 = vector.extract_strided_slice %55 {offsets = [0, 24], sizes = [5, 8], strides = [1, 1]} : vector<10x32xf32> to vector<5x8xf32>
    %113 = vector.extract_strided_slice %56 {offsets = [0, 24], sizes = [5, 8], strides = [1, 1]} : vector<10x32xf32> to vector<5x8xf32>
    %cst_53 = arith.constant dense<0.000000e+00> : vector<5x5xf32>
    %114 = tpu.matmul %111, %112, %cst_53 {dimension_numbers = #tpu.dot_dimension_numbers<[1], [1], [0], [0], [0, 0, 1, 0], [], []>} : vector<5x8xf32>, vector<5x8xf32>, vector<5x5xf32> -> vector<5x5xf32>
    %cst_54 = arith.constant 0.353553385 : f32
    %115 = vector.broadcast %cst_54 : f32 to vector<5x5xf32>
    %116 = arith.mulf %114, %115 : vector<5x5xf32>
    %cst_55 = arith.constant dense<0xFF800000> : vector<5xf32>
    %117 = vector.multi_reduction <maximumf>, %116, %cst_55 [1] : vector<5x5xf32> to vector<5xf32>
    %118 = vector.shape_cast %117 : vector<5xf32> to vector<5x1xf32>
    %119 = vector.broadcast %118 : vector<5x1xf32> to vector<5x5xf32>
    %120 = arith.subf %116, %119 : vector<5x5xf32>
    %121 = math.exp %120 : vector<5x5xf32>
    %cst_56 = arith.constant dense<0.000000e+00> : vector<5xf32>
    %122 = vector.multi_reduction <add>, %121, %cst_56 [1] : vector<5x5xf32> to vector<5xf32>
    %123 = vector.shape_cast %122 : vector<5xf32> to vector<5x1xf32>
    %124 = tpu.reciprocal %123 {approx = true} : vector<5x1xf32> -> vector<5x1xf32>
    %125 = vector.broadcast %124 : vector<5x1xf32> to vector<5x5xf32>
    %126 = arith.mulf %121, %125 : vector<5x5xf32>
    %cst_57 = arith.constant dense<0.000000e+00> : vector<5x8xf32>
    %127 = tpu.matmul %126, %113, %cst_57 {dimension_numbers = #tpu.dot_dimension_numbers<[1], [0], [0], [1], [0, 0, 1, 1], [], []>} : vector<5x5xf32>, vector<5x8xf32>, vector<5x8xf32> -> vector<5x8xf32>
    %c0_58 = arith.constant 0 : index
    %c24 = arith.constant 24 : index
    %128 = vector.load %arg23[%c0_58, %c24] : memref<10x32xf32, #tpu.memory_space<vmem>>, vector<5x8xf32>
    tpu.vector_store %arg23[%c0_58, %c24], %127 {strides = array<i32>} : memref<10x32xf32, #tpu.memory_space<vmem>>, vector<5x8xf32>,
    %129 = vector.extract_strided_slice %54 {offsets = [5, 0], sizes = [5, 8], strides = [1, 1]} : vector<10x32xf32> to vector<5x8xf32>
    %130 = vector.extract_strided_slice %55 {offsets = [5, 0], sizes = [5, 8], strides = [1, 1]} : vector<10x32xf32> to vector<5x8xf32>
    %131 = vector.extract_strided_slice %56 {offsets = [5, 0], sizes = [5, 8], strides = [1, 1]} : vector<10x32xf32> to vector<5x8xf32>
    %cst_59 = arith.constant dense<0.000000e+00> : vector<5x5xf32>
    %132 = tpu.matmul %129, %130, %cst_59 {dimension_numbers = #tpu.dot_dimension_numbers<[1], [1], [0], [0], [0, 0, 1, 0], [], []>} : vector<5x8xf32>, vector<5x8xf32>, vector<5x5xf32> -> vector<5x5xf32>
    %cst_60 = arith.constant 0.353553385 : f32
    %133 = vector.broadcast %cst_60 : f32 to vector<5x5xf32>
    %134 = arith.mulf %132, %133 : vector<5x5xf32>
    %cst_61 = arith.constant dense<0xFF800000> : vector<5xf32>
    %135 = vector.multi_reduction <maximumf>, %134, %cst_61 [1] : vector<5x5xf32> to vector<5xf32>
    %136 = vector.shape_cast %135 : vector<5xf32> to vector<5x1xf32>
    %137 = vector.broadcast %136 : vector<5x1xf32> to vector<5x5xf32>
    %138 = arith.subf %134, %137 : vector<5x5xf32>
    %139 = math.exp %138 : vector<5x5xf32>
    %cst_62 = arith.constant dense<0.000000e+00> : vector<5xf32>
    %140 = vector.multi_reduction <add>, %139, %cst_62 [1] : vector<5x5xf32> to vector<5xf32>
    %141 = vector.shape_cast %140 : vector<5xf32> to vector<5x1xf32>
    %142 = tpu.reciprocal %141 {approx = true} : vector<5x1xf32> -> vector<5x1xf32>
    %143 = vector.broadcast %142 : vector<5x1xf32> to vector<5x5xf32>
    %144 = arith.mulf %139, %143 : vector<5x5xf32>
    %cst_63 = arith.constant dense<0.000000e+00> : vector<5x8xf32>
    %145 = tpu.matmul %144, %131, %cst_63 {dimension_numbers = #tpu.dot_dimension_numbers<[1], [0], [0], [1], [0, 0, 1, 1], [], []>} : vector<5x5xf32>, vector<5x8xf32>, vector<5x8xf32> -> vector<5x8xf32>
    %c5_64 = arith.constant 5 : index
    %c0_65 = arith.constant 0 : index
    %146 = vector.load %arg23[%c5_64, %c0_65] : memref<10x32xf32, #tpu.memory_space<vmem>>, vector<5x8xf32>
    tpu.vector_store %arg23[%c5_64, %c0_65], %145 {strides = array<i32>} : memref<10x32xf32, #tpu.memory_space<vmem>>, vector<5x8xf32>,
    %147 = vector.extract_strided_slice %54 {offsets = [5, 8], sizes = [5, 8], strides = [1, 1]} : vector<10x32xf32> to vector<5x8xf32>
    %148 = vector.extract_strided_slice %55 {offsets = [5, 8], sizes = [5, 8], strides = [1, 1]} : vector<10x32xf32> to vector<5x8xf32>
    %149 = vector.extract_strided_slice %56 {offsets = [5, 8], sizes = [5, 8], strides = [1, 1]} : vector<10x32xf32> to vector<5x8xf32>
    %cst_66 = arith.constant dense<0.000000e+00> : vector<5x5xf32>
    %150 = tpu.matmul %147, %148, %cst_66 {dimension_numbers = #tpu.dot_dimension_numbers<[1], [1], [0], [0], [0, 0, 1, 0], [], []>} : vector<5x8xf32>, vector<5x8xf32>, vector<5x5xf32> -> vector<5x5xf32>
    %cst_67 = arith.constant 0.353553385 : f32
    %151 = vector.broadcast %cst_67 : f32 to vector<5x5xf32>
    %152 = arith.mulf %150, %151 : vector<5x5xf32>
    %cst_68 = arith.constant dense<0xFF800000> : vector<5xf32>
    %153 = vector.multi_reduction <maximumf>, %152, %cst_68 [1] : vector<5x5xf32> to vector<5xf32>
    %154 = vector.shape_cast %153 : vector<5xf32> to vector<5x1xf32>
    %155 = vector.broadcast %154 : vector<5x1xf32> to vector<5x5xf32>
    %156 = arith.subf %152, %155 : vector<5x5xf32>
    %157 = math.exp %156 : vector<5x5xf32>
    %cst_69 = arith.constant dense<0.000000e+00> : vector<5xf32>
    %158 = vector.multi_reduction <add>, %157, %cst_69 [1] : vector<5x5xf32> to vector<5xf32>
    %159 = vector.shape_cast %158 : vector<5xf32> to vector<5x1xf32>
    %160 = tpu.reciprocal %159 {approx = true} : vector<5x1xf32> -> vector<5x1xf32>
    %161 = vector.broadcast %160 : vector<5x1xf32> to vector<5x5xf32>
    %162 = arith.mulf %157, %161 : vector<5x5xf32>
    %cst_70 = arith.constant dense<0.000000e+00> : vector<5x8xf32>
    %163 = tpu.matmul %162, %149, %cst_70 {dimension_numbers = #tpu.dot_dimension_numbers<[1], [0], [0], [1], [0, 0, 1, 1], [], []>} : vector<5x5xf32>, vector<5x8xf32>, vector<5x8xf32> -> vector<5x8xf32>
    %c5_71 = arith.constant 5 : index
    %c8_72 = arith.constant 8 : index
    %164 = vector.load %arg23[%c5_71, %c8_72] : memref<10x32xf32, #tpu.memory_space<vmem>>, vector<5x8xf32>
    tpu.vector_store %arg23[%c5_71, %c8_72], %163 {strides = array<i32>} : memref<10x32xf32, #tpu.memory_space<vmem>>, vector<5x8xf32>,
    %165 = vector.extract_strided_slice %54 {offsets = [5, 16], sizes = [5, 8], strides = [1, 1]} : vector<10x32xf32> to vector<5x8xf32>
    %166 = vector.extract_strided_slice %55 {offsets = [5, 16], sizes = [5, 8], strides = [1, 1]} : vector<10x32xf32> to vector<5x8xf32>
    %167 = vector.extract_strided_slice %56 {offsets = [5, 16], sizes = [5, 8], strides = [1, 1]} : vector<10x32xf32> to vector<5x8xf32>
    %cst_73 = arith.constant dense<0.000000e+00> : vector<5x5xf32>
    %168 = tpu.matmul %165, %166, %cst_73 {dimension_numbers = #tpu.dot_dimension_numbers<[1], [1], [0], [0], [0, 0, 1, 0], [], []>} : vector<5x8xf32>, vector<5x8xf32>, vector<5x5xf32> -> vector<5x5xf32>
    %cst_74 = arith.constant 0.353553385 : f32
    %169 = vector.broadcast %cst_74 : f32 to vector<5x5xf32>
    %170 = arith.mulf %168, %169 : vector<5x5xf32>
    %cst_75 = arith.constant dense<0xFF800000> : vector<5xf32>
    %171 = vector.multi_reduction <maximumf>, %170, %cst_75 [1] : vector<5x5xf32> to vector<5xf32>
    %172 = vector.shape_cast %171 : vector<5xf32> to vector<5x1xf32>
    %173 = vector.broadcast %172 : vector<5x1xf32> to vector<5x5xf32>
    %174 = arith.subf %170, %173 : vector<5x5xf32>
    %175 = math.exp %174 : vector<5x5xf32>
    %cst_76 = arith.constant dense<0.000000e+00> : vector<5xf32>
    %176 = vector.multi_reduction <add>, %175, %cst_76 [1] : vector<5x5xf32> to vector<5xf32>
    %177 = vector.shape_cast %176 : vector<5xf32> to vector<5x1xf32>
    %178 = tpu.reciprocal %177 {approx = true} : vector<5x1xf32> -> vector<5x1xf32>
    %179 = vector.broadcast %178 : vector<5x1xf32> to vector<5x5xf32>
    %180 = arith.mulf %175, %179 : vector<5x5xf32>
    %cst_77 = arith.constant dense<0.000000e+00> : vector<5x8xf32>
    %181 = tpu.matmul %180, %167, %cst_77 {dimension_numbers = #tpu.dot_dimension_numbers<[1], [0], [0], [1], [0, 0, 1, 1], [], []>} : vector<5x5xf32>, vector<5x8xf32>, vector<5x8xf32> -> vector<5x8xf32>
    %c5_78 = arith.constant 5 : index
    %c16_79 = arith.constant 16 : index
    %182 = vector.load %arg23[%c5_78, %c16_79] : memref<10x32xf32, #tpu.memory_space<vmem>>, vector<5x8xf32>
    tpu.vector_store %arg23[%c5_78, %c16_79], %181 {strides = array<i32>} : memref<10x32xf32, #tpu.memory_space<vmem>>, vector<5x8xf32>,
    %183 = vector.extract_strided_slice %54 {offsets = [5, 24], sizes = [5, 8], strides = [1, 1]} : vector<10x32xf32> to vector<5x8xf32>
    %184 = vector.extract_strided_slice %55 {offsets = [5, 24], sizes = [5, 8], strides = [1, 1]} : vector<10x32xf32> to vector<5x8xf32>
    %185 = vector.extract_strided_slice %56 {offsets = [5, 24], sizes = [5, 8], strides = [1, 1]} : vector<10x32xf32> to vector<5x8xf32>
    %cst_80 = arith.constant dense<0.000000e+00> : vector<5x5xf32>
    %186 = tpu.matmul %183, %184, %cst_80 {dimension_numbers = #tpu.dot_dimension_numbers<[1], [1], [0], [0], [0, 0, 1, 0], [], []>} : vector<5x8xf32>, vector<5x8xf32>, vector<5x5xf32> -> vector<5x5xf32>
    %cst_81 = arith.constant 0.353553385 : f32
    %187 = vector.broadcast %cst_81 : f32 to vector<5x5xf32>
    %188 = arith.mulf %186, %187 : vector<5x5xf32>
    %cst_82 = arith.constant dense<0xFF800000> : vector<5xf32>
    %189 = vector.multi_reduction <maximumf>, %188, %cst_82 [1] : vector<5x5xf32> to vector<5xf32>
    %190 = vector.shape_cast %189 : vector<5xf32> to vector<5x1xf32>
    %191 = vector.broadcast %190 : vector<5x1xf32> to vector<5x5xf32>
    %192 = arith.subf %188, %191 : vector<5x5xf32>
    %193 = math.exp %192 : vector<5x5xf32>
    %cst_83 = arith.constant dense<0.000000e+00> : vector<5xf32>
    %194 = vector.multi_reduction <add>, %193, %cst_83 [1] : vector<5x5xf32> to vector<5xf32>
    %195 = vector.shape_cast %194 : vector<5xf32> to vector<5x1xf32>
    %196 = tpu.reciprocal %195 {approx = true} : vector<5x1xf32> -> vector<5x1xf32>
    %197 = vector.broadcast %196 : vector<5x1xf32> to vector<5x5xf32>
    %198 = arith.mulf %193, %197 : vector<5x5xf32>
    %cst_84 = arith.constant dense<0.000000e+00> : vector<5x8xf32>
    %199 = tpu.matmul %198, %185, %cst_84 {dimension_numbers = #tpu.dot_dimension_numbers<[1], [0], [0], [1], [0, 0, 1, 1], [], []>} : vector<5x5xf32>, vector<5x8xf32>, vector<5x8xf32> -> vector<5x8xf32>
    %c5_85 = arith.constant 5 : index
    %c24_86 = arith.constant 24 : index
    %200 = vector.load %arg23[%c5_85, %c24_86] : memref<10x32xf32, #tpu.memory_space<vmem>>, vector<5x8xf32>
    tpu.vector_store %arg23[%c5_85, %c24_86], %199 {strides = array<i32>} : memref<10x32xf32, #tpu.memory_space<vmem>>, vector<5x8xf32>,
    %c0_87 = arith.constant 0 : index
    %c0_88 = arith.constant 0 : index
    %201 = vector.load %arg23[%c0_87, %c0_88] : memref<10x32xf32, #tpu.memory_space<vmem>>, vector<10x32xf32>
    %c0_89 = arith.constant 0 : index
    %c0_90 = arith.constant 0 : index
    %c0_91 = arith.constant 0 : index
    %202 = vector.load %arg9[%c0_89, %c0_90, %c0_91] : memref<2x32x32xf32, #tpu.memory_space<vmem>>, vector<1x32x32xf32>
    %203 = vector.shape_cast %202 : vector<1x32x32xf32> to vector<32x32xf32>
    %cst_92 = arith.constant dense<0.000000e+00> : vector<10x32xf32>
    %204 = tpu.matmul %201, %203, %cst_92 {dimension_numbers = #tpu.dot_dimension_numbers<[1], [0], [0], [1], [0, 0, 1, 1], [], []>} : vector<10x32xf32>, vector<32x32xf32>, vector<10x32xf32> -> vector<10x32xf32>
    %c0_93 = arith.constant 0 : index
    %c0_94 = arith.constant 0 : index
    %c0_95 = arith.constant 0 : index
    %205 = vector.load %arg10[%c0_93, %c0_94, %c0_95] : memref<2x1x32xf32, #tpu.memory_space<vmem>>, vector<1x1x32xf32>
    %206 = vector.shape_cast %205 : vector<1x1x32xf32> to vector<1x32xf32>
    %207 = vector.broadcast %206 : vector<1x32xf32> to vector<10x32xf32>
    %208 = arith.addf %204, %207 : vector<10x32xf32>
    %209 = arith.addf %22, %208 : vector<10x32xf32>
    %c0_96 = arith.constant 0 : index
    %c0_97 = arith.constant 0 : index
    %c0_98 = arith.constant 0 : index
    %210 = vector.load %arg11[%c0_96, %c0_97, %c0_98] : memref<2x1x32xf32, #tpu.memory_space<vmem>>, vector<1x1x32xf32>
    %211 = vector.shape_cast %210 : vector<1x1x32xf32> to vector<1x32xf32>
    %c0_99 = arith.constant 0 : index
    %c0_100 = arith.constant 0 : index
    %c0_101 = arith.constant 0 : index
    %212 = vector.load %arg12[%c0_99, %c0_100, %c0_101] : memref<2x1x32xf32, #tpu.memory_space<vmem>>, vector<1x1x32xf32>
    %213 = vector.shape_cast %212 : vector<1x1x32xf32> to vector<1x32xf32>
    %cst_102 = arith.constant dense<0.000000e+00> : vector<10xf32>
    %214 = vector.multi_reduction <add>, %209, %cst_102 [1] : vector<10x32xf32> to vector<10xf32>
    %215 = vector.shape_cast %214 : vector<10xf32> to vector<10x1xf32>
    %cst_103 = arith.constant 3.200000e+01 : f32
    %216 = vector.broadcast %cst_103 : f32 to vector<10x1xf32>
    %217 = arith.divf %215, %216 : vector<10x1xf32>
    %218 = vector.broadcast %217 : vector<10x1xf32> to vector<10x32xf32>
    %219 = arith.subf %209, %218 : vector<10x32xf32>
    %220 = arith.mulf %219, %219 : vector<10x32xf32>
    %cst_104 = arith.constant dense<0.000000e+00> : vector<10xf32>
    %221 = vector.multi_reduction <add>, %220, %cst_104 [1] : vector<10x32xf32> to vector<10xf32>
    %222 = vector.shape_cast %221 : vector<10xf32> to vector<10x1xf32>
    %cst_105 = arith.constant 3.200000e+01 : f32
    %223 = vector.broadcast %cst_105 : f32 to vector<10x1xf32>
    %224 = arith.divf %222, %223 : vector<10x1xf32>
    %cst_106 = arith.constant 9.99999974E-6 : f32
    %225 = vector.broadcast %cst_106 : f32 to vector<10x1xf32>
    %226 = arith.addf %224, %225 : vector<10x1xf32>
    %227 = math.rsqrt %226 : vector<10x1xf32>
    %228 = vector.broadcast %227 : vector<10x1xf32> to vector<10x32xf32>
    %229 = arith.mulf %219, %228 : vector<10x32xf32>
    %230 = vector.broadcast %211 : vector<1x32xf32> to vector<10x32xf32>
    %231 = arith.mulf %229, %230 : vector<10x32xf32>
    %232 = vector.broadcast %213 : vector<1x32xf32> to vector<10x32xf32>
    %233 = arith.addf %231, %232 : vector<10x32xf32>
    %c0_107 = arith.constant 0 : index
    %c0_108 = arith.constant 0 : index
    %c0_109 = arith.constant 0 : index
    %234 = vector.load %arg13[%c0_107, %c0_108, %c0_109] : memref<2x32x128xf32, #tpu.memory_space<vmem>>, vector<1x32x128xf32>
    %235 = vector.shape_cast %234 : vector<1x32x128xf32> to vector<32x128xf32>
    %cst_110 = arith.constant dense<0.000000e+00> : vector<10x128xf32>
    %236 = tpu.matmul %233, %235, %cst_110 {dimension_numbers = #tpu.dot_dimension_numbers<[1], [0], [0], [1], [0, 0, 1, 1], [], []>} : vector<10x32xf32>, vector<32x128xf32>, vector<10x128xf32> -> vector<10x128xf32>
    %c0_111 = arith.constant 0 : index
    %c0_112 = arith.constant 0 : index
    %c0_113 = arith.constant 0 : index
    %237 = vector.load %arg14[%c0_111, %c0_112, %c0_113] : memref<2x1x128xf32, #tpu.memory_space<vmem>>, vector<1x1x128xf32>
    %238 = vector.shape_cast %237 : vector<1x1x128xf32> to vector<1x128xf32>
    %239 = vector.broadcast %238 : vector<1x128xf32> to vector<10x128xf32>
    %240 = arith.addf %236, %239 : vector<10x128xf32>
    %cst_114 = arith.constant 5.000000e-01 : f32
    %241 = vector.broadcast %cst_114 : f32 to vector<10x128xf32>
    %242 = arith.mulf %241, %240 : vector<10x128xf32>
    %cst_115 = arith.constant 0.707106769 : f32
    %243 = vector.broadcast %cst_115 : f32 to vector<10x128xf32>
    %244 = arith.mulf %240, %243 : vector<10x128xf32>
    %cst_116 = arith.constant 0.000000e+00 : f32
    %245 = vector.broadcast %cst_116 : f32 to vector<10x128xf32>
    %246 = arith.cmpf oge, %244, %245 : vector<10x128xf32>
    %cst_117 = arith.constant 1.000000e+00 : f32
    %cst_118 = arith.constant -1.000000e+00 : f32
    %247 = vector.broadcast %cst_117 : f32 to vector<10x128xf32>
    %248 = vector.broadcast %cst_118 : f32 to vector<10x128xf32>
    %249 = arith.select %246, %247, %248 : vector<10x128xi1>, vector<10x128xf32>
    %250 = math.absf %244 : vector<10x128xf32>
    %cst_119 = arith.constant 0.327591091 : f32
    %251 = vector.broadcast %cst_119 : f32 to vector<10x128xf32>
    %252 = arith.mulf %251, %250 : vector<10x128xf32>
    %cst_120 = arith.constant 1.000000e+00 : f32
    %253 = vector.broadcast %cst_120 : f32 to vector<10x128xf32>
    %254 = arith.addf %253, %252 : vector<10x128xf32>
    %cst_121 = arith.constant 1.000000e+00 : f32
    %255 = vector.broadcast %cst_121 : f32 to vector<10x128xf32>
    %256 = arith.divf %255, %254 : vector<10x128xf32>
    %cst_122 = arith.constant 1.06140542 : f32
    %257 = vector.broadcast %cst_122 : f32 to vector<10x128xf32>
    %258 = arith.mulf %257, %256 : vector<10x128xf32>
    %cst_123 = arith.constant -1.45315206 : f32
    %259 = vector.broadcast %cst_123 : f32 to vector<10x128xf32>
    %260 = arith.addf %258, %259 : vector<10x128xf32>
    %261 = arith.mulf %260, %256 : vector<10x128xf32>
    %cst_124 = arith.constant 1.42141378 : f32
    %262 = vector.broadcast %cst_124 : f32 to vector<10x128xf32>
    %263 = arith.addf %261, %262 : vector<10x128xf32>
    %264 = arith.mulf %263, %256 : vector<10x128xf32>
    %cst_125 = arith.constant -0.284496725 : f32
    %265 = vector.broadcast %cst_125 : f32 to vector<10x128xf32>
    %266 = arith.addf %264, %265 : vector<10x128xf32>
    %267 = arith.mulf %266, %256 : vector<10x128xf32>
    %cst_126 = arith.constant 0.254829586 : f32
    %268 = vector.broadcast %cst_126 : f32 to vector<10x128xf32>
    %269 = arith.addf %267, %268 : vector<10x128xf32>
    %270 = arith.mulf %269, %256 : vector<10x128xf32>
    %cst_127 = arith.constant 0.000000e+00 : f32
    %271 = vector.broadcast %cst_127 : f32 to vector<10x128xf32>
    %272 = arith.subf %271, %250 : vector<10x128xf32>
    %273 = arith.mulf %272, %250 : vector<10x128xf32>
    %274 = math.exp %273 : vector<10x128xf32>
    %275 = arith.mulf %270, %274 : vector<10x128xf32>
    %cst_128 = arith.constant 1.000000e+00 : f32
    %276 = vector.broadcast %cst_128 : f32 to vector<10x128xf32>
    %277 = arith.subf %276, %275 : vector<10x128xf32>
    %278 = arith.mulf %249, %277 : vector<10x128xf32>
    %cst_129 = arith.constant 1.000000e+00 : f32
    %279 = vector.broadcast %cst_129 : f32 to vector<10x128xf32>
    %280 = arith.addf %279, %278 : vector<10x128xf32>
    %281 = arith.mulf %242, %280 : vector<10x128xf32>
    %c0_130 = arith.constant 0 : index
    %c0_131 = arith.constant 0 : index
    %c0_132 = arith.constant 0 : index
    %282 = vector.load %arg15[%c0_130, %c0_131, %c0_132] : memref<2x128x32xf32, #tpu.memory_space<vmem>>, vector<1x128x32xf32>
    %283 = vector.shape_cast %282 : vector<1x128x32xf32> to vector<128x32xf32>
    %cst_133 = arith.constant dense<0.000000e+00> : vector<10x32xf32>
    %284 = tpu.matmul %281, %283, %cst_133 {dimension_numbers = #tpu.dot_dimension_numbers<[1], [0], [0], [1], [0, 0, 1, 1], [], []>} : vector<10x128xf32>, vector<128x32xf32>, vector<10x32xf32> -> vector<10x32xf32>
    %c0_134 = arith.constant 0 : index
    %c0_135 = arith.constant 0 : index
    %c0_136 = arith.constant 0 : index
    %285 = vector.load %arg16[%c0_134, %c0_135, %c0_136] : memref<2x1x32xf32, #tpu.memory_space<vmem>>, vector<1x1x32xf32>
    %286 = vector.shape_cast %285 : vector<1x1x32xf32> to vector<1x32xf32>
    %287 = vector.broadcast %286 : vector<1x32xf32> to vector<10x32xf32>
    %288 = arith.addf %284, %287 : vector<10x32xf32>
    %289 = arith.addf %209, %288 : vector<10x32xf32>
    %c0_137 = arith.constant 0 : index
    %c0_138 = arith.constant 0 : index
    %290 = vector.load %arg22[%c0_137, %c0_138] : memref<10x32xf32, #tpu.memory_space<vmem>>, vector<10x32xf32>
    tpu.vector_store %arg22[%c0_137, %c0_138], %289 {strides = array<i32>} : memref<10x32xf32, #tpu.memory_space<vmem>>, vector<10x32xf32>,
    %c0_139 = arith.constant 0 : index
    %c0_140 = arith.constant 0 : index
    %291 = vector.load %arg22[%c0_139, %c0_140] : memref<10x32xf32, #tpu.memory_space<vmem>>, vector<10x32xf32>
    %c1_141 = arith.constant 1 : index
    %c0_142 = arith.constant 0 : index
    %c0_143 = arith.constant 0 : index
    %292 = vector.load %arg5[%c1_141, %c0_142, %c0_143] : memref<2x1x32xf32, #tpu.memory_space<vmem>>, vector<1x1x32xf32>
    %293 = vector.shape_cast %292 : vector<1x1x32xf32> to vector<1x32xf32>
    %c1_144 = arith.constant 1 : index
    %c0_145 = arith.constant 0 : index
    %c0_146 = arith.constant 0 : index
    %294 = vector.load %arg6[%c1_144, %c0_145, %c0_146] : memref<2x1x32xf32, #tpu.memory_space<vmem>>, vector<1x1x32xf32>
    %295 = vector.shape_cast %294 : vector<1x1x32xf32> to vector<1x32xf32>
    %cst_147 = arith.constant dense<0.000000e+00> : vector<10xf32>
    %296 = vector.multi_reduction <add>, %291, %cst_147 [1] : vector<10x32xf32> to vector<10xf32>
    %297 = vector.shape_cast %296 : vector<10xf32> to vector<10x1xf32>
    %cst_148 = arith.constant 3.200000e+01 : f32
    %298 = vector.broadcast %cst_148 : f32 to vector<10x1xf32>
    %299 = arith.divf %297, %298 : vector<10x1xf32>
    %300 = vector.broadcast %299 : vector<10x1xf32> to vector<10x32xf32>
    %301 = arith.subf %291, %300 : vector<10x32xf32>
    %302 = arith.mulf %301, %301 : vector<10x32xf32>
    %cst_149 = arith.constant dense<0.000000e+00> : vector<10xf32>
    %303 = vector.multi_reduction <add>, %302, %cst_149 [1] : vector<10x32xf32> to vector<10xf32>
    %304 = vector.shape_cast %303 : vector<10xf32> to vector<10x1xf32>
    %cst_150 = arith.constant 3.200000e+01 : f32
    %305 = vector.broadcast %cst_150 : f32 to vector<10x1xf32>
    %306 = arith.divf %304, %305 : vector<10x1xf32>
    %cst_151 = arith.constant 9.99999974E-6 : f32
    %307 = vector.broadcast %cst_151 : f32 to vector<10x1xf32>
    %308 = arith.addf %306, %307 : vector<10x1xf32>
    %309 = math.rsqrt %308 : vector<10x1xf32>
    %310 = vector.broadcast %309 : vector<10x1xf32> to vector<10x32xf32>
    %311 = arith.mulf %301, %310 : vector<10x32xf32>
    %312 = vector.broadcast %293 : vector<1x32xf32> to vector<10x32xf32>
    %313 = arith.mulf %311, %312 : vector<10x32xf32>
    %314 = vector.broadcast %295 : vector<1x32xf32> to vector<10x32xf32>
    %315 = arith.addf %313, %314 : vector<10x32xf32>
    %c1_152 = arith.constant 1 : index
    %c0_153 = arith.constant 0 : index
    %c0_154 = arith.constant 0 : index
    %316 = vector.load %arg7[%c1_152, %c0_153, %c0_154] : memref<2x32x96xf32, #tpu.memory_space<vmem>>, vector<1x32x96xf32>
    %317 = vector.shape_cast %316 : vector<1x32x96xf32> to vector<32x96xf32>
    %cst_155 = arith.constant dense<0.000000e+00> : vector<10x96xf32>
    %318 = tpu.matmul %315, %317, %cst_155 {dimension_numbers = #tpu.dot_dimension_numbers<[1], [0], [0], [1], [0, 0, 1, 1], [], []>} : vector<10x32xf32>, vector<32x96xf32>, vector<10x96xf32> -> vector<10x96xf32>
    %c1_156 = arith.constant 1 : index
    %c0_157 = arith.constant 0 : index
    %c0_158 = arith.constant 0 : index
    %319 = vector.load %arg8[%c1_156, %c0_157, %c0_158] : memref<2x1x96xf32, #tpu.memory_space<vmem>>, vector<1x1x96xf32>
    %320 = vector.shape_cast %319 : vector<1x1x96xf32> to vector<1x96xf32>
    %321 = vector.broadcast %320 : vector<1x96xf32> to vector<10x96xf32>
    %322 = arith.addf %318, %321 : vector<10x96xf32>
    %323 = vector.extract_strided_slice %322 {offsets = [0, 0], sizes = [10, 32], strides = [1, 1]} : vector<10x96xf32> to vector<10x32xf32>
    %324 = vector.extract_strided_slice %322 {offsets = [0, 32], sizes = [10, 32], strides = [1, 1]} : vector<10x96xf32> to vector<10x32xf32>
    %325 = vector.extract_strided_slice %322 {offsets = [0, 64], sizes = [10, 32], strides = [1, 1]} : vector<10x96xf32> to vector<10x32xf32>
    %326 = vector.extract_strided_slice %323 {offsets = [0, 0], sizes = [5, 8], strides = [1, 1]} : vector<10x32xf32> to vector<5x8xf32>
    %327 = vector.extract_strided_slice %324 {offsets = [0, 0], sizes = [5, 8], strides = [1, 1]} : vector<10x32xf32> to vector<5x8xf32>
    %328 = vector.extract_strided_slice %325 {offsets = [0, 0], sizes = [5, 8], strides = [1, 1]} : vector<10x32xf32> to vector<5x8xf32>
    %cst_159 = arith.constant dense<0.000000e+00> : vector<5x5xf32>
    %329 = tpu.matmul %326, %327, %cst_159 {dimension_numbers = #tpu.dot_dimension_numbers<[1], [1], [0], [0], [0, 0, 1, 0], [], []>} : vector<5x8xf32>, vector<5x8xf32>, vector<5x5xf32> -> vector<5x5xf32>
    %cst_160 = arith.constant 0.353553385 : f32
    %330 = vector.broadcast %cst_160 : f32 to vector<5x5xf32>
    %331 = arith.mulf %329, %330 : vector<5x5xf32>
    %cst_161 = arith.constant dense<0xFF800000> : vector<5xf32>
    %332 = vector.multi_reduction <maximumf>, %331, %cst_161 [1] : vector<5x5xf32> to vector<5xf32>
    %333 = vector.shape_cast %332 : vector<5xf32> to vector<5x1xf32>
    %334 = vector.broadcast %333 : vector<5x1xf32> to vector<5x5xf32>
    %335 = arith.subf %331, %334 : vector<5x5xf32>
    %336 = math.exp %335 : vector<5x5xf32>
    %cst_162 = arith.constant dense<0.000000e+00> : vector<5xf32>
    %337 = vector.multi_reduction <add>, %336, %cst_162 [1] : vector<5x5xf32> to vector<5xf32>
    %338 = vector.shape_cast %337 : vector<5xf32> to vector<5x1xf32>
    %339 = tpu.reciprocal %338 {approx = true} : vector<5x1xf32> -> vector<5x1xf32>
    %340 = vector.broadcast %339 : vector<5x1xf32> to vector<5x5xf32>
    %341 = arith.mulf %336, %340 : vector<5x5xf32>
    %cst_163 = arith.constant dense<0.000000e+00> : vector<5x8xf32>
    %342 = tpu.matmul %341, %328, %cst_163 {dimension_numbers = #tpu.dot_dimension_numbers<[1], [0], [0], [1], [0, 0, 1, 1], [], []>} : vector<5x5xf32>, vector<5x8xf32>, vector<5x8xf32> -> vector<5x8xf32>
    %c0_164 = arith.constant 0 : index
    %c0_165 = arith.constant 0 : index
    %343 = vector.load %arg23[%c0_164, %c0_165] : memref<10x32xf32, #tpu.memory_space<vmem>>, vector<5x8xf32>
    tpu.vector_store %arg23[%c0_164, %c0_165], %342 {strides = array<i32>} : memref<10x32xf32, #tpu.memory_space<vmem>>, vector<5x8xf32>,
    %344 = vector.extract_strided_slice %323 {offsets = [0, 8], sizes = [5, 8], strides = [1, 1]} : vector<10x32xf32> to vector<5x8xf32>
    %345 = vector.extract_strided_slice %324 {offsets = [0, 8], sizes = [5, 8], strides = [1, 1]} : vector<10x32xf32> to vector<5x8xf32>
    %346 = vector.extract_strided_slice %325 {offsets = [0, 8], sizes = [5, 8], strides = [1, 1]} : vector<10x32xf32> to vector<5x8xf32>
    %cst_166 = arith.constant dense<0.000000e+00> : vector<5x5xf32>
    %347 = tpu.matmul %344, %345, %cst_166 {dimension_numbers = #tpu.dot_dimension_numbers<[1], [1], [0], [0], [0, 0, 1, 0], [], []>} : vector<5x8xf32>, vector<5x8xf32>, vector<5x5xf32> -> vector<5x5xf32>
    %cst_167 = arith.constant 0.353553385 : f32
    %348 = vector.broadcast %cst_167 : f32 to vector<5x5xf32>
    %349 = arith.mulf %347, %348 : vector<5x5xf32>
    %cst_168 = arith.constant dense<0xFF800000> : vector<5xf32>
    %350 = vector.multi_reduction <maximumf>, %349, %cst_168 [1] : vector<5x5xf32> to vector<5xf32>
    %351 = vector.shape_cast %350 : vector<5xf32> to vector<5x1xf32>
    %352 = vector.broadcast %351 : vector<5x1xf32> to vector<5x5xf32>
    %353 = arith.subf %349, %352 : vector<5x5xf32>
    %354 = math.exp %353 : vector<5x5xf32>
    %cst_169 = arith.constant dense<0.000000e+00> : vector<5xf32>
    %355 = vector.multi_reduction <add>, %354, %cst_169 [1] : vector<5x5xf32> to vector<5xf32>
    %356 = vector.shape_cast %355 : vector<5xf32> to vector<5x1xf32>
    %357 = tpu.reciprocal %356 {approx = true} : vector<5x1xf32> -> vector<5x1xf32>
    %358 = vector.broadcast %357 : vector<5x1xf32> to vector<5x5xf32>
    %359 = arith.mulf %354, %358 : vector<5x5xf32>
    %cst_170 = arith.constant dense<0.000000e+00> : vector<5x8xf32>
    %360 = tpu.matmul %359, %346, %cst_170 {dimension_numbers = #tpu.dot_dimension_numbers<[1], [0], [0], [1], [0, 0, 1, 1], [], []>} : vector<5x5xf32>, vector<5x8xf32>, vector<5x8xf32> -> vector<5x8xf32>
    %c0_171 = arith.constant 0 : index
    %c8_172 = arith.constant 8 : index
    %361 = vector.load %arg23[%c0_171, %c8_172] : memref<10x32xf32, #tpu.memory_space<vmem>>, vector<5x8xf32>
    tpu.vector_store %arg23[%c0_171, %c8_172], %360 {strides = array<i32>} : memref<10x32xf32, #tpu.memory_space<vmem>>, vector<5x8xf32>,
    %362 = vector.extract_strided_slice %323 {offsets = [0, 16], sizes = [5, 8], strides = [1, 1]} : vector<10x32xf32> to vector<5x8xf32>
    %363 = vector.extract_strided_slice %324 {offsets = [0, 16], sizes = [5, 8], strides = [1, 1]} : vector<10x32xf32> to vector<5x8xf32>
    %364 = vector.extract_strided_slice %325 {offsets = [0, 16], sizes = [5, 8], strides = [1, 1]} : vector<10x32xf32> to vector<5x8xf32>
    %cst_173 = arith.constant dense<0.000000e+00> : vector<5x5xf32>
    %365 = tpu.matmul %362, %363, %cst_173 {dimension_numbers = #tpu.dot_dimension_numbers<[1], [1], [0], [0], [0, 0, 1, 0], [], []>} : vector<5x8xf32>, vector<5x8xf32>, vector<5x5xf32> -> vector<5x5xf32>
    %cst_174 = arith.constant 0.353553385 : f32
    %366 = vector.broadcast %cst_174 : f32 to vector<5x5xf32>
    %367 = arith.mulf %365, %366 : vector<5x5xf32>
    %cst_175 = arith.constant dense<0xFF800000> : vector<5xf32>
    %368 = vector.multi_reduction <maximumf>, %367, %cst_175 [1] : vector<5x5xf32> to vector<5xf32>
    %369 = vector.shape_cast %368 : vector<5xf32> to vector<5x1xf32>
    %370 = vector.broadcast %369 : vector<5x1xf32> to vector<5x5xf32>
    %371 = arith.subf %367, %370 : vector<5x5xf32>
    %372 = math.exp %371 : vector<5x5xf32>
    %cst_176 = arith.constant dense<0.000000e+00> : vector<5xf32>
    %373 = vector.multi_reduction <add>, %372, %cst_176 [1] : vector<5x5xf32> to vector<5xf32>
    %374 = vector.shape_cast %373 : vector<5xf32> to vector<5x1xf32>
    %375 = tpu.reciprocal %374 {approx = true} : vector<5x1xf32> -> vector<5x1xf32>
    %376 = vector.broadcast %375 : vector<5x1xf32> to vector<5x5xf32>
    %377 = arith.mulf %372, %376 : vector<5x5xf32>
    %cst_177 = arith.constant dense<0.000000e+00> : vector<5x8xf32>
    %378 = tpu.matmul %377, %364, %cst_177 {dimension_numbers = #tpu.dot_dimension_numbers<[1], [0], [0], [1], [0, 0, 1, 1], [], []>} : vector<5x5xf32>, vector<5x8xf32>, vector<5x8xf32> -> vector<5x8xf32>
    %c0_178 = arith.constant 0 : index
    %c16_179 = arith.constant 16 : index
    %379 = vector.load %arg23[%c0_178, %c16_179] : memref<10x32xf32, #tpu.memory_space<vmem>>, vector<5x8xf32>
    tpu.vector_store %arg23[%c0_178, %c16_179], %378 {strides = array<i32>} : memref<10x32xf32, #tpu.memory_space<vmem>>, vector<5x8xf32>,
    %380 = vector.extract_strided_slice %323 {offsets = [0, 24], sizes = [5, 8], strides = [1, 1]} : vector<10x32xf32> to vector<5x8xf32>
    %381 = vector.extract_strided_slice %324 {offsets = [0, 24], sizes = [5, 8], strides = [1, 1]} : vector<10x32xf32> to vector<5x8xf32>
    %382 = vector.extract_strided_slice %325 {offsets = [0, 24], sizes = [5, 8], strides = [1, 1]} : vector<10x32xf32> to vector<5x8xf32>
    %cst_180 = arith.constant dense<0.000000e+00> : vector<5x5xf32>
    %383 = tpu.matmul %380, %381, %cst_180 {dimension_numbers = #tpu.dot_dimension_numbers<[1], [1], [0], [0], [0, 0, 1, 0], [], []>} : vector<5x8xf32>, vector<5x8xf32>, vector<5x5xf32> -> vector<5x5xf32>
    %cst_181 = arith.constant 0.353553385 : f32
    %384 = vector.broadcast %cst_181 : f32 to vector<5x5xf32>
    %385 = arith.mulf %383, %384 : vector<5x5xf32>
    %cst_182 = arith.constant dense<0xFF800000> : vector<5xf32>
    %386 = vector.multi_reduction <maximumf>, %385, %cst_182 [1] : vector<5x5xf32> to vector<5xf32>
    %387 = vector.shape_cast %386 : vector<5xf32> to vector<5x1xf32>
    %388 = vector.broadcast %387 : vector<5x1xf32> to vector<5x5xf32>
    %389 = arith.subf %385, %388 : vector<5x5xf32>
    %390 = math.exp %389 : vector<5x5xf32>
    %cst_183 = arith.constant dense<0.000000e+00> : vector<5xf32>
    %391 = vector.multi_reduction <add>, %390, %cst_183 [1] : vector<5x5xf32> to vector<5xf32>
    %392 = vector.shape_cast %391 : vector<5xf32> to vector<5x1xf32>
    %393 = tpu.reciprocal %392 {approx = true} : vector<5x1xf32> -> vector<5x1xf32>
    %394 = vector.broadcast %393 : vector<5x1xf32> to vector<5x5xf32>
    %395 = arith.mulf %390, %394 : vector<5x5xf32>
    %cst_184 = arith.constant dense<0.000000e+00> : vector<5x8xf32>
    %396 = tpu.matmul %395, %382, %cst_184 {dimension_numbers = #tpu.dot_dimension_numbers<[1], [0], [0], [1], [0, 0, 1, 1], [], []>} : vector<5x5xf32>, vector<5x8xf32>, vector<5x8xf32> -> vector<5x8xf32>
    %c0_185 = arith.constant 0 : index
    %c24_186 = arith.constant 24 : index
    %397 = vector.load %arg23[%c0_185, %c24_186] : memref<10x32xf32, #tpu.memory_space<vmem>>, vector<5x8xf32>
    tpu.vector_store %arg23[%c0_185, %c24_186], %396 {strides = array<i32>} : memref<10x32xf32, #tpu.memory_space<vmem>>, vector<5x8xf32>,
    %398 = vector.extract_strided_slice %323 {offsets = [5, 0], sizes = [5, 8], strides = [1, 1]} : vector<10x32xf32> to vector<5x8xf32>
    %399 = vector.extract_strided_slice %324 {offsets = [5, 0], sizes = [5, 8], strides = [1, 1]} : vector<10x32xf32> to vector<5x8xf32>
    %400 = vector.extract_strided_slice %325 {offsets = [5, 0], sizes = [5, 8], strides = [1, 1]} : vector<10x32xf32> to vector<5x8xf32>
    %cst_187 = arith.constant dense<0.000000e+00> : vector<5x5xf32>
    %401 = tpu.matmul %398, %399, %cst_187 {dimension_numbers = #tpu.dot_dimension_numbers<[1], [1], [0], [0], [0, 0, 1, 0], [], []>} : vector<5x8xf32>, vector<5x8xf32>, vector<5x5xf32> -> vector<5x5xf32>
    %cst_188 = arith.constant 0.353553385 : f32
    %402 = vector.broadcast %cst_188 : f32 to vector<5x5xf32>
    %403 = arith.mulf %401, %402 : vector<5x5xf32>
    %cst_189 = arith.constant dense<0xFF800000> : vector<5xf32>
    %404 = vector.multi_reduction <maximumf>, %403, %cst_189 [1] : vector<5x5xf32> to vector<5xf32>
    %405 = vector.shape_cast %404 : vector<5xf32> to vector<5x1xf32>
    %406 = vector.broadcast %405 : vector<5x1xf32> to vector<5x5xf32>
    %407 = arith.subf %403, %406 : vector<5x5xf32>
    %408 = math.exp %407 : vector<5x5xf32>
    %cst_190 = arith.constant dense<0.000000e+00> : vector<5xf32>
    %409 = vector.multi_reduction <add>, %408, %cst_190 [1] : vector<5x5xf32> to vector<5xf32>
    %410 = vector.shape_cast %409 : vector<5xf32> to vector<5x1xf32>
    %411 = tpu.reciprocal %410 {approx = true} : vector<5x1xf32> -> vector<5x1xf32>
    %412 = vector.broadcast %411 : vector<5x1xf32> to vector<5x5xf32>
    %413 = arith.mulf %408, %412 : vector<5x5xf32>
    %cst_191 = arith.constant dense<0.000000e+00> : vector<5x8xf32>
    %414 = tpu.matmul %413, %400, %cst_191 {dimension_numbers = #tpu.dot_dimension_numbers<[1], [0], [0], [1], [0, 0, 1, 1], [], []>} : vector<5x5xf32>, vector<5x8xf32>, vector<5x8xf32> -> vector<5x8xf32>
    %c5_192 = arith.constant 5 : index
    %c0_193 = arith.constant 0 : index
    %415 = vector.load %arg23[%c5_192, %c0_193] : memref<10x32xf32, #tpu.memory_space<vmem>>, vector<5x8xf32>
    tpu.vector_store %arg23[%c5_192, %c0_193], %414 {strides = array<i32>} : memref<10x32xf32, #tpu.memory_space<vmem>>, vector<5x8xf32>,
    %416 = vector.extract_strided_slice %323 {offsets = [5, 8], sizes = [5, 8], strides = [1, 1]} : vector<10x32xf32> to vector<5x8xf32>
    %417 = vector.extract_strided_slice %324 {offsets = [5, 8], sizes = [5, 8], strides = [1, 1]} : vector<10x32xf32> to vector<5x8xf32>
    %418 = vector.extract_strided_slice %325 {offsets = [5, 8], sizes = [5, 8], strides = [1, 1]} : vector<10x32xf32> to vector<5x8xf32>
    %cst_194 = arith.constant dense<0.000000e+00> : vector<5x5xf32>
    %419 = tpu.matmul %416, %417, %cst_194 {dimension_numbers = #tpu.dot_dimension_numbers<[1], [1], [0], [0], [0, 0, 1, 0], [], []>} : vector<5x8xf32>, vector<5x8xf32>, vector<5x5xf32> -> vector<5x5xf32>
    %cst_195 = arith.constant 0.353553385 : f32
    %420 = vector.broadcast %cst_195 : f32 to vector<5x5xf32>
    %421 = arith.mulf %419, %420 : vector<5x5xf32>
    %cst_196 = arith.constant dense<0xFF800000> : vector<5xf32>
    %422 = vector.multi_reduction <maximumf>, %421, %cst_196 [1] : vector<5x5xf32> to vector<5xf32>
    %423 = vector.shape_cast %422 : vector<5xf32> to vector<5x1xf32>
    %424 = vector.broadcast %423 : vector<5x1xf32> to vector<5x5xf32>
    %425 = arith.subf %421, %424 : vector<5x5xf32>
    %426 = math.exp %425 : vector<5x5xf32>
    %cst_197 = arith.constant dense<0.000000e+00> : vector<5xf32>
    %427 = vector.multi_reduction <add>, %426, %cst_197 [1] : vector<5x5xf32> to vector<5xf32>
    %428 = vector.shape_cast %427 : vector<5xf32> to vector<5x1xf32>
    %429 = tpu.reciprocal %428 {approx = true} : vector<5x1xf32> -> vector<5x1xf32>
    %430 = vector.broadcast %429 : vector<5x1xf32> to vector<5x5xf32>
    %431 = arith.mulf %426, %430 : vector<5x5xf32>
    %cst_198 = arith.constant dense<0.000000e+00> : vector<5x8xf32>
    %432 = tpu.matmul %431, %418, %cst_198 {dimension_numbers = #tpu.dot_dimension_numbers<[1], [0], [0], [1], [0, 0, 1, 1], [], []>} : vector<5x5xf32>, vector<5x8xf32>, vector<5x8xf32> -> vector<5x8xf32>
    %c5_199 = arith.constant 5 : index
    %c8_200 = arith.constant 8 : index
    %433 = vector.load %arg23[%c5_199, %c8_200] : memref<10x32xf32, #tpu.memory_space<vmem>>, vector<5x8xf32>
    tpu.vector_store %arg23[%c5_199, %c8_200], %432 {strides = array<i32>} : memref<10x32xf32, #tpu.memory_space<vmem>>, vector<5x8xf32>,
    %434 = vector.extract_strided_slice %323 {offsets = [5, 16], sizes = [5, 8], strides = [1, 1]} : vector<10x32xf32> to vector<5x8xf32>
    %435 = vector.extract_strided_slice %324 {offsets = [5, 16], sizes = [5, 8], strides = [1, 1]} : vector<10x32xf32> to vector<5x8xf32>
    %436 = vector.extract_strided_slice %325 {offsets = [5, 16], sizes = [5, 8], strides = [1, 1]} : vector<10x32xf32> to vector<5x8xf32>
    %cst_201 = arith.constant dense<0.000000e+00> : vector<5x5xf32>
    %437 = tpu.matmul %434, %435, %cst_201 {dimension_numbers = #tpu.dot_dimension_numbers<[1], [1], [0], [0], [0, 0, 1, 0], [], []>} : vector<5x8xf32>, vector<5x8xf32>, vector<5x5xf32> -> vector<5x5xf32>
    %cst_202 = arith.constant 0.353553385 : f32
    %438 = vector.broadcast %cst_202 : f32 to vector<5x5xf32>
    %439 = arith.mulf %437, %438 : vector<5x5xf32>
    %cst_203 = arith.constant dense<0xFF800000> : vector<5xf32>
    %440 = vector.multi_reduction <maximumf>, %439, %cst_203 [1] : vector<5x5xf32> to vector<5xf32>
    %441 = vector.shape_cast %440 : vector<5xf32> to vector<5x1xf32>
    %442 = vector.broadcast %441 : vector<5x1xf32> to vector<5x5xf32>
    %443 = arith.subf %439, %442 : vector<5x5xf32>
    %444 = math.exp %443 : vector<5x5xf32>
    %cst_204 = arith.constant dense<0.000000e+00> : vector<5xf32>
    %445 = vector.multi_reduction <add>, %444, %cst_204 [1] : vector<5x5xf32> to vector<5xf32>
    %446 = vector.shape_cast %445 : vector<5xf32> to vector<5x1xf32>
    %447 = tpu.reciprocal %446 {approx = true} : vector<5x1xf32> -> vector<5x1xf32>
    %448 = vector.broadcast %447 : vector<5x1xf32> to vector<5x5xf32>
    %449 = arith.mulf %444, %448 : vector<5x5xf32>
    %cst_205 = arith.constant dense<0.000000e+00> : vector<5x8xf32>
    %450 = tpu.matmul %449, %436, %cst_205 {dimension_numbers = #tpu.dot_dimension_numbers<[1], [0], [0], [1], [0, 0, 1, 1], [], []>} : vector<5x5xf32>, vector<5x8xf32>, vector<5x8xf32> -> vector<5x8xf32>
    %c5_206 = arith.constant 5 : index
    %c16_207 = arith.constant 16 : index
    %451 = vector.load %arg23[%c5_206, %c16_207] : memref<10x32xf32, #tpu.memory_space<vmem>>, vector<5x8xf32>
    tpu.vector_store %arg23[%c5_206, %c16_207], %450 {strides = array<i32>} : memref<10x32xf32, #tpu.memory_space<vmem>>, vector<5x8xf32>,
    %452 = vector.extract_strided_slice %323 {offsets = [5, 24], sizes = [5, 8], strides = [1, 1]} : vector<10x32xf32> to vector<5x8xf32>
    %453 = vector.extract_strided_slice %324 {offsets = [5, 24], sizes = [5, 8], strides = [1, 1]} : vector<10x32xf32> to vector<5x8xf32>
    %454 = vector.extract_strided_slice %325 {offsets = [5, 24], sizes = [5, 8], strides = [1, 1]} : vector<10x32xf32> to vector<5x8xf32>
    %cst_208 = arith.constant dense<0.000000e+00> : vector<5x5xf32>
    %455 = tpu.matmul %452, %453, %cst_208 {dimension_numbers = #tpu.dot_dimension_numbers<[1], [1], [0], [0], [0, 0, 1, 0], [], []>} : vector<5x8xf32>, vector<5x8xf32>, vector<5x5xf32> -> vector<5x5xf32>
    %cst_209 = arith.constant 0.353553385 : f32
    %456 = vector.broadcast %cst_209 : f32 to vector<5x5xf32>
    %457 = arith.mulf %455, %456 : vector<5x5xf32>
    %cst_210 = arith.constant dense<0xFF800000> : vector<5xf32>
    %458 = vector.multi_reduction <maximumf>, %457, %cst_210 [1] : vector<5x5xf32> to vector<5xf32>
    %459 = vector.shape_cast %458 : vector<5xf32> to vector<5x1xf32>
    %460 = vector.broadcast %459 : vector<5x1xf32> to vector<5x5xf32>
    %461 = arith.subf %457, %460 : vector<5x5xf32>
    %462 = math.exp %461 : vector<5x5xf32>
    %cst_211 = arith.constant dense<0.000000e+00> : vector<5xf32>
    %463 = vector.multi_reduction <add>, %462, %cst_211 [1] : vector<5x5xf32> to vector<5xf32>
    %464 = vector.shape_cast %463 : vector<5xf32> to vector<5x1xf32>
    %465 = tpu.reciprocal %464 {approx = true} : vector<5x1xf32> -> vector<5x1xf32>
    %466 = vector.broadcast %465 : vector<5x1xf32> to vector<5x5xf32>
    %467 = arith.mulf %462, %466 : vector<5x5xf32>
    %cst_212 = arith.constant dense<0.000000e+00> : vector<5x8xf32>
    %468 = tpu.matmul %467, %454, %cst_212 {dimension_numbers = #tpu.dot_dimension_numbers<[1], [0], [0], [1], [0, 0, 1, 1], [], []>} : vector<5x5xf32>, vector<5x8xf32>, vector<5x8xf32> -> vector<5x8xf32>
    %c5_213 = arith.constant 5 : index
    %c24_214 = arith.constant 24 : index
    %469 = vector.load %arg23[%c5_213, %c24_214] : memref<10x32xf32, #tpu.memory_space<vmem>>, vector<5x8xf32>
    tpu.vector_store %arg23[%c5_213, %c24_214], %468 {strides = array<i32>} : memref<10x32xf32, #tpu.memory_space<vmem>>, vector<5x8xf32>,
    %c0_215 = arith.constant 0 : index
    %c0_216 = arith.constant 0 : index
    %470 = vector.load %arg23[%c0_215, %c0_216] : memref<10x32xf32, #tpu.memory_space<vmem>>, vector<10x32xf32>
    %c1_217 = arith.constant 1 : index
    %c0_218 = arith.constant 0 : index
    %c0_219 = arith.constant 0 : index
    %471 = vector.load %arg9[%c1_217, %c0_218, %c0_219] : memref<2x32x32xf32, #tpu.memory_space<vmem>>, vector<1x32x32xf32>
    %472 = vector.shape_cast %471 : vector<1x32x32xf32> to vector<32x32xf32>
    %cst_220 = arith.constant dense<0.000000e+00> : vector<10x32xf32>
    %473 = tpu.matmul %470, %472, %cst_220 {dimension_numbers = #tpu.dot_dimension_numbers<[1], [0], [0], [1], [0, 0, 1, 1], [], []>} : vector<10x32xf32>, vector<32x32xf32>, vector<10x32xf32> -> vector<10x32xf32>
    %c1_221 = arith.constant 1 : index
    %c0_222 = arith.constant 0 : index
    %c0_223 = arith.constant 0 : index
    %474 = vector.load %arg10[%c1_221, %c0_222, %c0_223] : memref<2x1x32xf32, #tpu.memory_space<vmem>>, vector<1x1x32xf32>
    %475 = vector.shape_cast %474 : vector<1x1x32xf32> to vector<1x32xf32>
    %476 = vector.broadcast %475 : vector<1x32xf32> to vector<10x32xf32>
    %477 = arith.addf %473, %476 : vector<10x32xf32>
    %478 = arith.addf %291, %477 : vector<10x32xf32>
    %c1_224 = arith.constant 1 : index
    %c0_225 = arith.constant 0 : index
    %c0_226 = arith.constant 0 : index
    %479 = vector.load %arg11[%c1_224, %c0_225, %c0_226] : memref<2x1x32xf32, #tpu.memory_space<vmem>>, vector<1x1x32xf32>
    %480 = vector.shape_cast %479 : vector<1x1x32xf32> to vector<1x32xf32>
    %c1_227 = arith.constant 1 : index
    %c0_228 = arith.constant 0 : index
    %c0_229 = arith.constant 0 : index
    %481 = vector.load %arg12[%c1_227, %c0_228, %c0_229] : memref<2x1x32xf32, #tpu.memory_space<vmem>>, vector<1x1x32xf32>
    %482 = vector.shape_cast %481 : vector<1x1x32xf32> to vector<1x32xf32>
    %cst_230 = arith.constant dense<0.000000e+00> : vector<10xf32>
    %483 = vector.multi_reduction <add>, %478, %cst_230 [1] : vector<10x32xf32> to vector<10xf32>
    %484 = vector.shape_cast %483 : vector<10xf32> to vector<10x1xf32>
    %cst_231 = arith.constant 3.200000e+01 : f32
    %485 = vector.broadcast %cst_231 : f32 to vector<10x1xf32>
    %486 = arith.divf %484, %485 : vector<10x1xf32>
    %487 = vector.broadcast %486 : vector<10x1xf32> to vector<10x32xf32>
    %488 = arith.subf %478, %487 : vector<10x32xf32>
    %489 = arith.mulf %488, %488 : vector<10x32xf32>
    %cst_232 = arith.constant dense<0.000000e+00> : vector<10xf32>
    %490 = vector.multi_reduction <add>, %489, %cst_232 [1] : vector<10x32xf32> to vector<10xf32>
    %491 = vector.shape_cast %490 : vector<10xf32> to vector<10x1xf32>
    %cst_233 = arith.constant 3.200000e+01 : f32
    %492 = vector.broadcast %cst_233 : f32 to vector<10x1xf32>
    %493 = arith.divf %491, %492 : vector<10x1xf32>
    %cst_234 = arith.constant 9.99999974E-6 : f32
    %494 = vector.broadcast %cst_234 : f32 to vector<10x1xf32>
    %495 = arith.addf %493, %494 : vector<10x1xf32>
    %496 = math.rsqrt %495 : vector<10x1xf32>
    %497 = vector.broadcast %496 : vector<10x1xf32> to vector<10x32xf32>
    %498 = arith.mulf %488, %497 : vector<10x32xf32>
    %499 = vector.broadcast %480 : vector<1x32xf32> to vector<10x32xf32>
    %500 = arith.mulf %498, %499 : vector<10x32xf32>
    %501 = vector.broadcast %482 : vector<1x32xf32> to vector<10x32xf32>
    %502 = arith.addf %500, %501 : vector<10x32xf32>
    %c1_235 = arith.constant 1 : index
    %c0_236 = arith.constant 0 : index
    %c0_237 = arith.constant 0 : index
    %503 = vector.load %arg13[%c1_235, %c0_236, %c0_237] : memref<2x32x128xf32, #tpu.memory_space<vmem>>, vector<1x32x128xf32>
    %504 = vector.shape_cast %503 : vector<1x32x128xf32> to vector<32x128xf32>
    %cst_238 = arith.constant dense<0.000000e+00> : vector<10x128xf32>
    %505 = tpu.matmul %502, %504, %cst_238 {dimension_numbers = #tpu.dot_dimension_numbers<[1], [0], [0], [1], [0, 0, 1, 1], [], []>} : vector<10x32xf32>, vector<32x128xf32>, vector<10x128xf32> -> vector<10x128xf32>
    %c1_239 = arith.constant 1 : index
    %c0_240 = arith.constant 0 : index
    %c0_241 = arith.constant 0 : index
    %506 = vector.load %arg14[%c1_239, %c0_240, %c0_241] : memref<2x1x128xf32, #tpu.memory_space<vmem>>, vector<1x1x128xf32>
    %507 = vector.shape_cast %506 : vector<1x1x128xf32> to vector<1x128xf32>
    %508 = vector.broadcast %507 : vector<1x128xf32> to vector<10x128xf32>
    %509 = arith.addf %505, %508 : vector<10x128xf32>
    %cst_242 = arith.constant 5.000000e-01 : f32
    %510 = vector.broadcast %cst_242 : f32 to vector<10x128xf32>
    %511 = arith.mulf %510, %509 : vector<10x128xf32>
    %cst_243 = arith.constant 0.707106769 : f32
    %512 = vector.broadcast %cst_243 : f32 to vector<10x128xf32>
    %513 = arith.mulf %509, %512 : vector<10x128xf32>
    %cst_244 = arith.constant 0.000000e+00 : f32
    %514 = vector.broadcast %cst_244 : f32 to vector<10x128xf32>
    %515 = arith.cmpf oge, %513, %514 : vector<10x128xf32>
    %cst_245 = arith.constant 1.000000e+00 : f32
    %cst_246 = arith.constant -1.000000e+00 : f32
    %516 = vector.broadcast %cst_245 : f32 to vector<10x128xf32>
    %517 = vector.broadcast %cst_246 : f32 to vector<10x128xf32>
    %518 = arith.select %515, %516, %517 : vector<10x128xi1>, vector<10x128xf32>
    %519 = math.absf %513 : vector<10x128xf32>
    %cst_247 = arith.constant 0.327591091 : f32
    %520 = vector.broadcast %cst_247 : f32 to vector<10x128xf32>
    %521 = arith.mulf %520, %519 : vector<10x128xf32>
    %cst_248 = arith.constant 1.000000e+00 : f32
    %522 = vector.broadcast %cst_248 : f32 to vector<10x128xf32>
    %523 = arith.addf %522, %521 : vector<10x128xf32>
    %cst_249 = arith.constant 1.000000e+00 : f32
    %524 = vector.broadcast %cst_249 : f32 to vector<10x128xf32>
    %525 = arith.divf %524, %523 : vector<10x128xf32>
    %cst_250 = arith.constant 1.06140542 : f32
    %526 = vector.broadcast %cst_250 : f32 to vector<10x128xf32>
    %527 = arith.mulf %526, %525 : vector<10x128xf32>
    %cst_251 = arith.constant -1.45315206 : f32
    %528 = vector.broadcast %cst_251 : f32 to vector<10x128xf32>
    %529 = arith.addf %527, %528 : vector<10x128xf32>
    %530 = arith.mulf %529, %525 : vector<10x128xf32>
    %cst_252 = arith.constant 1.42141378 : f32
    %531 = vector.broadcast %cst_252 : f32 to vector<10x128xf32>
    %532 = arith.addf %530, %531 : vector<10x128xf32>
    %533 = arith.mulf %532, %525 : vector<10x128xf32>
    %cst_253 = arith.constant -0.284496725 : f32
    %534 = vector.broadcast %cst_253 : f32 to vector<10x128xf32>
    %535 = arith.addf %533, %534 : vector<10x128xf32>
    %536 = arith.mulf %535, %525 : vector<10x128xf32>
    %cst_254 = arith.constant 0.254829586 : f32
    %537 = vector.broadcast %cst_254 : f32 to vector<10x128xf32>
    %538 = arith.addf %536, %537 : vector<10x128xf32>
    %539 = arith.mulf %538, %525 : vector<10x128xf32>
    %cst_255 = arith.constant 0.000000e+00 : f32
    %540 = vector.broadcast %cst_255 : f32 to vector<10x128xf32>
    %541 = arith.subf %540, %519 : vector<10x128xf32>
    %542 = arith.mulf %541, %519 : vector<10x128xf32>
    %543 = math.exp %542 : vector<10x128xf32>
    %544 = arith.mulf %539, %543 : vector<10x128xf32>
    %cst_256 = arith.constant 1.000000e+00 : f32
    %545 = vector.broadcast %cst_256 : f32 to vector<10x128xf32>
    %546 = arith.subf %545, %544 : vector<10x128xf32>
    %547 = arith.mulf %518, %546 : vector<10x128xf32>
    %cst_257 = arith.constant 1.000000e+00 : f32
    %548 = vector.broadcast %cst_257 : f32 to vector<10x128xf32>
    %549 = arith.addf %548, %547 : vector<10x128xf32>
    %550 = arith.mulf %511, %549 : vector<10x128xf32>
    %c1_258 = arith.constant 1 : index
    %c0_259 = arith.constant 0 : index
    %c0_260 = arith.constant 0 : index
    %551 = vector.load %arg15[%c1_258, %c0_259, %c0_260] : memref<2x128x32xf32, #tpu.memory_space<vmem>>, vector<1x128x32xf32>
    %552 = vector.shape_cast %551 : vector<1x128x32xf32> to vector<128x32xf32>
    %cst_261 = arith.constant dense<0.000000e+00> : vector<10x32xf32>
    %553 = tpu.matmul %550, %552, %cst_261 {dimension_numbers = #tpu.dot_dimension_numbers<[1], [0], [0], [1], [0, 0, 1, 1], [], []>} : vector<10x128xf32>, vector<128x32xf32>, vector<10x32xf32> -> vector<10x32xf32>
    %c1_262 = arith.constant 1 : index
    %c0_263 = arith.constant 0 : index
    %c0_264 = arith.constant 0 : index
    %554 = vector.load %arg16[%c1_262, %c0_263, %c0_264] : memref<2x1x32xf32, #tpu.memory_space<vmem>>, vector<1x1x32xf32>
    %555 = vector.shape_cast %554 : vector<1x1x32xf32> to vector<1x32xf32>
    %556 = vector.broadcast %555 : vector<1x32xf32> to vector<10x32xf32>
    %557 = arith.addf %553, %556 : vector<10x32xf32>
    %558 = arith.addf %478, %557 : vector<10x32xf32>
    %c0_265 = arith.constant 0 : index
    %c0_266 = arith.constant 0 : index
    %559 = vector.load %arg22[%c0_265, %c0_266] : memref<10x32xf32, #tpu.memory_space<vmem>>, vector<10x32xf32>
    tpu.vector_store %arg22[%c0_265, %c0_266], %558 {strides = array<i32>} : memref<10x32xf32, #tpu.memory_space<vmem>>, vector<10x32xf32>,
    %c0_267 = arith.constant 0 : index
    %c0_268 = arith.constant 0 : index
    %560 = vector.load %arg22[%c0_267, %c0_268] : memref<10x32xf32, #tpu.memory_space<vmem>>, vector<10x32xf32>
    %c0_269 = arith.constant 0 : index
    %c0_270 = arith.constant 0 : index
    %561 = vector.load %arg17[%c0_269, %c0_270] : memref<1x32xf32, #tpu.memory_space<vmem>>, vector<1x32xf32>
    %c0_271 = arith.constant 0 : index
    %c0_272 = arith.constant 0 : index
    %562 = vector.load %arg18[%c0_271, %c0_272] : memref<1x32xf32, #tpu.memory_space<vmem>>, vector<1x32xf32>
    %c0_273 = arith.constant 0 : index
    %c0_274 = arith.constant 0 : index
    %563 = vector.load %arg19[%c0_273, %c0_274] : memref<32x4xf32, #tpu.memory_space<vmem>>, vector<32x4xf32>
    %c0_275 = arith.constant 0 : index
    %c0_276 = arith.constant 0 : index
    %564 = vector.load %arg20[%c0_275, %c0_276] : memref<1x4xf32, #tpu.memory_space<vmem>>, vector<1x4xf32>
    %565 = vector.extract_strided_slice %560 {offsets = [0, 0], sizes = [1, 32], strides = [1, 1]} : vector<10x32xf32> to vector<1x32xf32>
    %cst_277 = arith.constant dense<0.000000e+00> : vector<1xf32>
    %566 = vector.multi_reduction <add>, %565, %cst_277 [1] : vector<1x32xf32> to vector<1xf32>
    %567 = vector.shape_cast %566 : vector<1xf32> to vector<1x1xf32>
    %cst_278 = arith.constant 3.200000e+01 : f32
    %568 = vector.broadcast %cst_278 : f32 to vector<1x1xf32>
    %569 = arith.divf %567, %568 : vector<1x1xf32>
    %570 = vector.broadcast %569 : vector<1x1xf32> to vector<1x32xf32>
    %571 = arith.subf %565, %570 : vector<1x32xf32>
    %572 = arith.mulf %571, %571 : vector<1x32xf32>
    %cst_279 = arith.constant dense<0.000000e+00> : vector<1xf32>
    %573 = vector.multi_reduction <add>, %572, %cst_279 [1] : vector<1x32xf32> to vector<1xf32>
    %574 = vector.shape_cast %573 : vector<1xf32> to vector<1x1xf32>
    %cst_280 = arith.constant 3.200000e+01 : f32
    %575 = vector.broadcast %cst_280 : f32 to vector<1x1xf32>
    %576 = arith.divf %574, %575 : vector<1x1xf32>
    %cst_281 = arith.constant 9.99999974E-6 : f32
    %577 = vector.broadcast %cst_281 : f32 to vector<1x1xf32>
    %578 = arith.addf %576, %577 : vector<1x1xf32>
    %579 = math.rsqrt %578 : vector<1x1xf32>
    %580 = vector.broadcast %579 : vector<1x1xf32> to vector<1x32xf32>
    %581 = arith.mulf %571, %580 : vector<1x32xf32>
    %582 = arith.mulf %581, %561 : vector<1x32xf32>
    %583 = arith.addf %582, %562 : vector<1x32xf32>
    %cst_282 = arith.constant dense<0.000000e+00> : vector<1x4xf32>
    %584 = tpu.matmul %583, %563, %cst_282 {dimension_numbers = #tpu.dot_dimension_numbers<[1], [0], [0], [1], [0, 0, 1, 1], [], []>} : vector<1x32xf32>, vector<32x4xf32>, vector<1x4xf32> -> vector<1x4xf32>
    %585 = arith.addf %584, %564 : vector<1x4xf32>
    %c0_283 = arith.constant 0 : index
    %c0_284 = arith.constant 0 : index
    %586 = vector.load %arg21[%c0_283, %c0_284] : memref<2x4xf32, #tpu.memory_space<vmem>>, vector<1x4xf32>
    tpu.vector_store %arg21[%c0_283, %c0_284], %585 {strides = array<i32>} : memref<2x4xf32, #tpu.memory_space<vmem>>, vector<1x4xf32>,
    %587 = vector.extract_strided_slice %560 {offsets = [5, 0], sizes = [1, 32], strides = [1, 1]} : vector<10x32xf32> to vector<1x32xf32>
    %cst_285 = arith.constant dense<0.000000e+00> : vector<1xf32>
    %588 = vector.multi_reduction <add>, %587, %cst_285 [1] : vector<1x32xf32> to vector<1xf32>
    %589 = vector.shape_cast %588 : vector<1xf32> to vector<1x1xf32>
    %cst_286 = arith.constant 3.200000e+01 : f32
    %590 = vector.broadcast %cst_286 : f32 to vector<1x1xf32>
    %591 = arith.divf %589, %590 : vector<1x1xf32>
    %592 = vector.broadcast %591 : vector<1x1xf32> to vector<1x32xf32>
    %593 = arith.subf %587, %592 : vector<1x32xf32>
    %594 = arith.mulf %593, %593 : vector<1x32xf32>
    %cst_287 = arith.constant dense<0.000000e+00> : vector<1xf32>
    %595 = vector.multi_reduction <add>, %594, %cst_287 [1] : vector<1x32xf32> to vector<1xf32>
    %596 = vector.shape_cast %595 : vector<1xf32> to vector<1x1xf32>
    %cst_288 = arith.constant 3.200000e+01 : f32
    %597 = vector.broadcast %cst_288 : f32 to vector<1x1xf32>
    %598 = arith.divf %596, %597 : vector<1x1xf32>
    %cst_289 = arith.constant 9.99999974E-6 : f32
    %599 = vector.broadcast %cst_289 : f32 to vector<1x1xf32>
    %600 = arith.addf %598, %599 : vector<1x1xf32>
    %601 = math.rsqrt %600 : vector<1x1xf32>
    %602 = vector.broadcast %601 : vector<1x1xf32> to vector<1x32xf32>
    %603 = arith.mulf %593, %602 : vector<1x32xf32>
    %604 = arith.mulf %603, %561 : vector<1x32xf32>
    %605 = arith.addf %604, %562 : vector<1x32xf32>
    %cst_290 = arith.constant dense<0.000000e+00> : vector<1x4xf32>
    %606 = tpu.matmul %605, %563, %cst_290 {dimension_numbers = #tpu.dot_dimension_numbers<[1], [0], [0], [1], [0, 0, 1, 1], [], []>} : vector<1x32xf32>, vector<32x4xf32>, vector<1x4xf32> -> vector<1x4xf32>
    %607 = arith.addf %606, %564 : vector<1x4xf32>
    %c1_291 = arith.constant 1 : index
    %c0_292 = arith.constant 0 : index
    %608 = vector.load %arg21[%c1_291, %c0_292] : memref<2x4xf32, #tpu.memory_space<vmem>>, vector<1x4xf32>
    tpu.vector_store %arg21[%c1_291, %c0_292], %607 {strides = array<i32>} : memref<2x4xf32, #tpu.memory_space<vmem>>, vector<1x4xf32>,
    return
  }
}

</mosaic_0001>

<bundles_post_ra>
// kernel: preprocess_forward.1
= control target key start
LH: loop header
LB: loop body
LE: loop exit
PB: predicated region body
PF: predicated region fallthrough
CT: control target
= control target key end

     0   :  { %vm182_vm0 = vcmask 253952   ;;  %vm188_vm1 = vcmask 257024   ;;  %vm194_vm2 = vcmask 261124   ;;  %vm200_vm3 = vcmask 261120   ;;  %s4965_s22 = smov 88   ;;  %s5933_s24 = smov 120   ;;  %s5894_s1 = inlined_call_operand.vmem [shape: f32[256,32], index: 1, kind: input, shape index: {}]   ;;  %s5895_s0 = inlined_call_operand.vmem [shape: f32[8,256], index: 0, kind: input, shape index: {}]   ;;  %s5896_s3 = inlined_call_operand.vmem [shape: f32[1,32], index: 3, kind: input, shape index: {}]   ;;  %s5897_s4 = inlined_call_operand.vmem [shape: f32[5,32], index: 4, kind: input, shape index: {}]   ;;  %s5898_s2 = inlined_call_operand.vmem [shape: f32[1,32], index: 2, kind: input, shape index: {}]   ;;  %s5899_s7 = inlined_call_operand.vmem [shape: f32[2,32,96], index: 7, kind: input, shape index: {}]   ;;  %s5900_s5 = inlined_call_operand.vmem [shape: f32[2,1,32], index: 5, kind: input, shape index: {}]   ;;  %s5901_s6 = inlined_call_operand.vmem [shape: f32[2,1,32], index: 6, kind: input, shape index: {}]   ;;  %s5902_s8 = inlined_call_operand.vmem [shape: f32[2,1,96], index: 8, kind: input, shape index: {}]   ;;  %s5903_s9 = inlined_call_operand.vmem [shape: f32[2,32,32], index: 9, kind: input, shape index: {}]   ;;  %s5904_s10 = inlined_call_operand.vmem [shape: f32[2,1,32], index: 10, kind: input, shape index: {}]   ;;  %s5905_s13 = inlined_call_operand.vmem [shape: f32[2,32,128], index: 13, kind: input, shape index: {}]   ;;  %s5906_s11 = inlined_call_operand.vmem [shape: f32[2,1,32], index: 11, kind: input, shape index: {}]   ;;  %s5907_s12 = inlined_call_operand.vmem [shape: f32[2,1,32], index: 12, kind: input, shape index: {}]   ;;  %s5908_s15 = inlined_call_operand.vmem [shape: f32[2,128,32], index: 15, kind: input, shape index: {}]   ;;  %s5909_s14 = inlined_call_operand.vmem [shape: f32[2,1,128], index: 14, kind: input, shape index: {}]   ;;  %s5910_s16 = inlined_call_operand.vmem [shape: f32[2,1,32], index: 16, kind: input, shape index: {}]   ;;  %s5911_s19 = inlined_call_operand.vmem [shape: f32[32,4], index: 19, kind: input, shape index: {}]   ;;  %s5912_s17 = inlined_call_operand.vmem [shape: f32[1,32], index: 17, kind: input, shape index: {}]   ;;  %s5913_s18 = inlined_call_operand.vmem [shape: f32[1,32], index: 18, kind: input, shape index: {}]   ;;  %s5914_s20 = inlined_call_operand.vmem [shape: f32[1,4], index: 20, kind: input, shape index: {}]   ;;  %s5915_s21 = inlined_call_operand.vmem [shape: f32[2,4], index: 21, kind: output, shape index: {}]  }
   0x1   :  { %5935 = sst [smem:[#allocation4_spill]] %s5894_s1  ;;  %vm204_vm4 = vcmask 254976   ;;  %vm4963_vm5 = vmmov 0   ;;  %vm340_vm6 = vcmask 64512   ;;  %vm416_vm7 = vcmask 36864   ;;  %s5931_s25 = smov 80  }
   0x2   :  { %5936 = sst [smem:[#allocation5_spill]] %s5895_s0  ;;  %s4966_s0 = smov 64   ;;  %vm434_vm8 = vcmask 1044480   ;;  %vm430_vm9 = vcmask 39936   ;;  %vm507_vm10 = vcmask 61440   ;;  %vm1029_vm11 = vcmask 1042432  }
   0x3   :  { %5937 = sst [smem:[#allocation6_spill]] %s5896_s3  ;;  %s5929_s27 = smov 56   ;;  %vm680_vm12 = vcmask 127040   ;;  %vm853_vm13 = vcmask 192640   ;;  %vm1026_vm14 = vcmask 258240  }
   0x4   :  { %5938 = sst [smem:[#allocation7_spill]] %s5897_s4  ;;  %s5927_s4 = smov 112  }
   0x5   :  { %5939 = sst [smem:[#allocation8_spill]] %s5898_s2  ;;  %s5923_s29 = smov 72  }
   0x6   :  { %5940 = sst [smem:[#allocation9_spill]] %s5899_s7  ;;  %s4964_s7 = smov 96  }
   0x7   :  { %s5941_s26 = sld [smem:[#allocation4_spill]]  ;;  %s5921_s1 = smov 40  }
   0x8   :  { %s5942_s3 = sld [smem:[#allocation5_spill]] }
   0x9   :  { %s5943_s28 = sld [smem:[#allocation6_spill]] }
   0xa   :  { %s5944_s2 = sld [smem:[#allocation7_spill]] }
   0xb   :  { %s5945_s30 = sld [smem:[#allocation8_spill]] }
   0xc   :  { %s5946_s23 = sld [smem:[#allocation9_spill]] }
   0xd   :  { %v101_v0 = vld [vmem:[%s5941_s26 + $0xf8] sm:$0xff]  ;;  %v100_v2 = vld [vmem:[%s5941_s26 + $0xf0] sm:$0xff]  ;;  %v99_v4 = vld [vmem:[%s5941_s26 + $0xe8] sm:$0xff] }
   0xe   :  { %v85_v1 = vld [vmem:[%s5941_s26 + $0x78] sm:$0xff]  ;;  %4346 = vmatprep.subr.mxu0 %v101_v0  ;;  %v84_v3 = vld [vmem:[%s5941_s26 + $0x70] sm:$0xff]  ;;  %v83_v5 = vld [vmem:[%s5941_s26 + $0x68] sm:$0xff] }
   0xf   :  { %4347 = vmatpush3.msra.mxu0 %v85_v1  ;;  %v98_v6 = vld [vmem:[%s5941_s26 + $0xe0] sm:$0xff]  ;;  %v97_v8 = vld [vmem:[%s5941_s26 + $0xd8] sm:$0xff]  ;;  %v96_v10 = vld [vmem:[%s5941_s26 + $0xd0] sm:$0xff] }
  0x10   :  { %4348 = vmatprep.subr.mxu0 %v100_v2  ;;  %v82_v7 = vld [vmem:[%s5941_s26 + $0x60] sm:$0xff]  ;;  %v81_v9 = vld [vmem:[%s5941_s26 + $0x58] sm:$0xff]  ;;  %v80_v11 = vld [vmem:[%s5941_s26 + $0x50] sm:$0xff] }
  0x11   :  { %4349 = vmatpush3.msra.mxu0 %v84_v3  ;;  %v95_v12 = vld [vmem:[%s5941_s26 + $0xc8] sm:$0xff]  ;;  %v94_v15 = vld [vmem:[%s5941_s26 + $0xc0] sm:$0xff]  ;;  %v93_v17 = vld [vmem:[%s5941_s26 + $0xb8] sm:$0xff] }
  0x12   :  { %4350 = vmatprep.subr.mxu0 %v99_v4  ;;  %v69_v13 = vld [vmem:[%s5942_s3 + $0x8] sm:$0xff]  ;;  %v78_v16 = vld [vmem:[%s5941_s26 + $0x40] sm:$0xff]  ;;  %v77_v18 = vld [vmem:[%s5941_s26 + $0x38] sm:$0xff] }
  0x13   :  { %4351 = vmatpush3.msra.mxu0 %v83_v5  ;;  %v79_v14 = vld [vmem:[%s5941_s26 + $0x48] sm:$0xff]  ;;  %173 = vmatprep.mubr.f32.mxu0 %v69_v13  ;;  %v92_v19 = vld [vmem:[%s5941_s26 + $0xb0] sm:$0xff]  ;;  %v90_v23 = vld [vmem:[%s5941_s26 + $0xa0] sm:$0xff] }
  0x14   :  { %4352 = vmatprep.subr.mxu0 %v98_v6  ;;  %v76_v20 = vld [vmem:[%s5941_s26 + $0x30] sm:$0xff]  ;;  %v91_v21 = vld [vmem:[%s5941_s26 + $0xa8] sm:$0xff]  ;;  %v74_v24 = vld [vmem:[%s5941_s26 + $0x20] sm:$0xff] }
  0x15   :  { %4353 = vmatpush3.msra.mxu0 %v82_v7  ;;  %v75_v22 = vld [vmem:[%s5941_s26 + $0x28] sm:$0xff]  ;;  %v89_v25 = vld [vmem:[%s5941_s26 + $0x98] sm:$0xff]  ;;  %v88_v27 = vld [vmem:[%s5941_s26 + $0x90] sm:$0xff] }
  0x16   :  { %4354 = vmatprep.subr.mxu0 %v97_v8  ;;  %v73_v26 = vld [vmem:[%s5941_s26 + $0x18] sm:$0xff]  ;;  %v72_v28 = vld [vmem:[%s5941_s26 + $0x10] sm:$0xff]  ;;  %v87_v29 = vld [vmem:[%s5941_s26 + $0x88] sm:$0xff] }
  0x17   :  { %4355 = vmatpush3.msra.mxu0 %v81_v9  ;;  %v71_v30 = vld [vmem:[%s5941_s26 + $0x8] sm:$0xff]  ;;  %v86_v31 = vld [vmem:[%s5941_s26 + $0x80] sm:$0xff]  ;;  %v248_v60 = vld [vmem:[%s5946_s23 + $0x18] sm:$0xff] }
  0x18   :  { %4356 = vmatprep.subr.mxu0 %v96_v10  ;;  %v70_v32 = vld [vmem:[%s5941_s26] sm:$0xff]  ;;  %v247_v61 = vld [vmem:[%s5946_s23 + $0x10] sm:$0xff]  ;;  %4527 = vmatprep.subr.mxu1 %v248_v60  ;;  %v246_v62 = vld [vmem:[%s5946_s23 + $0x8] sm:$0xff]  ;;  %s4975_s26 = smov 8  }
  0x19   :  { %4357 = vmatpush3.msra.mxu0 %v80_v11  ;;  %v68_v33 = vld [vmem:[%s5942_s3] sm:$0xff]  ;;  %4528 = vmatpush3.msra.mxu1 %v248_v60  ;;  %s4976_s3 = smov 16  }
  0x1a   :  { %4358 = vmatprep.subr.mxu0 %v95_v12  ;;  %v179_v34 = vld [vmem:[%s5943_s28] sm:$0x1]  ;;  %4529 = vmatprep.subr.mxu1 %v247_v61  ;;  %s5925_s28 = smov 104  }
  0x1b   :  { %4359 = vmatpush3.msra.mxu0 %v79_v14  ;;  %v180_v35 = vld [vmem:[%s5944_s2] sm:$0x1f]  ;;  %4530 = vmatpush3.msra.mxu1 %v247_v61  ;;  %s5919_s2 = smov 48  }
  0x1c   :  { %4360 = vmatprep.subr.mxu0 %v94_v15  ;;  %v181_v36 = vadd.f32 %v180_v35, %v179_v34  ;;  %v4215_v38 = vld [vmem:[%s5945_s30] ss:$0 sm:$0xff]  ;;  %v185_v41 = vrot.slane %v180_v35, 1  ;;  %v191_v42 = vrot.slane %v180_v35, 5  ;;  %4531 = vmatprep.subr.mxu1 %v246_v62  ;;  %s4977_s30 = smov 24  }
  0x1d   :  { %4361 = vmatpush3.msra.mxu0 %v78_v16  ;;  %4532 = vmatpush3.msra.mxu1 %v246_v62  ;;  %v245_v63 = vld [vmem:[%s5946_s23] sm:$0xff]  ;;  %v4962_v16 = vmov 0.0  }
  0x1e   :  { %4362 = vmatprep.subr.mxu0 %v93_v17  ;;  %183 = vst.msk [vmem:[#allocation2] sm:$0x1] %vm182_vm0, %v181_v36  ;;  %190 = vst.msk [vmem:[#allocation2 + $0x5] sm:$0x1] %vm182_vm0, %v181_v36  ;;  %4533 = vmatprep.subr.mxu1 %v245_v63  ;;  %v4216_v7 = vld [vmem:[%s5900_s5] ss:$0 sm:$0xff] }
  0x1f   :  { %4363 = vmatpush3.msra.mxu0 %v77_v18  ;;  %4534 = vmatpush3.msra.mxu1 %v245_v63  ;;  %v4217_v9 = vld [vmem:[%s5901_s6] ss:$0 sm:$0xff] }
  0x20   :  { %4364 = vmatprep.subr.mxu0 %v92_v19  ;;  %4538 = vmatprep.subr.mxu1 %v4962_v16  ;;  %v4218_v17 = vld [vmem:[%s5902_s8] ss:$0 sm:$0xff] }
  0x21   :  { %4365 = vmatpush3.msra.mxu0 %v76_v20 }
  0x22   :  { %4366 = vmatprep.subr.mxu0 %v91_v21 }
  0x23   :  { %4367 = vmatpush3.msra.mxu0 %v75_v22 }
  0x24   :  { %4368 = vmatprep.subr.mxu0 %v90_v23 }
  0x25   :  { %4369 = vmatpush3.msra.mxu0 %v74_v24 }
  0x26   :  { %4370 = vmatprep.subr.mxu0 %v89_v25 }
  0x27   :  { %4371 = vmatpush3.msra.mxu0 %v73_v26 }
  0x28   :  { %4372 = vmatprep.subr.mxu0 %v88_v27 }
  0x29   :  { %4373 = vmatpush3.msra.mxu0 %v72_v28 }
  0x2a   :  { %4374 = vmatprep.subr.mxu0 %v87_v29 }
  0x2b   :  { %4375 = vmatpush3.msra.mxu0 %v71_v30 }
  0x2c   :  { %4376 = vmatprep.subr.mxu0 %v86_v31 }
  0x2d   :  { %4377 = vmatpush3.msra.mxu0 %v70_v32 }
  0x2e   :  { %174 = vmatmul.mubr.f32.vlgmr.msra.gmra.mxu0 %v68_v33  ;;  %4568 = vmatprep.subr.mxu0 %v4962_v16 }
  0x2f   :  { %4570 = vmatprep.mubr.msk.f32.mxu0 %vm4963_vm5, %v4962_v16 }
  0xee   :  { %v4378_v37 = vpop.f32.mrf.mxu0 }
  0xf0   :  { %v4379_v39 = vpop.f32.mrf.mxu0 }
  0xf1   :  { %v4380_v40 = vadd.f32 %v4379_v39, %v4378_v37 }
  0xf3   :  { %v176_v43 = vadd.f32 %v4380_v40, %v4215_v38 }
  0xf5   :  { %v187_v44 = vadd.f32 %v185_v41, %v176_v43  ;;  %v193_v45 = vadd.f32 %v191_v42, %v176_v43 }
  0xf7   :  { %189 = vst.msk [vmem:[#allocation2 + $0x1] sm:$0xf] %vm188_vm1, %v187_v44 }
  0xf8   :  { %195 = vst.msk [vmem:[#allocation2 + $0x2] sm:$0xf0] %vm194_vm2, %v193_v45 }
  0xff   :  { %v5202_v46 = vld [vmem:[#allocation2] sm:$0xff]  ;;  %v5206_v48 = vld [vmem:[#allocation2 + $0x8] sm:$0x3] }
 0x100   :  { %v201_v47 = vsel %vm200_vm3, %v5202_v46, 0.0  ;;  %v205_v49 = vsel %vm204_vm4, %v5206_v48, 0.0 }
 0x101   :  { %202 = vadd.xlane.f32.xlu0 %v201_v47 }
 0x105   :  { %206 = vadd.xlane.f32.xlu0 %v205_v49 }
 0x18a   :  { %v203_v50 = vpop.xlane.xlu0 %202 }
 0x18b   :  { %v209_v51 = vmul.f32 0.03125, %v203_v50 }
 0x18d   :  { %v211_v52 = vsub.f32 %v5202_v46, %v209_v51 }
 0x18e   :  { %v207_v53 = vpop.xlane.xlu0 %206 }
 0x18f   :  { %v210_v54 = vmul.f32 0.03125, %v207_v53  ;;  %v213_v55 = vmul.f32 %v211_v52, %v211_v52 }
 0x191   :  { %v212_v56 = vsub.f32 %v5206_v48, %v210_v54  ;;  %v215_v57 = vsel %vm200_vm3, %v213_v55, 0.0 }
 0x192   :  { %216 = vadd.xlane.f32.xlu1 %v215_v57 }
 0x193   :  { %v214_v58 = vmul.f32 %v212_v56, %v212_v56 }
 0x195   :  { %v218_v59 = vsel %vm204_vm4, %v214_v58, 0.0 }
 0x196   :  { %219 = vadd.xlane.f32.xlu1 %v218_v59 }
 0x21b   :  { %v217_v0 = vpop.xlane.xlu1 %216 }
 0x21c   :  { %v221_v1 = vmul.f32 0.03125, %v217_v0 }
 0x21e   :  { %v223_v2 = vadd.f32 1e-05, %v221_v1 }
 0x21f   :  { %v220_v3 = vpop.xlane.xlu1 %219 }
 0x220   :  { %4862 = vrsqrt.f32 %v223_v2  ;;  %v222_v4 = vmul.f32 0.03125, %v220_v3 }
 0x222   :  { %v224_v5 = vadd.f32 1e-05, %v222_v4 }
 0x224   :  { %4864 = vrsqrt.f32 %v224_v5 }
 0x22d   :  { %v4863_v6 = vpop.eup %4862 }
 0x22e   :  { %v227_v8 = vmul.f32 %v4863_v6, %v211_v52 }
 0x230   :  { %v235_v10 = vmul.f32 %v4216_v7, %v227_v8 }
 0x231   :  { %v4865_v11 = vpop.eup %4864 }
 0x232   :  { %v228_v12 = vmul.f32 %v4865_v11, %v212_v56  ;;  %v243_v13 = vadd.f32 %v4217_v9, %v235_v10 }
 0x234   :  { %v236_v14 = vmul.f32 %v4216_v7, %v228_v12  ;;  %4535 = vmatprep.mubr.msk.f32.mxu1 %vm200_vm3, %v243_v13 }
 0x236   :  { %v244_v15 = vadd.f32 %v4217_v9, %v236_v14 }
 0x238   :  { %4536 = vmatmul.mubr.msk.f32.vlgmr.msra.gmra.mxu1 %vm200_vm3, %v244_v15 }
 0x239   :  { %4540 = vmatprep.mubr.msk.f32.mxu1 %vm4963_vm5, %v4962_v16 }
 0x2f8   :  { %v4537_v18 = vpop.f32.mrf.mxu1 }
 0x2f9   :  { %v5243_v19 = vadd.f32 %v4537_v18, %v4218_v17 }
 0x2fa   :  { %v328_v20 = vpop.f32.mrf.mxu1 }
 0x2fb   :  { %v5245_v21 = vadd.f32 %v4218_v17, %v328_v20  ;;  %v1031_v45 = vrot.slane %v5243_v19, 5 }
 0x2fd   :  { %338 = vrot.lane.b32.xlu0 %v5245_v21, %s4964_s7  ;;  %v1030_v44 = vrot.slane %v5245_v21, 5 }
 0x2ff   :  { %v5286_v47 = vsel %vm1029_vm11, %v1030_v44, %v1031_v45 }
 0x301   :  { %511 = vrot.lane.b32.xlu0 %v5245_v21, %s4965_s22 }
 0x36f   :  { %v339_v22 = vpop.permute.xlu0 %338 }
 0x370   :  { %4539 = vmatpush3.xpose.msk.msra.mxu1 %vm340_vm6, %v339_v22 }
 0x371   :  { %4543 = vmatprep.subr.mxu1 %v4962_v16 }
 0x373   :  { %4541 = vmatmul.mubr.msk.f32.vlgmr.msra.gmra.mxu1 %vm340_vm6, %v5245_v21  ;;  %v512_v36 = vpop.permute.xlu0 %511 }
 0x374   :  { %4545 = vmatprep.mubr.msk.f32.mxu1 %vm4963_vm5, %v4962_v16 }
 0x433   :  { %v411_v23 = vpop.f32.mrf.mxu1 }
 0x434   :  { %v415_v24 = vmul.f32 0.35355338, %v411_v23 }
 0x435   :  { %v4542_v25 = vpop.f32.mrf.mxu1 }
 0x436   :  { %v417_v26 = vsel %vm416_vm7, %v415_v24, -inf }
 0x437   :  { %418 = vmax.xlane.f32.xlu1 %v417_v26 }
 0x448   :  { %428 = vrot.lane.b32.xlu1 %v5245_v21, %s4966_s0 }
 0x4c0   :  { %v419_v27 = vpop.xlane.xlu1 %418 }
 0x4c1   :  { %v420_v28 = vsub.f32 %v415_v24, %v419_v27 }
 0x4c3   :  { %v421_v29 = vmul.f32 1.442695, %v420_v28 }
 0x4c4   :  { %v429_v30 = vpop.permute.xlu1 %428 }
 0x4c5   :  { %4866 = vpow2.f32 %v421_v29  ;;  %4544 = vmatpush3.msk.msra.mxu1 %vm434_vm8, %v429_v30 }
 0x4c6   :  { %4548 = vmatprep.subr.mxu1 %v4962_v16 }
 0x4d2   :  { %v4867_v31 = vpop.eup %4866 }
 0x4d3   :  { %v423_v32 = vsel %vm416_vm7, %v4867_v31, 0.0 }
 0x4d4   :  { %424 = vadd.xlane.f32.xlu1 %v423_v32 }
 0x4e5   :  { %509 = vrot.lane.b32.xlu1 %v5245_v21, %s5933_s24 }
 0x4e9   :  { %684 = vrot.lane.b32.xlu1 %v5245_v21, %s5931_s25 }
 0x55d   :  { %v425_v33 = vpop.xlane.xlu1 %424 }
 0x55e   :  { %4868 = vrcp.f32 %v425_v33 }
 0x561   :  { %v510_v37 = vpop.permute.xlu1 %509 }
 0x565   :  { %v685_v55 = vpop.permute.xlu1 %684 }
 0x56b   :  { %v4869_v34 = vpop.eup %4868 }
 0x56c   :  { %v427_v35 = vmul.f32 %v4869_v34, %v4867_v31 }
 0x56e   :  { %4546 = vmatmul.mubr.msk.f32.vlgmr.msra.gmra.mxu1 %vm430_vm9, %v427_v35 }
 0x56f   :  { %4549 = vmatpush3.xpose.msk.msra.mxu1 %vm340_vm6, %v512_v36  ;;  %4550 = vmatprep.mubr.msk.f32.mxu1 %vm4963_vm5, %v4962_v16 }
 0x570   :  { %4553 = vmatprep.subr.mxu1 %v4962_v16 }
 0x572   :  { %4551 = vmatmul.mubr.msk.f32.vlgmr.msra.gmra.mxu1 %vm340_vm6, %v510_v37 }
 0x573   :  { %4555 = vmatprep.mubr.msk.f32.mxu1 %vm4963_vm5, %v4962_v16 }
 0x62e   :  { %v503_v38 = vpop.f32.mrf.mxu1 }
 0x62f   :  { %508 = vst.msk [vmem:[#allocation3] sm:$0x1f] %vm507_vm10, %v503_v38 }
 0x630   :  { %v4547_v39 = vpop.f32.mrf.mxu1 }
 0x632   :  { %v583_v40 = vpop.f32.mrf.mxu1 }
 0x633   :  { %v587_v41 = vmul.f32 0.35355338, %v583_v40 }
 0x634   :  { %v4552_v42 = vpop.f32.mrf.mxu1 }
 0x635   :  { %v588_v43 = vsel %vm416_vm7, %v587_v41, -inf }
 0x636   :  { %589 = vmax.xlane.f32.xlu0 %v588_v43 }
 0x64c   :  { %599 = vrot.lane.b32.xlu0 %v5245_v21, %s5929_s27 }
 0x650   :  { %682 = vrot.lane.b32.xlu0 %v5245_v21, %s5927_s4 }
 0x654   :  { %855 = vrot.lane.b32.xlu0 %v5245_v21, %s5925_s28 }
 0x658   :  { %1201 = vrot.lane.b32.xlu0 %v5286_v47, %s4965_s22 }
 0x65c   :  { %1373 = vrot.lane.b32.xlu0 %v5286_v47, %s5931_s25  ;;  %s5952_s25 = smov 72  }
 0x660   :  { %1545 = vrot.lane.b32.xlu0 %v5286_v47, %s5923_s29 }
 0x6bf   :  { %v590_v49 = vpop.xlane.xlu0 %589 }
 0x6c0   :  { %v591_v50 = vsub.f32 %v587_v41, %v590_v49 }
 0x6c2   :  { %v592_v51 = vmul.f32 1.442695, %v591_v50 }
 0x6c3   :  { %v600_v52 = vpop.permute.xlu0 %599 }
 0x6c4   :  { %4870 = vpow2.f32 %v592_v51  ;;  %4554 = vmatpush3.msk.msra.mxu1 %vm434_vm8, %v600_v52 }
 0x6c5   :  { %4558 = vmatprep.subr.mxu1 %v4962_v16 }
 0x6c7   :  { %v683_v56 = vpop.permute.xlu0 %682 }
 0x6cb   :  { %v856_v58 = vpop.permute.xlu0 %855 }
 0x6cf   :  { %v1202_v60 = vpop.permute.xlu0 %1201 }
 0x6d1   :  { %v4871_v53 = vpop.eup %4870 }
 0x6d2   :  { %v594_v54 = vsel %vm416_vm7, %v4871_v53, 0.0 }
 0x6d3   :  { %595 = vadd.xlane.f32.xlu1 %v594_v54  ;;  %v1374_v0 = vpop.permute.xlu0 %1373 }
 0x6d7   :  { %v1546_v3 = vpop.permute.xlu0 %1545 }
 0x6e4   :  { %857 = vrot.lane.b32.xlu1 %v5245_v21, %s5923_s29 }
 0x6e8   :  { %1033 = vrot.lane.b32.xlu1 %v5286_v47, %s4964_s7 }
 0x6ec   :  { %1199 = vrot.lane.b32.xlu1 %v5286_v47, %s5933_s24  ;;  %s5951_s24 = smov 104  }
 0x6f0   :  { %1371 = vrot.lane.b32.xlu1 %v5286_v47, %s5927_s4 }
 0x6f4   :  { %1543 = vrot.lane.b32.xlu1 %v5286_v47, %s5925_s28 }
 0x75c   :  { %v596_v57 = vpop.xlane.xlu1 %595 }
 0x75d   :  { %4872 = vrcp.f32 %v596_v57 }
 0x760   :  { %v858_v59 = vpop.permute.xlu1 %857 }
 0x761   :  { %4569 = vmatpush3.xpose.msk.msra.mxu0 %vm340_vm6, %v858_v59 }
 0x762   :  { %4578 = vmatprep.subr.mxu0 %v4962_v16 }
 0x764   :  { %4571 = vmatmul.mubr.msk.f32.vlgmr.msra.gmra.mxu0 %vm340_vm6, %v856_v58  ;;  %v1034_v61 = vpop.permute.xlu1 %1033 }
 0x765   :  { %4579 = vmatpush3.xpose.msk.msra.mxu0 %vm340_vm6, %v1034_v61  ;;  %4580 = vmatprep.mubr.msk.f32.mxu0 %vm4963_vm5, %v4962_v16 }
 0x766   :  { %4588 = vmatprep.subr.mxu0 %v4962_v16 }
 0x768   :  { %4581 = vmatmul.mubr.msk.f32.vlgmr.msra.gmra.mxu0 %vm340_vm6, %v5286_v47  ;;  %v1200_v62 = vpop.permute.xlu1 %1199 }
 0x769   :  { %4589 = vmatpush3.xpose.msk.msra.mxu0 %vm340_vm6, %v1202_v60  ;;  %4590 = vmatprep.mubr.msk.f32.mxu0 %vm4963_vm5, %v4962_v16 }
 0x76a   :  { %v4873_v63 = vpop.eup %4872  ;;  %4598 = vmatprep.subr.mxu0 %v4962_v16 }
 0x76b   :  { %v598_v1 = vmul.f32 %v4873_v63, %v4871_v53 }
 0x76c   :  { %4591 = vmatmul.mubr.msk.f32.vlgmr.msra.gmra.mxu0 %vm340_vm6, %v1200_v62  ;;  %v1372_v2 = vpop.permute.xlu1 %1371 }
 0x76d   :  { %4556 = vmatmul.mubr.msk.f32.vlgmr.msra.gmra.mxu1 %vm430_vm9, %v598_v1  ;;  %4599 = vmatpush3.xpose.msk.msra.mxu0 %vm340_vm6, %v1374_v0 }
 0x76e   :  { %4559 = vmatpush3.xpose.msk.msra.mxu1 %vm340_vm6, %v685_v55  ;;  %4600 = vmatprep.mubr.msk.f32.mxu0 %vm4963_vm5, %v4962_v16 }
 0x76f   :  { %4560 = vmatprep.mubr.msk.f32.mxu1 %vm4963_vm5, %v4962_v16  ;;  %4608 = vmatprep.subr.mxu0 %v4962_v16 }
 0x770   :  { %4601 = vmatmul.mubr.msk.f32.vlgmr.msra.gmra.mxu0 %vm340_vm6, %v1372_v2  ;;  %4563 = vmatprep.subr.mxu1 %v4962_v16  ;;  %v1544_v4 = vpop.permute.xlu1 %1543 }
 0x771   :  { %4561 = vmatmul.mubr.msk.f32.vlgmr.msra.gmra.mxu1 %vm340_vm6, %v683_v56  ;;  %4609 = vmatpush3.xpose.msk.msra.mxu0 %vm340_vm6, %v1546_v3 }
 0x772   :  { %4610 = vmatprep.mubr.msk.f32.mxu0 %vm4963_vm5, %v4962_v16  ;;  %4565 = vmatprep.mubr.msk.f32.mxu1 %vm4963_vm5, %v4962_v16 }
 0x774   :  { %4611 = vmatmul.mubr.msk.f32.vlgmr.msra.gmra.mxu0 %vm340_vm6, %v1544_v4 }
 0x824   :  { %v929_v5 = vpop.f32.mrf.mxu0 }
 0x825   :  { %v933_v6 = vmul.f32 0.35355338, %v929_v5 }
 0x826   :  { %v4572_v7 = vpop.f32.mrf.mxu0 }
 0x827   :  { %v934_v8 = vsel %vm416_vm7, %v933_v6, -inf }
 0x828   :  { %935 = vmax.xlane.f32.xlu1 %v934_v8  ;;  %v1105_v9 = vpop.f32.mrf.mxu0 }
 0x829   :  { %v1109_v22 = vmul.f32 0.35355338, %v1105_v9 }
 0x82a   :  { %v4582_v10 = vpop.f32.mrf.mxu0 }
 0x82b   :  { %v1110_v29 = vsel %vm416_vm7, %v1109_v22, -inf }
 0x82c   :  { %v1273_v11 = vpop.f32.mrf.mxu0 }
 0x82d   :  { %v5339_v12 = vpop.f32.mrf.mxu1  ;;  %v1277_v28 = vmul.f32 0.35355338, %v1273_v11 }
 0x82e   :  { %v4592_v13 = vpop.f32.mrf.mxu0 }
 0x82f   :  { %v4557_v14 = vpop.f32.mrf.mxu1  ;;  %v1278_v31 = vsel %vm416_vm7, %v1277_v28, -inf }
 0x830   :  { %v1445_v15 = vpop.f32.mrf.mxu0 }
 0x831   :  { %v756_v17 = vpop.f32.mrf.mxu1  ;;  %v1449_v30 = vmul.f32 0.35355338, %v1445_v15 }
 0x832   :  { %v760_v18 = vmul.f32 0.35355338, %v756_v17  ;;  %v4602_v19 = vpop.f32.mrf.mxu0 }
 0x833   :  { %v4562_v20 = vpop.f32.mrf.mxu1  ;;  %v1450_v32 = vsel %vm416_vm7, %v1449_v30, -inf }
 0x834   :  { %v1617_v23 = vpop.f32.mrf.mxu0  ;;  %v761_v24 = vsel %vm416_vm7, %v760_v18, -inf }
 0x835   :  { %v1621_v25 = vmul.f32 0.35355338, %v1617_v23  ;;  %762 = vmax.xlane.f32.xlu0 %v761_v24 }
 0x836   :  { %v4612_v26 = vpop.f32.mrf.mxu0 }
 0x837   :  { %v1622_v27 = vsel %vm416_vm7, %v1621_v25, -inf }
 0x838   :  { %1623 = vmax.xlane.f32.xlu1 %v1622_v27 }
 0x839   :  { %1111 = vmax.xlane.f32.xlu0 %v1110_v29 }
 0x83d   :  { %1279 = vmax.xlane.f32.xlu0 %v1278_v31 }
 0x841   :  { %1451 = vmax.xlane.f32.xlu0 %v1450_v32  ;;  %v1720_v32 = vld [vmem:[%s5903_s9 + $0x18] sm:$0xff] }
 0x8b1   :  { %v936_v33 = vpop.xlane.xlu1 %935 }
 0x8b2   :  { %v937_v34 = vsub.f32 %v933_v6, %v936_v33  ;;  %v1719_v33 = vld [vmem:[%s5903_s9 + $0x10] sm:$0xff] }
 0x8b4   :  { %v938_v35 = vmul.f32 1.442695, %v937_v34 }
 0x8b6   :  { %4874 = vpow2.f32 %v938_v35  ;;  %v1718_v35 = vld [vmem:[%s5903_s9 + $0x8] sm:$0xff] }
 0x8be   :  { %v763_v36 = vpop.xlane.xlu0 %762 }
 0x8bf   :  { %v764_v49 = vsub.f32 %v760_v18, %v763_v36 }
 0x8c1   :  { %v1624_v37 = vpop.xlane.xlu1 %1623  ;;  %v765_v54 = vmul.f32 1.442695, %v764_v49 }
 0x8c2   :  { %v1112_v38 = vpop.xlane.xlu0 %1111  ;;  %v1625_v42 = vsub.f32 %v1621_v25, %v1624_v37  ;;  %v1717_v37 = vld [vmem:[%s5903_s9] sm:$0xff] }
 0x8c3   :  { %v5346_v39 = vpop.eup %4874  ;;  %v1113_v40 = vsub.f32 %v1109_v22, %v1112_v38 }
 0x8c4   :  { %v940_v41 = vsel %vm416_vm7, %v5346_v39, 0.0  ;;  %v1626_v50 = vmul.f32 1.442695, %v1625_v42 }
 0x8c5   :  { %v1114_v43 = vmul.f32 1.442695, %v1113_v40  ;;  %941 = vadd.xlane.f32.xlu1 %v940_v41 }
 0x8c6   :  { %v1280_v44 = vpop.xlane.xlu0 %1279 }
 0x8c7   :  { %4876 = vpow2.f32 %v1114_v43  ;;  %v1281_v45 = vsub.f32 %v1277_v28, %v1280_v44 }
 0x8c9   :  { %v1282_v51 = vmul.f32 1.442695, %v1281_v45 }
 0x8ca   :  { %v1452_v52 = vpop.xlane.xlu0 %1451 }
 0x8cb   :  { %4878 = vpow2.f32 %v1282_v51  ;;  %v1453_v53 = vsub.f32 %v1449_v30, %v1452_v52 }
 0x8cc   :  { %4880 = vpow2.f32 %v1626_v50 }
 0x8cd   :  { %v1454_v55 = vmul.f32 1.442695, %v1453_v53  ;;  %v4253_v53 = vld [vmem:[%s5904_s10] ss:$0 sm:$0xff] }
 0x8cf   :  { %4882 = vpow2.f32 %v1454_v55 }
 0x8d0   :  { %4884 = vpow2.f32 %v765_v54 }
 0x8d4   :  { %v4877_v56 = vpop.eup %4876 }
 0x8d5   :  { %v1116_v57 = vsel %vm416_vm7, %v4877_v56, 0.0 }
 0x8d6   :  { %1117 = vadd.xlane.f32.xlu0 %v1116_v57 }
 0x8d8   :  { %v5351_v58 = vpop.eup %4878 }
 0x8d9   :  { %v1284_v59 = vsel %vm416_vm7, %v5351_v58, 0.0  ;;  %v5355_v60 = vpop.eup %4880 }
 0x8da   :  { %1285 = vadd.xlane.f32.xlu1 %v1284_v59  ;;  %v1628_v63 = vsel %vm416_vm7, %v5355_v60, 0.0 }
 0x8dc   :  { %v5357_v61 = vpop.eup %4882 }
 0x8dd   :  { %v1456_v62 = vsel %vm416_vm7, %v5357_v61, 0.0  ;;  %v4885_v0 = vpop.eup %4884 }
 0x8de   :  { %1457 = vadd.xlane.f32.xlu0 %v1456_v62  ;;  %1629 = vadd.xlane.f32.xlu1 %v1628_v63  ;;  %v767_v1 = vsel %vm416_vm7, %v4885_v0, 0.0 }
 0x8e2   :  { %768 = vadd.xlane.f32.xlu0 %v767_v1 }
 0x8ef   :  { %945 = vrot.lane.b32.xlu1 %v5245_v21, %s5921_s1 }
 0x8f3   :  { %1121 = vrot.lane.b32.xlu1 %v5286_v47, %s4966_s0 }
 0x8f7   :  { %1289 = vrot.lane.b32.xlu1 %v5286_v47, %s5929_s27 }
 0x8f8   :  { %772 = vrot.lane.b32.xlu0 %v5245_v21, %s5919_s2 }
 0x8fb   :  { %1633 = vrot.lane.b32.xlu1 %v5286_v47, %s5921_s1  ;;  %s5949_s1 = smov 56  }
 0x8fc   :  { %1461 = vrot.lane.b32.xlu0 %v5286_v47, %s5919_s2  ;;  %s5950_s2 = smov 112  }
 0x900   :  { %677 = vrot.lane.b32.xlu0 %v5339_v12, %s4975_s26 }
 0x94e   :  { %v942_v4 = vpop.xlane.xlu1 %941 }
 0x95f   :  { %v1118_v2 = vpop.xlane.xlu0 %1117 }
 0x963   :  { %v1286_v6 = vpop.xlane.xlu1 %1285 }
 0x967   :  { %v1458_v3 = vpop.xlane.xlu0 %1457  ;;  %v1630_v21 = vpop.xlane.xlu1 %1629 }
 0x96b   :  { %v769_v5 = vpop.xlane.xlu0 %768  ;;  %v946_v9 = vpop.permute.xlu1 %945 }
 0x96c   :  { %4886 = vrcp.f32 %v769_v5 }
 0x96d   :  { %4888 = vrcp.f32 %v942_v4 }
 0x96e   :  { %4890 = vrcp.f32 %v1118_v2 }
 0x96f   :  { %v773_v7 = vpop.permute.xlu0 %772  ;;  %4892 = vrcp.f32 %v1286_v6  ;;  %v1122_v13 = vpop.permute.xlu1 %1121  ;;  %v1858_v6 = vld [vmem:[%s5905_s13 + $0x18] sm:$0xff] }
 0x970   :  { %4564 = vmatpush3.msk.msra.mxu1 %vm434_vm8, %v773_v7  ;;  %4894 = vrcp.f32 %v1458_v3  ;;  %v1857_v7 = vld [vmem:[%s5905_s13 + $0x10] sm:$0xff] }
 0x971   :  { %4573 = vmatprep.subr.mxu1 %v4962_v16  ;;  %4896 = vrcp.f32 %v1630_v21  ;;  %v1856_v21 = vld [vmem:[%s5905_s13 + $0x8] sm:$0xff] }
 0x973   :  { %v1462_v8 = vpop.permute.xlu0 %1461  ;;  %v1290_v19 = vpop.permute.xlu1 %1289 }
 0x977   :  { %v678_v47 = vpop.permute.xlu0 %677  ;;  %v1634_v25 = vpop.permute.xlu1 %1633 }
 0x978   :  { %681 = vst.msk [vmem:[#allocation3] sm:$0x1f] %vm680_vm12, %v678_v47 }
 0x979   :  { %v4887_v10 = vpop.eup %4886 }
 0x97a   :  { %v771_v11 = vmul.f32 %v4887_v10, %v4885_v0  ;;  %v4889_v12 = vpop.eup %4888 }
 0x97b   :  { %v944_v14 = vmul.f32 %v4889_v12, %v5346_v39  ;;  %v4891_v15 = vpop.eup %4890 }
 0x97c   :  { %4566 = vmatmul.mubr.msk.f32.vlgmr.msra.gmra.mxu1 %vm430_vm9, %v771_v11  ;;  %v1120_v17 = vmul.f32 %v4891_v15, %v4877_v56  ;;  %v4893_v18 = vpop.eup %4892  ;;  %v4256_v15 = vld [vmem:[%s5906_s11] ss:$0 sm:$0xff] }
 0x97d   :  { %4574 = vmatpush3.msk.msra.mxu1 %vm434_vm8, %v946_v9  ;;  %4575 = vmatprep.mubr.msk.f32.mxu1 %vm4963_vm5, %v4962_v16  ;;  %v1288_v20 = vmul.f32 %v4893_v18, %v5351_v58  ;;  %v4895_v22 = vpop.eup %4894  ;;  %v4257_v18 = vld [vmem:[%s5907_s12] ss:$0 sm:$0xff] }
 0x97e   :  { %4583 = vmatprep.subr.mxu1 %v4962_v16  ;;  %v1460_v23 = vmul.f32 %v4895_v22, %v5357_v61  ;;  %v4897_v24 = vpop.eup %4896 }
 0x97f   :  { %v1632_v26 = vmul.f32 %v4897_v24, %v5355_v60 }
 0x980   :  { %4576 = vmatmul.mubr.msk.f32.vlgmr.msra.gmra.mxu1 %vm430_vm9, %v944_v14 }
 0x981   :  { %4584 = vmatpush3.msk.msra.mxu1 %vm434_vm8, %v1122_v13  ;;  %4585 = vmatprep.mubr.msk.f32.mxu1 %vm4963_vm5, %v4962_v16 }
 0x982   :  { %4593 = vmatprep.subr.mxu1 %v4962_v16 }
 0x984   :  { %4586 = vmatmul.mubr.msk.f32.vlgmr.msra.gmra.mxu1 %vm430_vm9, %v1120_v17 }
 0x985   :  { %4594 = vmatpush3.msk.msra.mxu1 %vm434_vm8, %v1290_v19  ;;  %4595 = vmatprep.mubr.msk.f32.mxu1 %vm4963_vm5, %v4962_v16 }
 0x986   :  { %4603 = vmatprep.subr.mxu1 %v4962_v16 }
 0x988   :  { %4596 = vmatmul.mubr.msk.f32.vlgmr.msra.gmra.mxu1 %vm430_vm9, %v1288_v20 }
 0x989   :  { %4604 = vmatpush3.msk.msra.mxu1 %vm434_vm8, %v1462_v8  ;;  %4605 = vmatprep.mubr.msk.f32.mxu1 %vm4963_vm5, %v4962_v16  ;;  %v1855_v8 = vld [vmem:[%s5905_s13] sm:$0xff] }
 0x98a   :  { %4613 = vmatprep.subr.mxu1 %v4962_v16 }
 0x98c   :  { %4606 = vmatmul.mubr.msk.f32.vlgmr.msra.gmra.mxu1 %vm430_vm9, %v1460_v23 }
 0x98d   :  { %4614 = vmatpush3.msk.msra.mxu1 %vm434_vm8, %v1634_v25  ;;  %4615 = vmatprep.mubr.msk.f32.mxu1 %vm4963_vm5, %v4962_v16 }
 0x98e   :  { %4618 = vmatprep.subr.mxu1 %v1720_v32 }
 0x990   :  { %4616 = vmatmul.mubr.msk.f32.vlgmr.msra.gmra.mxu1 %vm430_vm9, %v1632_v26  ;;  %v2016_v26 = vld [vmem:[%s5908_s15 + $0x78] sm:$0xff] }
 0x991   :  { %4619 = vmatpush3.msra.mxu1 %v1720_v32  ;;  %4640 = vmatprep.subr.mxu0 %v2016_v26  ;;  %v2010_v32 = vld [vmem:[%s5908_s15 + $0x48] sm:$0xff] }
 0x992   :  { %4620 = vmatprep.subr.mxu1 %v1719_v33  ;;  %4641 = vmatpush3.msra.mxu0 %v2016_v26 }
 0x993   :  { %4621 = vmatpush3.msra.mxu1 %v1719_v33  ;;  %v2009_v33 = vld [vmem:[%s5908_s15 + $0x40] sm:$0xff] }
 0x994   :  { %4622 = vmatprep.subr.mxu1 %v1718_v35 }
 0x995   :  { %4623 = vmatpush3.msra.mxu1 %v1718_v35  ;;  %v2007_v35 = vld [vmem:[%s5908_s15 + $0x30] sm:$0xff] }
 0x996   :  { %4624 = vmatprep.subr.mxu1 %v1717_v37 }
 0x997   :  { %4625 = vmatpush3.msra.mxu1 %v1717_v37  ;;  %v2005_v37 = vld [vmem:[%s5908_s15 + $0x20] sm:$0xff] }
 0x998   :  { %4629 = vmatprep.subr.mxu1 %v1858_v6 }
 0xa3c   :  { %v845_v27 = vpop.f32.mrf.mxu1 }
 0xa3d   :  { %850 = vrot.lane.b32.xlu0 %v845_v27, %s4976_s3  ;;  %v2015_v27 = vld [vmem:[%s5908_s15 + $0x70] sm:$0xff] }
 0xa3e   :  { %v4567_v28 = vpop.f32.mrf.mxu1  ;;  %4642 = vmatprep.subr.mxu0 %v2015_v27 }
 0xa3f   :  { %4643 = vmatpush3.msra.mxu0 %v2015_v27  ;;  %v2014_v28 = vld [vmem:[%s5908_s15 + $0x68] sm:$0xff] }
 0xa40   :  { %v1018_v29 = vpop.f32.mrf.mxu1  ;;  %4644 = vmatprep.subr.mxu0 %v2014_v28 }
 0xa41   :  { %1023 = vrot.lane.b32.xlu0 %v1018_v29, %s4977_s30  ;;  %4645 = vmatpush3.msra.mxu0 %v2014_v28  ;;  %v2013_v29 = vld [vmem:[%s5908_s15 + $0x60] sm:$0xff] }
 0xa42   :  { %v4577_v30 = vpop.f32.mrf.mxu1  ;;  %4646 = vmatprep.subr.mxu0 %v2013_v29 }
 0xa43   :  { %4647 = vmatpush3.msra.mxu0 %v2013_v29  ;;  %v2012_v30 = vld [vmem:[%s5908_s15 + $0x58] sm:$0xff] }
 0xa44   :  { %v1194_v31 = vpop.f32.mrf.mxu1  ;;  %4648 = vmatprep.subr.mxu0 %v2012_v30 }
 0xa45   :  { %1198 = vst.msk [vmem:[#allocation3 + $0x5] sm:$0x1f] %vm507_vm10, %v1194_v31  ;;  %4649 = vmatpush3.msra.mxu0 %v2012_v30  ;;  %v2011_v31 = vld [vmem:[%s5908_s15 + $0x50] sm:$0xff] }
 0xa46   :  { %v4587_v34 = vpop.f32.mrf.mxu1  ;;  %4650 = vmatprep.subr.mxu0 %v2011_v31 }
 0xa47   :  { %4651 = vmatpush3.msra.mxu0 %v2011_v31  ;;  %v2008_v34 = vld [vmem:[%s5908_s15 + $0x38] sm:$0xff] }
 0xa48   :  { %v1362_v36 = vpop.f32.mrf.mxu1  ;;  %4652 = vmatprep.subr.mxu0 %v2010_v32 }
 0xa49   :  { %1367 = vrot.lane.b32.xlu1 %v1362_v36, %s4975_s26  ;;  %4653 = vmatpush3.msra.mxu0 %v2010_v32  ;;  %v2006_v36 = vld [vmem:[%s5908_s15 + $0x28] sm:$0xff] }
 0xa4a   :  { %v4597_v38 = vpop.f32.mrf.mxu1  ;;  %4654 = vmatprep.subr.mxu0 %v2009_v33 }
 0xa4b   :  { %4655 = vmatpush3.msra.mxu0 %v2009_v33  ;;  %v2004_v38 = vld [vmem:[%s5908_s15 + $0x18] sm:$0xff] }
 0xa4c   :  { %v1534_v39 = vpop.f32.mrf.mxu1  ;;  %4656 = vmatprep.subr.mxu0 %v2008_v34 }
 0xa4d   :  { %1539 = vrot.lane.b32.xlu1 %v1534_v39, %s4976_s3  ;;  %4657 = vmatpush3.msra.mxu0 %v2008_v34  ;;  %v2003_v39 = vld [vmem:[%s5908_s15 + $0x10] sm:$0xff] }
 0xa4e   :  { %v4607_v40 = vpop.f32.mrf.mxu1  ;;  %4658 = vmatprep.subr.mxu0 %v2007_v35 }
 0xa4f   :  { %4659 = vmatpush3.msra.mxu0 %v2007_v35  ;;  %v2002_v40 = vld [vmem:[%s5908_s15 + $0x8] sm:$0xff] }
 0xa50   :  { %v1706_v41 = vpop.f32.mrf.mxu1  ;;  %4660 = vmatprep.subr.mxu0 %v2006_v36 }
 0xa51   :  { %1711 = vrot.lane.b32.xlu1 %v1706_v41, %s4977_s30  ;;  %4661 = vmatpush3.msra.mxu0 %v2006_v36  ;;  %v2001_v41 = vld [vmem:[%s5908_s15] sm:$0xff] }
 0xa52   :  { %v4617_v42 = vpop.f32.mrf.mxu1  ;;  %4662 = vmatprep.subr.mxu0 %v2005_v37 }
 0xa53   :  { %4663 = vmatpush3.msra.mxu0 %v2005_v37  ;;  %v4258_v42 = vld [vmem:[%s5909_s14] ss:$0 sm:$0xff] }
 0xa54   :  { %4664 = vmatprep.subr.mxu0 %v2004_v38  ;;  %v4261_v37 = vld [vmem:[%s5910_s16] ss:$0 sm:$0xff] }
 0xa55   :  { %4665 = vmatpush3.msra.mxu0 %v2004_v38 }
 0xa56   :  { %4666 = vmatprep.subr.mxu0 %v2003_v39 }
 0xa57   :  { %4667 = vmatpush3.msra.mxu0 %v2003_v39 }
 0xa58   :  { %4668 = vmatprep.subr.mxu0 %v2002_v40 }
 0xa59   :  { %4669 = vmatpush3.msra.mxu0 %v2002_v40 }
 0xa5a   :  { %4670 = vmatprep.subr.mxu0 %v2001_v41 }
 0xa5b   :  { %4671 = vmatpush3.msra.mxu0 %v2001_v41 }
 0xa5c   :  { %4716 = vmatprep.subr.mxu0 %v4962_v16 }
 0xaaf   :  { %v851_v43 = vpop.permute.xlu0 %850 }
 0xab0   :  { %854 = vst.msk [vmem:[#allocation3] sm:$0x1f] %vm853_vm13, %v851_v43 }
 0xab3   :  { %v1024_v44 = vpop.permute.xlu0 %1023 }
 0xab4   :  { %1027 = vst.msk [vmem:[#allocation3] sm:$0x1f] %vm1026_vm14, %v1024_v44 }
 0xabb   :  { %v1368_v45 = vpop.permute.xlu1 %1367 }
 0xabc   :  { %1370 = vst.msk [vmem:[#allocation3 + $0x5] sm:$0x1f] %vm680_vm12, %v1368_v45 }
 0xabf   :  { %v1540_v49 = vpop.permute.xlu1 %1539 }
 0xac0   :  { %1542 = vst.msk [vmem:[#allocation3 + $0x5] sm:$0x1f] %vm853_vm13, %v1540_v49 }
 0xac3   :  { %v1712_v50 = vpop.permute.xlu1 %1711 }
 0xac4   :  { %1714 = vst.msk [vmem:[#allocation3 + $0x5] sm:$0x1f] %vm1026_vm14, %v1712_v50 }
 0xacb   :  { %v1715_v51 = vld [vmem:[#allocation3] sm:$0xff]  ;;  %v1716_v52 = vld [vmem:[#allocation3 + $0x8] sm:$0x3] }
 0xacc   :  { %4626 = vmatprep.mubr.msk.f32.mxu1 %vm200_vm3, %v1715_v51 }
 0xacd   :  { %4627 = vmatmul.mubr.msk.f32.vlgmr.msra.gmra.mxu1 %vm200_vm3, %v1716_v52 }
 0xace   :  { %4630 = vmatpush3.msra.mxu1 %v1858_v6 }
 0xacf   :  { %4631 = vmatprep.subr.mxu1 %v1857_v7 }
 0xad0   :  { %4632 = vmatpush3.msra.mxu1 %v1857_v7 }
 0xad1   :  { %4633 = vmatprep.subr.mxu1 %v1856_v21 }
 0xad2   :  { %4634 = vmatpush3.msra.mxu1 %v1856_v21 }
 0xad3   :  { %4635 = vmatprep.subr.mxu1 %v1855_v8 }
 0xad4   :  { %4636 = vmatpush3.msra.mxu1 %v1855_v8 }
 0xb8d   :  { %v4628_v54 = vpop.f32.mrf.mxu1 }
 0xb8e   :  { %v1806_v55 = vadd.f32 %v4628_v54, %v4253_v53 }
 0xb8f   :  { %v1800_v56 = vpop.f32.mrf.mxu1 }
 0xb90   :  { %v5439_v57 = vadd.f32 %v1806_v55, %v5206_v48  ;;  %v1801_v58 = vadd.f32 %v4253_v53, %v1800_v56 }
 0xb92   :  { %v5442_v59 = vadd.f32 %v1801_v58, %v5202_v46  ;;  %v1816_v60 = vsel %vm204_vm4, %v5439_v57, 0.0 }
 0xb93   :  { %1817 = vadd.xlane.f32.xlu1 %v1816_v60 }
 0xb94   :  { %v1813_v61 = vsel %vm200_vm3, %v5442_v59, 0.0 }
 0xb95   :  { %1814 = vadd.xlane.f32.xlu0 %v1813_v61 }
 0xc1c   :  { %v1818_v62 = vpop.xlane.xlu1 %1817 }
 0xc1d   :  { %v1820_v63 = vmul.f32 0.03125, %v1818_v62 }
 0xc1e   :  { %v1815_v0 = vpop.xlane.xlu0 %1814 }
 0xc1f   :  { %v1819_v1 = vmul.f32 0.03125, %v1815_v0  ;;  %v1822_v2 = vsub.f32 %v5439_v57, %v1820_v63 }
 0xc21   :  { %v1821_v48 = vsub.f32 %v5442_v59, %v1819_v1  ;;  %v1824_v4 = vmul.f32 %v1822_v2, %v1822_v2 }
 0xc23   :  { %v1823_v3 = vmul.f32 %v1821_v48, %v1821_v48  ;;  %v1828_v5 = vsel %vm204_vm4, %v1824_v4, 0.0 }
 0xc25   :  { %v1825_v46 = vsel %vm200_vm3, %v1823_v3, 0.0 }
 0xc26   :  { %1826 = vadd.xlane.f32.xlu0 %v1825_v46 }
 0xc2a   :  { %1829 = vadd.xlane.f32.xlu0 %v1828_v5 }
 0xcaf   :  { %v1827_v47 = vpop.xlane.xlu0 %1826 }
 0xcb0   :  { %v1831_v9 = vmul.f32 0.03125, %v1827_v47 }
 0xcb2   :  { %v1833_v10 = vadd.f32 1e-05, %v1831_v9 }
 0xcb3   :  { %v1830_v11 = vpop.xlane.xlu0 %1829 }
 0xcb4   :  { %4898 = vrsqrt.f32 %v1833_v10  ;;  %v1832_v12 = vmul.f32 0.03125, %v1830_v11 }
 0xcb6   :  { %v1834_v13 = vadd.f32 1e-05, %v1832_v12 }
 0xcb8   :  { %4900 = vrsqrt.f32 %v1834_v13 }
 0xcc1   :  { %v4899_v14 = vpop.eup %4898 }
 0xcc2   :  { %v1837_v17 = vmul.f32 %v4899_v14, %v1821_v48 }
 0xcc4   :  { %v1845_v19 = vmul.f32 %v4256_v15, %v1837_v17 }
 0xcc5   :  { %v4901_v20 = vpop.eup %4900 }
 0xcc6   :  { %v1838_v22 = vmul.f32 %v4901_v20, %v1822_v2  ;;  %v1853_v23 = vadd.f32 %v4257_v18, %v1845_v19 }
 0xcc8   :  { %v1846_v24 = vmul.f32 %v4256_v15, %v1838_v22  ;;  %4637 = vmatprep.mubr.msk.f32.mxu1 %vm200_vm3, %v1853_v23 }
 0xcca   :  { %v1854_v25 = vadd.f32 %v4257_v18, %v1846_v24  ;;  %v4978_v24 = vmov -1.0  }
 0xccc   :  { %4638 = vmatmul.mubr.msk.f32.vlgmr.msra.gmra.mxu1 %vm200_vm3, %v1854_v25 }
 0xd8c   :  { %v4639_v43 = vpop.f32.mrf.mxu1 }
 0xd8d   :  { %v1944_v44 = vadd.f32 %v4639_v43, %v4258_v42 }
 0xd8e   :  { %v1938_v45 = vpop.f32.mrf.mxu1 }
 0xd8f   :  { %v1950_v49 = vmul.f32 0.70710677, %v1944_v44  ;;  %v1939_v50 = vadd.f32 %v4258_v42, %v1938_v45  ;;  %v1948_v34 = vmul.f32 0.5, %v1944_v44 }
 0xd91   :  { %v1956_v51 = vand.u32 2147483647, %v1950_v49  ;;  %v1949_v52 = vmul.f32 0.70710677, %v1939_v50  ;;  %vm1952_vm15 = vcmp.ge.f32.partialorder %v1950_v49, 0.0  ;;  %v1947_v32 = vmul.f32 0.5, %v1939_v50 }
 0xd92   :  { %v1954_v25 = vsel %vm1952_vm15, 1.0, %v4978_v24 }
 0xd93   :  { %v1958_v53 = vmul.f32 0.3275911, %v1956_v51  ;;  %v1955_v54 = vand.u32 2147483647, %v1949_v52  ;;  %v1984_v60 = vsub.f32 0.0, %v1956_v51  ;;  %vm1951_vm1 = vcmp.ge.f32.partialorder %v1949_v52, 0.0 }
 0xd94   :  { %v1953_v29 = vsel %vm1951_vm1, 1.0, %v4978_v24 }
 0xd95   :  { %v1960_v55 = vadd.f32 1.0, %v1958_v53  ;;  %v1957_v56 = vmul.f32 0.3275911, %v1955_v54  ;;  %v1983_v61 = vsub.f32 0.0, %v1955_v54  ;;  %v1986_v62 = vmul.f32 %v1984_v60, %v1956_v51 }
 0xd97   :  { %4902 = vrcp.f32 %v1960_v55  ;;  %v1959_v58 = vadd.f32 1.0, %v1957_v56  ;;  %v1985_v0 = vmul.f32 %v1983_v61, %v1955_v54  ;;  %v1989_v2 = vmul.f32 1.442695, %v1986_v62  ;;  %v4269_v61 = vld [vmem:[%s5946_s23 + $0x38] sm:$0xff]  ;;  %v4268_v62 = vld [vmem:[%s5946_s23 + $0x30] sm:$0xff] }
 0xd98   :  { %4675 = vmatprep.subr.mxu1 %v4269_v61 }
 0xd99   :  { %4904 = vrcp.f32 %v1959_v58  ;;  %v1987_v46 = vmul.f32 1.442695, %v1985_v0  ;;  %4676 = vmatpush3.msra.mxu1 %v4269_v61  ;;  %v4266_v0 = vld [vmem:[%s5946_s23 + $0x20] sm:$0xff] }
 0xd9a   :  { %4906 = vpow2.f32 %v1989_v2  ;;  %4677 = vmatprep.subr.mxu1 %v4268_v62 }
 0xd9b   :  { %4908 = vpow2.f32 %v1987_v46  ;;  %4678 = vmatpush3.msra.mxu1 %v4268_v62 }
 0xda4   :  { %v4903_v63 = vpop.eup %4902 }
 0xda5   :  { %v1966_v1 = vmul.f32 1.0614054, %v4903_v63 }
 0xda6   :  { %v4905_v48 = vpop.eup %4904 }
 0xda7   :  { %v1968_v3 = vadd.f32 -1.4531521, %v1966_v1  ;;  %v1965_v4 = vmul.f32 1.0614054, %v4905_v48  ;;  %v4907_v17 = vpop.eup %4906 }
 0xda8   :  { %v4909_v22 = vpop.eup %4908 }
 0xda9   :  { %v1970_v5 = vmul.f32 %v4903_v63, %v1968_v3  ;;  %v1967_v6 = vadd.f32 -1.4531521, %v1965_v4 }
 0xdab   :  { %v1972_v7 = vadd.f32 1.4214138, %v1970_v5  ;;  %v1969_v21 = vmul.f32 %v4905_v48, %v1967_v6  ;;  %v4264_v6 = vld [vmem:[%s5900_s5 + $0x1] ss:$0 sm:$0xff] }
 0xdad   :  { %v1974_v8 = vmul.f32 %v4903_v63, %v1972_v7  ;;  %v1971_v47 = vadd.f32 1.4214138, %v1969_v21 }
 0xdaf   :  { %v1976_v9 = vadd.f32 -0.28449672, %v1974_v8  ;;  %v1973_v10 = vmul.f32 %v4905_v48, %v1971_v47  ;;  %v4265_v8 = vld [vmem:[%s5901_s6 + $0x1] ss:$0 sm:$0xff]  ;;  %s5947_s6 = smov 120  }
 0xdb1   :  { %v1978_v11 = vmul.f32 %v4903_v63, %v1976_v9  ;;  %v1975_v12 = vadd.f32 -0.28449672, %v1973_v10 }
 0xdb3   :  { %v1980_v13 = vadd.f32 0.2548296, %v1978_v11  ;;  %v1977_v14 = vmul.f32 %v4905_v48, %v1975_v12 }
 0xdb5   :  { %v1982_v15 = vmul.f32 %v4903_v63, %v1980_v13  ;;  %v1979_v18 = vadd.f32 0.2548296, %v1977_v14  ;;  %v4267_v63 = vld [vmem:[%s5946_s23 + $0x28] sm:$0xff]  ;;  %v4271_v13 = vld [vmem:[%s5902_s8 + $0x1] ss:$0 sm:$0xff]  ;;  %s5948_s8 = smov 80  }
 0xdb6   :  { %4679 = vmatprep.subr.mxu1 %v4267_v63 }
 0xdb7   :  { %v1992_v19 = vmul.f32 %v4907_v17, %v1982_v15  ;;  %v1981_v20 = vmul.f32 %v4905_v48, %v1979_v18  ;;  %4680 = vmatpush3.msra.mxu1 %v4267_v63 }
 0xdb8   :  { %4681 = vmatprep.subr.mxu1 %v4266_v0 }
 0xdb9   :  { %v1994_v23 = vsub.f32 1.0, %v1992_v19  ;;  %v1991_v26 = vmul.f32 %v4909_v22, %v1981_v20  ;;  %4682 = vmatpush3.msra.mxu1 %v4266_v0 }
 0xdba   :  { %4686 = vmatprep.subr.mxu1 %v4962_v16 }
 0xdbb   :  { %v1996_v27 = vmul.f32 %v1994_v23, %v1954_v25  ;;  %v1993_v28 = vsub.f32 1.0, %v1991_v26 }
 0xdbd   :  { %v1995_v30 = vmul.f32 %v1993_v28, %v1953_v29  ;;  %v1998_v31 = vadd.f32 1.0, %v1996_v27 }
 0xdbf   :  { %v1997_v33 = vadd.f32 1.0, %v1995_v30  ;;  %v2000_v36 = vmul.f32 %v1998_v31, %v1948_v34 }
 0xdc1   :  { %v1999_v35 = vmul.f32 %v1997_v33, %v1947_v32 }
 0xdc3   :  { %4672 = vmatprep.mubr.f32.mxu0 %v1999_v35 }
 0xdc4   :  { %4673 = vmatmul.mubr.f32.vlgmr.msra.gmra.mxu0 %v2000_v36 }
 0xdc5   :  { %4718 = vmatprep.mubr.msk.f32.mxu0 %vm4963_vm5, %v4962_v16 }
 0xe84   :  { %v4674_v38 = vpop.f32.mrf.mxu0 }
 0xe85   :  { %v2096_v39 = vadd.f32 %v4674_v38, %v4261_v37 }
 0xe86   :  { %v2090_v40 = vpop.f32.mrf.mxu0 }
 0xe87   :  { %v2100_v41 = vadd.f32 %v2096_v39, %v5439_v57  ;;  %v2091_v42 = vadd.f32 %v4261_v37, %v2090_v40 }
 0xe89   :  { %2102 = vst.msk [vmem:[#allocation2 + $0x8] sm:$0x3] %vm204_vm4, %v2100_v41  ;;  %v2099_v43 = vadd.f32 %v2091_v42, %v5442_v59 }
 0xe8b   :  { %2101 = vst.msk [vmem:[#allocation2] sm:$0xff] %vm200_vm3, %v2099_v43 }
 0xe90   :  { %v5535_v44 = vld [vmem:[#allocation2 + $0x8] sm:$0x3] }
 0xe91   :  { %v2112_v45 = vsel %vm204_vm4, %v5535_v44, 0.0 }
 0xe92   :  { %2113 = vadd.xlane.f32.xlu1 %v2112_v45  ;;  %v5539_v49 = vld [vmem:[#allocation2] sm:$0xff] }
 0xe93   :  { %v2109_v50 = vsel %vm200_vm3, %v5539_v49, 0.0 }
 0xe94   :  { %2110 = vadd.xlane.f32.xlu0 %v2109_v50 }
 0xf1b   :  { %v2114_v57 = vpop.xlane.xlu1 %2113 }
 0xf1c   :  { %v2116_v51 = vmul.f32 0.03125, %v2114_v57 }
 0xf1d   :  { %v2111_v52 = vpop.xlane.xlu0 %2110 }
 0xf1e   :  { %v2118_v53 = vsub.f32 %v5535_v44, %v2116_v51  ;;  %v2115_v59 = vmul.f32 0.03125, %v2111_v52 }
 0xf20   :  { %v2117_v54 = vsub.f32 %v5539_v49, %v2115_v59  ;;  %v2120_v55 = vmul.f32 %v2118_v53, %v2118_v53 }
 0xf22   :  { %v2124_v56 = vsel %vm204_vm4, %v2120_v55, 0.0  ;;  %v2119_v58 = vmul.f32 %v2117_v54, %v2117_v54 }
 0xf23   :  { %2125 = vadd.xlane.f32.xlu1 %v2124_v56 }
 0xf24   :  { %v2121_v60 = vsel %vm200_vm3, %v2119_v58, 0.0 }
 0xf25   :  { %2122 = vadd.xlane.f32.xlu0 %v2121_v60 }
 0xfac   :  { %v2126_v1 = vpop.xlane.xlu1 %2125 }
 0xfad   :  { %v2128_v2 = vmul.f32 0.03125, %v2126_v1 }
 0xfae   :  { %v2123_v48 = vpop.xlane.xlu0 %2122 }
 0xfaf   :  { %v2130_v3 = vadd.f32 1e-05, %v2128_v2  ;;  %v2127_v46 = vmul.f32 0.03125, %v2123_v48 }
 0xfb1   :  { %4910 = vrsqrt.f32 %v2130_v3  ;;  %v2129_v4 = vadd.f32 1e-05, %v2127_v46 }
 0xfb3   :  { %4912 = vrsqrt.f32 %v2129_v4 }
 0xfbe   :  { %v4911_v5 = vpop.eup %4910 }
 0xfbf   :  { %v2134_v7 = vmul.f32 %v4911_v5, %v2118_v53 }
 0xfc0   :  { %v4913_v21 = vpop.eup %4912 }
 0xfc1   :  { %v2133_v47 = vmul.f32 %v4913_v21, %v2117_v54  ;;  %v2142_v9 = vmul.f32 %v4264_v6, %v2134_v7 }
 0xfc3   :  { %v2141_v10 = vmul.f32 %v4264_v6, %v2133_v47  ;;  %v2150_v11 = vadd.f32 %v4265_v8, %v2142_v9 }
 0xfc5   :  { %v2149_v12 = vadd.f32 %v4265_v8, %v2141_v10 }
 0xfc7   :  { %4683 = vmatprep.mubr.msk.f32.mxu1 %vm200_vm3, %v2149_v12 }
 0xfc8   :  { %4684 = vmatmul.mubr.msk.f32.vlgmr.msra.gmra.mxu1 %vm200_vm3, %v2150_v11 }
 0xfc9   :  { %4688 = vmatprep.mubr.msk.f32.mxu1 %vm4963_vm5, %v4962_v16 }
0x1088   :  { %v4685_v14 = vpop.f32.mrf.mxu1 }
0x1089   :  { %v2242_v15 = vadd.f32 %v4685_v14, %v4271_v13 }
0x108a   :  { %v2236_v17 = vpop.f32.mrf.mxu1 }
0x108b   :  { %v5573_v18 = vadd.f32 %v4271_v13, %v2236_v17  ;;  %v2930_v45 = vrot.slane %v2242_v15, 5 }
0x108d   :  { %2246 = vrot.lane.b32.xlu0 %v5573_v18, %s4964_s7  ;;  %v2929_v43 = vrot.slane %v5573_v18, 5 }
0x108f   :  { %v5613_v50 = vsel %vm1029_vm11, %v2929_v43, %v2930_v45 }
0x1091   :  { %2414 = vrot.lane.b32.xlu0 %v5573_v18, %s4965_s22 }
0x10ff   :  { %v2247_v19 = vpop.permute.xlu0 %2246 }
0x1100   :  { %4687 = vmatpush3.xpose.msk.msra.mxu1 %vm340_vm6, %v2247_v19 }
0x1101   :  { %4691 = vmatprep.subr.mxu1 %v4962_v16 }
0x1103   :  { %4689 = vmatmul.mubr.msk.f32.vlgmr.msra.gmra.mxu1 %vm340_vm6, %v5573_v18  ;;  %v2415_v35 = vpop.permute.xlu0 %2414 }
0x1104   :  { %4693 = vmatprep.mubr.msk.f32.mxu1 %vm4963_vm5, %v4962_v16 }
0x11c3   :  { %v2318_v20 = vpop.f32.mrf.mxu1 }
0x11c4   :  { %v2322_v22 = vmul.f32 0.35355338, %v2318_v20 }
0x11c5   :  { %v4690_v23 = vpop.f32.mrf.mxu1 }
0x11c6   :  { %v2323_v25 = vsel %vm416_vm7, %v2322_v22, -inf }
0x11c7   :  { %2324 = vmax.xlane.f32.xlu1 %v2323_v25 }
0x11d8   :  { %2334 = vrot.lane.b32.xlu1 %v5573_v18, %s4966_s0 }
0x1250   :  { %v2325_v26 = vpop.xlane.xlu1 %2324 }
0x1251   :  { %v2326_v27 = vsub.f32 %v2322_v22, %v2325_v26 }
0x1253   :  { %v2327_v28 = vmul.f32 1.442695, %v2326_v27 }
0x1254   :  { %v2335_v29 = vpop.permute.xlu1 %2334 }
0x1255   :  { %4914 = vpow2.f32 %v2327_v28  ;;  %4692 = vmatpush3.msk.msra.mxu1 %vm434_vm8, %v2335_v29 }
0x1256   :  { %4696 = vmatprep.subr.mxu1 %v4962_v16 }
0x1262   :  { %v4915_v30 = vpop.eup %4914 }
0x1263   :  { %v2329_v31 = vsel %vm416_vm7, %v4915_v30, 0.0 }
0x1264   :  { %2330 = vadd.xlane.f32.xlu1 %v2329_v31 }
0x1275   :  { %2412 = vrot.lane.b32.xlu1 %v5573_v18, %s5947_s6 }
0x1279   :  { %2586 = vrot.lane.b32.xlu1 %v5573_v18, %s5948_s8 }
0x12ed   :  { %v2331_v32 = vpop.xlane.xlu1 %2330 }
0x12ee   :  { %4916 = vrcp.f32 %v2331_v32 }
0x12f1   :  { %v2413_v36 = vpop.permute.xlu1 %2412 }
0x12f5   :  { %v2587_v55 = vpop.permute.xlu1 %2586 }
0x12fb   :  { %v4917_v33 = vpop.eup %4916 }
0x12fc   :  { %v2333_v34 = vmul.f32 %v4917_v33, %v4915_v30 }
0x12fe   :  { %4694 = vmatmul.mubr.msk.f32.vlgmr.msra.gmra.mxu1 %vm430_vm9, %v2333_v34 }
0x12ff   :  { %4697 = vmatpush3.xpose.msk.msra.mxu1 %vm340_vm6, %v2415_v35  ;;  %4698 = vmatprep.mubr.msk.f32.mxu1 %vm4963_vm5, %v4962_v16 }
0x1300   :  { %4701 = vmatprep.subr.mxu1 %v4962_v16 }
0x1302   :  { %4699 = vmatmul.mubr.msk.f32.vlgmr.msra.gmra.mxu1 %vm340_vm6, %v2413_v36 }
0x1303   :  { %4703 = vmatprep.mubr.msk.f32.mxu1 %vm4963_vm5, %v4962_v16 }
0x13be   :  { %v2407_v37 = vpop.f32.mrf.mxu1 }
0x13bf   :  { %2411 = vst.msk [vmem:[#allocation3] sm:$0x1f] %vm507_vm10, %v2407_v37 }
0x13c0   :  { %v4695_v38 = vpop.f32.mrf.mxu1 }
0x13c2   :  { %v2486_v39 = vpop.f32.mrf.mxu1 }
0x13c3   :  { %v2490_v40 = vmul.f32 0.35355338, %v2486_v39 }
0x13c4   :  { %v4700_v41 = vpop.f32.mrf.mxu1 }
0x13c5   :  { %v2491_v42 = vsel %vm416_vm7, %v2490_v40, -inf }
0x13c6   :  { %2492 = vmax.xlane.f32.xlu0 %v2491_v42 }
0x13dc   :  { %2502 = vrot.lane.b32.xlu0 %v5573_v18, %s5949_s1 }
0x13e0   :  { %2584 = vrot.lane.b32.xlu0 %v5573_v18, %s5950_s2 }
0x13e4   :  { %2756 = vrot.lane.b32.xlu0 %v5573_v18, %s5951_s24 }
0x13e8   :  { %3100 = vrot.lane.b32.xlu0 %v5613_v50, %s4965_s22  ;;  %s5954_s22 = smov 48  }
0x13ec   :  { %3272 = vrot.lane.b32.xlu0 %v5613_v50, %s5948_s8 }
0x13f0   :  { %3444 = vrot.lane.b32.xlu0 %v5613_v50, %s5952_s25 }
0x144f   :  { %v2493_v57 = vpop.xlane.xlu0 %2492 }
0x1450   :  { %v2494_v51 = vsub.f32 %v2490_v40, %v2493_v57 }
0x1452   :  { %v2495_v52 = vmul.f32 1.442695, %v2494_v51 }
0x1453   :  { %v2503_v53 = vpop.permute.xlu0 %2502 }
0x1454   :  { %4918 = vpow2.f32 %v2495_v52  ;;  %4702 = vmatpush3.msk.msra.mxu1 %vm434_vm8, %v2503_v53 }
0x1455   :  { %4706 = vmatprep.subr.mxu1 %v4962_v16 }
0x1457   :  { %v2585_v56 = vpop.permute.xlu0 %2584 }
0x145b   :  { %v2757_v60 = vpop.permute.xlu0 %2756 }
0x145f   :  { %v3101_v62 = vpop.permute.xlu0 %3100 }
0x1461   :  { %v4919_v59 = vpop.eup %4918 }
0x1462   :  { %v2497_v54 = vsel %vm416_vm7, %v4919_v59, 0.0 }
0x1463   :  { %2498 = vadd.xlane.f32.xlu1 %v2497_v54  ;;  %v3273_v2 = vpop.permute.xlu0 %3272 }
0x1467   :  { %v3445_v46 = vpop.permute.xlu0 %3444 }
0x1474   :  { %2758 = vrot.lane.b32.xlu1 %v5573_v18, %s5952_s25 }
0x1478   :  { %2932 = vrot.lane.b32.xlu1 %v5613_v50, %s4964_s7  ;;  %s5953_s7 = smov 40  }
0x147c   :  { %3098 = vrot.lane.b32.xlu1 %v5613_v50, %s5947_s6 }
0x1480   :  { %3270 = vrot.lane.b32.xlu1 %v5613_v50, %s5950_s2 }
0x1484   :  { %3442 = vrot.lane.b32.xlu1 %v5613_v50, %s5951_s24 }
0x14ec   :  { %v2499_v58 = vpop.xlane.xlu1 %2498 }
0x14ed   :  { %4920 = vrcp.f32 %v2499_v58 }
0x14f0   :  { %v2759_v61 = vpop.permute.xlu1 %2758 }
0x14f1   :  { %4717 = vmatpush3.xpose.msk.msra.mxu0 %vm340_vm6, %v2759_v61 }
0x14f2   :  { %4726 = vmatprep.subr.mxu0 %v4962_v16 }
0x14f4   :  { %4719 = vmatmul.mubr.msk.f32.vlgmr.msra.gmra.mxu0 %vm340_vm6, %v2757_v60  ;;  %v2933_v63 = vpop.permute.xlu1 %2932 }
0x14f5   :  { %4727 = vmatpush3.xpose.msk.msra.mxu0 %vm340_vm6, %v2933_v63  ;;  %4728 = vmatprep.mubr.msk.f32.mxu0 %vm4963_vm5, %v4962_v16 }
0x14f6   :  { %4736 = vmatprep.subr.mxu0 %v4962_v16 }
0x14f8   :  { %4729 = vmatmul.mubr.msk.f32.vlgmr.msra.gmra.mxu0 %vm340_vm6, %v5613_v50  ;;  %v3099_v0 = vpop.permute.xlu1 %3098 }
0x14f9   :  { %4737 = vmatpush3.xpose.msk.msra.mxu0 %vm340_vm6, %v3101_v62  ;;  %4738 = vmatprep.mubr.msk.f32.mxu0 %vm4963_vm5, %v4962_v16 }
0x14fa   :  { %v4921_v1 = vpop.eup %4920  ;;  %4746 = vmatprep.subr.mxu0 %v4962_v16 }
0x14fb   :  { %v2501_v48 = vmul.f32 %v4921_v1, %v4919_v59 }
0x14fc   :  { %4739 = vmatmul.mubr.msk.f32.vlgmr.msra.gmra.mxu0 %vm340_vm6, %v3099_v0  ;;  %v3271_v3 = vpop.permute.xlu1 %3270 }
0x14fd   :  { %4704 = vmatmul.mubr.msk.f32.vlgmr.msra.gmra.mxu1 %vm430_vm9, %v2501_v48  ;;  %4747 = vmatpush3.xpose.msk.msra.mxu0 %vm340_vm6, %v3273_v2 }
0x14fe   :  { %4707 = vmatpush3.xpose.msk.msra.mxu1 %vm340_vm6, %v2587_v55  ;;  %4748 = vmatprep.mubr.msk.f32.mxu0 %vm4963_vm5, %v4962_v16 }
0x14ff   :  { %4708 = vmatprep.mubr.msk.f32.mxu1 %vm4963_vm5, %v4962_v16  ;;  %4756 = vmatprep.subr.mxu0 %v4962_v16 }
0x1500   :  { %4749 = vmatmul.mubr.msk.f32.vlgmr.msra.gmra.mxu0 %vm340_vm6, %v3271_v3  ;;  %4711 = vmatprep.subr.mxu1 %v4962_v16  ;;  %v3443_v4 = vpop.permute.xlu1 %3442 }
0x1501   :  { %4709 = vmatmul.mubr.msk.f32.vlgmr.msra.gmra.mxu1 %vm340_vm6, %v2585_v56  ;;  %4757 = vmatpush3.xpose.msk.msra.mxu0 %vm340_vm6, %v3445_v46 }
0x1502   :  { %4758 = vmatprep.mubr.msk.f32.mxu0 %vm4963_vm5, %v4962_v16  ;;  %4713 = vmatprep.mubr.msk.f32.mxu1 %vm4963_vm5, %v4962_v16 }
0x1504   :  { %4759 = vmatmul.mubr.msk.f32.vlgmr.msra.gmra.mxu0 %vm340_vm6, %v3443_v4 }
0x15b4   :  { %v2830_v5 = vpop.f32.mrf.mxu0 }
0x15b5   :  { %v2834_v6 = vmul.f32 0.35355338, %v2830_v5 }
0x15b6   :  { %v4720_v7 = vpop.f32.mrf.mxu0 }
0x15b7   :  { %v2835_v21 = vsel %vm416_vm7, %v2834_v6, -inf }
0x15b8   :  { %2836 = vmax.xlane.f32.xlu1 %v2835_v21  ;;  %v3004_v8 = vpop.f32.mrf.mxu0 }
0x15b9   :  { %v3008_v20 = vmul.f32 0.35355338, %v3004_v8 }
0x15ba   :  { %v4730_v47 = vpop.f32.mrf.mxu0 }
0x15bb   :  { %v3009_v29 = vsel %vm416_vm7, %v3008_v20, -inf }
0x15bc   :  { %v3172_v9 = vpop.f32.mrf.mxu0 }
0x15bd   :  { %v5666_v10 = vpop.f32.mrf.mxu1  ;;  %v3176_v28 = vmul.f32 0.35355338, %v3172_v9 }
0x15be   :  { %v4740_v11 = vpop.f32.mrf.mxu0 }
0x15bf   :  { %v4705_v12 = vpop.f32.mrf.mxu1  ;;  %v3177_v31 = vsel %vm416_vm7, %v3176_v28, -inf }
0x15c0   :  { %v3344_v13 = vpop.f32.mrf.mxu0 }
0x15c1   :  { %v2658_v14 = vpop.f32.mrf.mxu1  ;;  %v3348_v30 = vmul.f32 0.35355338, %v3344_v13 }
0x15c2   :  { %v2662_v15 = vmul.f32 0.35355338, %v2658_v14  ;;  %v4750_v17 = vpop.f32.mrf.mxu0 }
0x15c3   :  { %v4710_v19 = vpop.f32.mrf.mxu1  ;;  %v3349_v32 = vsel %vm416_vm7, %v3348_v30, -inf }
0x15c4   :  { %v3516_v22 = vpop.f32.mrf.mxu0  ;;  %v2663_v23 = vsel %vm416_vm7, %v2662_v15, -inf }
0x15c5   :  { %v3520_v25 = vmul.f32 0.35355338, %v3516_v22  ;;  %2664 = vmax.xlane.f32.xlu0 %v2663_v23 }
0x15c6   :  { %v4760_v26 = vpop.f32.mrf.mxu0 }
0x15c7   :  { %v3521_v27 = vsel %vm416_vm7, %v3520_v25, -inf }
0x15c8   :  { %3522 = vmax.xlane.f32.xlu1 %v3521_v27 }
0x15c9   :  { %3010 = vmax.xlane.f32.xlu0 %v3009_v29 }
0x15cd   :  { %3178 = vmax.xlane.f32.xlu0 %v3177_v31 }
0x15d1   :  { %3350 = vmax.xlane.f32.xlu0 %v3349_v32 }
0x1641   :  { %v2837_v33 = vpop.xlane.xlu1 %2836 }
0x1642   :  { %v2838_v34 = vsub.f32 %v2834_v6, %v2837_v33  ;;  %v4309_v33 = vld [vmem:[%s5903_s9 + $0x38] sm:$0xff] }
0x1643   :  { %4766 = vmatprep.subr.mxu0 %v4309_v33 }
0x1644   :  { %v2839_v35 = vmul.f32 1.442695, %v2838_v34  ;;  %v4308_v34 = vld [vmem:[%s5903_s9 + $0x30] sm:$0xff]  ;;  %4767 = vmatpush3.msra.mxu0 %v4309_v33 }
0x1645   :  { %4768 = vmatprep.subr.mxu0 %v4308_v34  ;;  %v4336_v33 = vld [vmem:[%s5908_s15 + $0xd0] sm:$0xff] }
0x1646   :  { %4922 = vpow2.f32 %v2839_v35  ;;  %4769 = vmatpush3.msra.mxu0 %v4308_v34  ;;  %v4335_v34 = vld [vmem:[%s5908_s15 + $0xc8] sm:$0xff] }
0x164e   :  { %v2665_v36 = vpop.xlane.xlu0 %2664 }
0x164f   :  { %v2666_v51 = vsub.f32 %v2662_v15, %v2665_v36  ;;  %v4307_v36 = vld [vmem:[%s5903_s9 + $0x28] sm:$0xff] }
0x1650   :  { %4770 = vmatprep.subr.mxu0 %v4307_v36 }
0x1651   :  { %v3523_v37 = vpop.xlane.xlu1 %3522  ;;  %v2667_v55 = vmul.f32 1.442695, %v2666_v51  ;;  %4771 = vmatpush3.msra.mxu0 %v4307_v36  ;;  %v4333_v36 = vld [vmem:[%s5908_s15 + $0xb8] sm:$0xff] }
0x1652   :  { %v3011_v38 = vpop.xlane.xlu0 %3010  ;;  %v3524_v42 = vsub.f32 %v3520_v25, %v3523_v37 }
0x1653   :  { %v5673_v39 = vpop.eup %4922  ;;  %v3012_v40 = vsub.f32 %v3008_v20, %v3011_v38  ;;  %v4306_v38 = vld [vmem:[%s5903_s9 + $0x20] sm:$0xff] }
0x1654   :  { %v2841_v41 = vsel %vm416_vm7, %v5673_v39, 0.0  ;;  %v3525_v52 = vmul.f32 1.442695, %v3524_v42  ;;  %4772 = vmatprep.subr.mxu0 %v4306_v38 }
0x1655   :  { %v3013_v43 = vmul.f32 1.442695, %v3012_v40  ;;  %2842 = vadd.xlane.f32.xlu1 %v2841_v41  ;;  %4773 = vmatpush3.msra.mxu0 %v4306_v38  ;;  %v4331_v38 = vld [vmem:[%s5908_s15 + $0xa8] sm:$0xff] }
0x1656   :  { %v3179_v45 = vpop.xlane.xlu0 %3178 }
0x1657   :  { %4924 = vpow2.f32 %v3013_v43  ;;  %v3180_v57 = vsub.f32 %v3176_v28, %v3179_v45 }
0x1659   :  { %v3181_v53 = vmul.f32 1.442695, %v3180_v57 }
0x165a   :  { %v3351_v59 = vpop.xlane.xlu0 %3350 }
0x165b   :  { %4926 = vpow2.f32 %v3181_v53  ;;  %v3352_v54 = vsub.f32 %v3348_v30, %v3351_v59 }
0x165c   :  { %4928 = vpow2.f32 %v3525_v52 }
0x165d   :  { %v3353_v56 = vmul.f32 1.442695, %v3352_v54 }
0x165f   :  { %4930 = vpow2.f32 %v3353_v56 }
0x1660   :  { %4932 = vpow2.f32 %v2667_v55  ;;  %v4311_v55 = vld [vmem:[%s5904_s10 + $0x1] ss:$0 sm:$0xff] }
0x1664   :  { %v4925_v58 = vpop.eup %4924 }
0x1665   :  { %v3015_v60 = vsel %vm416_vm7, %v4925_v58, 0.0 }
0x1666   :  { %3016 = vadd.xlane.f32.xlu0 %v3015_v60 }
0x1668   :  { %v4927_v61 = vpop.eup %4926 }
0x1669   :  { %v3183_v62 = vsel %vm416_vm7, %v4927_v61, 0.0  ;;  %v5679_v63 = vpop.eup %4928 }
0x166a   :  { %3184 = vadd.xlane.f32.xlu1 %v3183_v62  ;;  %v3527_v2 = vsel %vm416_vm7, %v5679_v63, 0.0 }
0x166c   :  { %v4931_v0 = vpop.eup %4930 }
0x166d   :  { %v3355_v1 = vsel %vm416_vm7, %v4931_v0, 0.0  ;;  %v4933_v48 = vpop.eup %4932 }
0x166e   :  { %3356 = vadd.xlane.f32.xlu0 %v3355_v1  ;;  %3528 = vadd.xlane.f32.xlu1 %v3527_v2  ;;  %v2669_v3 = vsel %vm416_vm7, %v4933_v48, 0.0  ;;  %vm4108_vm7 = vcmask 259077  }
0x1672   :  { %2670 = vadd.xlane.f32.xlu0 %v2669_v3 }
0x167f   :  { %2846 = vrot.lane.b32.xlu1 %v5573_v18, %s5953_s7 }
0x1683   :  { %3020 = vrot.lane.b32.xlu1 %v5613_v50, %s4966_s0 }
0x1687   :  { %3188 = vrot.lane.b32.xlu1 %v5613_v50, %s5949_s1 }
0x1688   :  { %2674 = vrot.lane.b32.xlu0 %v5573_v18, %s5954_s22 }
0x168b   :  { %3532 = vrot.lane.b32.xlu1 %v5613_v50, %s5953_s7 }
0x168c   :  { %3360 = vrot.lane.b32.xlu0 %v5613_v50, %s5954_s22 }
0x1690   :  { %2580 = vrot.lane.b32.xlu0 %v5666_v10, %s4975_s26 }
0x16de   :  { %v2843_v5 = vpop.xlane.xlu1 %2842 }
0x16ef   :  { %v3017_v46 = vpop.xlane.xlu0 %3016 }
0x16f3   :  { %v3185_v7 = vpop.xlane.xlu1 %3184 }
0x16f7   :  { %v3357_v4 = vpop.xlane.xlu0 %3356  ;;  %v3529_v18 = vpop.xlane.xlu1 %3528 }
0x16fb   :  { %v2671_v6 = vpop.xlane.xlu0 %2670  ;;  %v2847_v47 = vpop.permute.xlu1 %2846 }
0x16fc   :  { %4934 = vrcp.f32 %v2671_v6 }
0x16fd   :  { %4936 = vrcp.f32 %v2843_v5 }
0x16fe   :  { %4938 = vrcp.f32 %v3017_v46 }
0x16ff   :  { %v2675_v21 = vpop.permute.xlu0 %2674  ;;  %4940 = vrcp.f32 %v3185_v7  ;;  %v3021_v12 = vpop.permute.xlu1 %3020 }
0x1700   :  { %4712 = vmatpush3.msk.msra.mxu1 %vm434_vm8, %v2675_v21  ;;  %4942 = vrcp.f32 %v3357_v4  ;;  %v4321_v21 = vld [vmem:[%s5905_s13 + $0x38] sm:$0xff] }
0x1701   :  { %4721 = vmatprep.subr.mxu1 %v4962_v16  ;;  %4944 = vrcp.f32 %v3529_v18  ;;  %v4320_v18 = vld [vmem:[%s5905_s13 + $0x30] sm:$0xff] }
0x1703   :  { %v3361_v8 = vpop.permute.xlu0 %3360  ;;  %v3189_v19 = vpop.permute.xlu1 %3188 }
0x1707   :  { %v2581_v50 = vpop.permute.xlu0 %2580  ;;  %v3533_v26 = vpop.permute.xlu1 %3532 }
0x1708   :  { %2583 = vst.msk [vmem:[#allocation3] sm:$0x1f] %vm680_vm12, %v2581_v50  ;;  %v4318_v50 = vld [vmem:[%s5905_s13 + $0x20] sm:$0xff] }
0x1709   :  { %v4935_v9 = vpop.eup %4934 }
0x170a   :  { %v2673_v10 = vmul.f32 %v4935_v9, %v4933_v48  ;;  %v4937_v11 = vpop.eup %4936 }
0x170b   :  { %v2845_v13 = vmul.f32 %v4937_v11, %v5673_v39  ;;  %v4939_v14 = vpop.eup %4938 }
0x170c   :  { %4714 = vmatmul.mubr.msk.f32.vlgmr.msra.gmra.mxu1 %vm430_vm9, %v2673_v10  ;;  %v3019_v15 = vmul.f32 %v4939_v14, %v4925_v58  ;;  %v4941_v17 = vpop.eup %4940 }
0x170d   :  { %4722 = vmatpush3.msk.msra.mxu1 %vm434_vm8, %v2847_v47  ;;  %4723 = vmatprep.mubr.msk.f32.mxu1 %vm4963_vm5, %v4962_v16  ;;  %v3187_v20 = vmul.f32 %v4941_v17, %v4927_v61  ;;  %v4943_v22 = vpop.eup %4942 }
0x170e   :  { %4731 = vmatprep.subr.mxu1 %v4962_v16  ;;  %v3359_v23 = vmul.f32 %v4943_v22, %v4931_v0  ;;  %v4945_v25 = vpop.eup %4944 }
0x170f   :  { %v3531_v27 = vmul.f32 %v4945_v25, %v5679_v63 }
0x1710   :  { %4724 = vmatmul.mubr.msk.f32.vlgmr.msra.gmra.mxu1 %vm430_vm9, %v2845_v13 }
0x1711   :  { %4732 = vmatpush3.msk.msra.mxu1 %vm434_vm8, %v3021_v12  ;;  %4733 = vmatprep.mubr.msk.f32.mxu1 %vm4963_vm5, %v4962_v16 }
0x1712   :  { %4741 = vmatprep.subr.mxu1 %v4962_v16 }
0x1714   :  { %4734 = vmatmul.mubr.msk.f32.vlgmr.msra.gmra.mxu1 %vm430_vm9, %v3019_v15  ;;  %v4316_v15 = vld [vmem:[%s5906_s11 + $0x1] ss:$0 sm:$0xff] }
0x1715   :  { %4742 = vmatpush3.msk.msra.mxu1 %vm434_vm8, %v3189_v19  ;;  %4743 = vmatprep.mubr.msk.f32.mxu1 %vm4963_vm5, %v4962_v16  ;;  %v4317_v19 = vld [vmem:[%s5907_s12 + $0x1] ss:$0 sm:$0xff] }
0x1716   :  { %4751 = vmatprep.subr.mxu1 %v4962_v16 }
0x1718   :  { %4744 = vmatmul.mubr.msk.f32.vlgmr.msra.gmra.mxu1 %vm430_vm9, %v3187_v20 }
0x1719   :  { %4752 = vmatpush3.msk.msra.mxu1 %vm434_vm8, %v3361_v8  ;;  %4753 = vmatprep.mubr.msk.f32.mxu1 %vm4963_vm5, %v4962_v16  ;;  %v4319_v8 = vld [vmem:[%s5905_s13 + $0x28] sm:$0xff] }
0x171a   :  { %4761 = vmatprep.subr.mxu1 %v4962_v16 }
0x171c   :  { %4754 = vmatmul.mubr.msk.f32.vlgmr.msra.gmra.mxu1 %vm430_vm9, %v3359_v23 }
0x171d   :  { %4762 = vmatpush3.msk.msra.mxu1 %vm434_vm8, %v3533_v26  ;;  %4763 = vmatprep.mubr.msk.f32.mxu1 %vm4963_vm5, %v4962_v16 }
0x171e   :  { %4777 = vmatprep.subr.mxu1 %v4321_v21 }
0x1720   :  { %4764 = vmatmul.mubr.msk.f32.vlgmr.msra.gmra.mxu1 %vm430_vm9, %v3531_v27 }
0x1721   :  { %4778 = vmatpush3.msra.mxu1 %v4321_v21 }
0x1722   :  { %4779 = vmatprep.subr.mxu1 %v4320_v18 }
0x1723   :  { %4780 = vmatpush3.msra.mxu1 %v4320_v18 }
0x1724   :  { %4781 = vmatprep.subr.mxu1 %v4319_v8 }
0x1725   :  { %4782 = vmatpush3.msra.mxu1 %v4319_v8 }
0x1726   :  { %4783 = vmatprep.subr.mxu1 %v4318_v50 }
0x1727   :  { %4784 = vmatpush3.msra.mxu1 %v4318_v50 }
0x1728   :  { %4823 = vmatprep.subr.mxu1 %v4962_v16 }
0x17cc   :  { %v2747_v28 = vpop.f32.mrf.mxu1 }
0x17cd   :  { %2752 = vrot.lane.b32.xlu0 %v2747_v28, %s4976_s3  ;;  %v4341_v28 = vld [vmem:[%s5908_s15 + $0xf8] sm:$0xff] }
0x17ce   :  { %v4715_v29 = vpop.f32.mrf.mxu1  ;;  %4788 = vmatprep.subr.mxu0 %v4341_v28 }
0x17cf   :  { %v4340_v29 = vld [vmem:[%s5908_s15 + $0xf0] sm:$0xff] }
0x17d0   :  { %v2919_v30 = vpop.f32.mrf.mxu1 }
0x17d1   :  { %2924 = vrot.lane.b32.xlu0 %v2919_v30, %s4977_s30  ;;  %v4339_v30 = vld [vmem:[%s5908_s15 + $0xe8] sm:$0xff] }
0x17d2   :  { %v4725_v31 = vpop.f32.mrf.mxu1 }
0x17d3   :  { %v4338_v31 = vld [vmem:[%s5908_s15 + $0xe0] sm:$0xff] }
0x17d4   :  { %v3093_v32 = vpop.f32.mrf.mxu1 }
0x17d5   :  { %3097 = vst.msk [vmem:[#allocation3 + $0x5] sm:$0x1f] %vm507_vm10, %v3093_v32  ;;  %v4337_v32 = vld [vmem:[%s5908_s15 + $0xd8] sm:$0xff] }
0x17d6   :  { %v4735_v35 = vpop.f32.mrf.mxu1 }
0x17d7   :  { %v4334_v35 = vld [vmem:[%s5908_s15 + $0xc0] sm:$0xff] }
0x17d8   :  { %v3261_v37 = vpop.f32.mrf.mxu1 }
0x17d9   :  { %3266 = vrot.lane.b32.xlu1 %v3261_v37, %s4975_s26  ;;  %v4332_v37 = vld [vmem:[%s5908_s15 + $0xb0] sm:$0xff] }
0x17da   :  { %v4745_v39 = vpop.f32.mrf.mxu1 }
0x17db   :  { %v4330_v39 = vld [vmem:[%s5908_s15 + $0xa0] sm:$0xff] }
0x17dc   :  { %v3433_v40 = vpop.f32.mrf.mxu1 }
0x17dd   :  { %3438 = vrot.lane.b32.xlu1 %v3433_v40, %s4976_s3  ;;  %v4329_v40 = vld [vmem:[%s5908_s15 + $0x98] sm:$0xff] }
0x17de   :  { %v4755_v41 = vpop.f32.mrf.mxu1 }
0x17df   :  { %v4328_v41 = vld [vmem:[%s5908_s15 + $0x90] sm:$0xff] }
0x17e0   :  { %v3605_v42 = vpop.f32.mrf.mxu1 }
0x17e1   :  { %3610 = vrot.lane.b32.xlu1 %v3605_v42, %s4977_s30  ;;  %v4327_v42 = vld [vmem:[%s5908_s15 + $0x88] sm:$0xff] }
0x17e2   :  { %v4765_v43 = vpop.f32.mrf.mxu1 }
0x17e3   :  { %v4326_v43 = vld [vmem:[%s5908_s15 + $0x80] sm:$0xff] }
0x183f   :  { %v2753_v45 = vpop.permute.xlu0 %2752 }
0x1840   :  { %2755 = vst.msk [vmem:[#allocation3] sm:$0x1f] %vm853_vm13, %v2753_v45  ;;  %v4323_v45 = vld [vmem:[%s5909_s14 + $0x1] ss:$0 sm:$0xff] }
0x1843   :  { %v2925_v57 = vpop.permute.xlu0 %2924 }
0x1844   :  { %2927 = vst.msk [vmem:[#allocation3] sm:$0x1f] %vm1026_vm14, %v2925_v57 }
0x184b   :  { %v3267_v51 = vpop.permute.xlu1 %3266 }
0x184c   :  { %3269 = vst.msk [vmem:[#allocation3 + $0x5] sm:$0x1f] %vm680_vm12, %v3267_v51 }
0x184f   :  { %v3439_v52 = vpop.permute.xlu1 %3438 }
0x1850   :  { %3441 = vst.msk [vmem:[#allocation3 + $0x5] sm:$0x1f] %vm853_vm13, %v3439_v52 }
0x1853   :  { %v3611_v53 = vpop.permute.xlu1 %3610 }
0x1854   :  { %3613 = vst.msk [vmem:[#allocation3 + $0x5] sm:$0x1f] %vm1026_vm14, %v3611_v53 }
0x185b   :  { %v3614_v59 = vld [vmem:[#allocation3] sm:$0xff]  ;;  %v3615_v54 = vld [vmem:[#allocation3 + $0x8] sm:$0x3] }
0x185c   :  { %4774 = vmatprep.mubr.msk.f32.mxu0 %vm200_vm3, %v3614_v59 }
0x185d   :  { %4775 = vmatmul.mubr.msk.f32.vlgmr.msra.gmra.mxu0 %vm200_vm3, %v3615_v54 }
0x185e   :  { %4789 = vmatpush3.msra.mxu0 %v4341_v28 }
0x185f   :  { %4790 = vmatprep.subr.mxu0 %v4340_v29 }
0x1860   :  { %4791 = vmatpush3.msra.mxu0 %v4340_v29 }
0x1861   :  { %4792 = vmatprep.subr.mxu0 %v4339_v30 }
0x1862   :  { %4793 = vmatpush3.msra.mxu0 %v4339_v30 }
0x1863   :  { %4794 = vmatprep.subr.mxu0 %v4338_v31 }
0x1864   :  { %4795 = vmatpush3.msra.mxu0 %v4338_v31 }
0x1865   :  { %4796 = vmatprep.subr.mxu0 %v4337_v32 }
0x1866   :  { %4797 = vmatpush3.msra.mxu0 %v4337_v32 }
0x1867   :  { %4798 = vmatprep.subr.mxu0 %v4336_v33 }
0x1868   :  { %4799 = vmatpush3.msra.mxu0 %v4336_v33 }
0x1869   :  { %4800 = vmatprep.subr.mxu0 %v4335_v34 }
0x186a   :  { %4801 = vmatpush3.msra.mxu0 %v4335_v34 }
0x186b   :  { %4802 = vmatprep.subr.mxu0 %v4334_v35 }
0x186c   :  { %4803 = vmatpush3.msra.mxu0 %v4334_v35 }
0x186d   :  { %4804 = vmatprep.subr.mxu0 %v4333_v36 }
0x186e   :  { %4805 = vmatpush3.msra.mxu0 %v4333_v36 }
0x186f   :  { %4806 = vmatprep.subr.mxu0 %v4332_v37 }
0x1870   :  { %4807 = vmatpush3.msra.mxu0 %v4332_v37 }
0x1871   :  { %4808 = vmatprep.subr.mxu0 %v4331_v38 }
0x1872   :  { %4809 = vmatpush3.msra.mxu0 %v4331_v38 }
0x1873   :  { %4810 = vmatprep.subr.mxu0 %v4330_v39 }
0x1874   :  { %4811 = vmatpush3.msra.mxu0 %v4330_v39  ;;  %v4343_v39 = vld [vmem:[%s5910_s16 + $0x1] ss:$0 sm:$0xff] }
0x1875   :  { %4812 = vmatprep.subr.mxu0 %v4329_v40 }
0x1876   :  { %4813 = vmatpush3.msra.mxu0 %v4329_v40 }
0x1877   :  { %4814 = vmatprep.subr.mxu0 %v4328_v41 }
0x1878   :  { %4815 = vmatpush3.msra.mxu0 %v4328_v41 }
0x1879   :  { %4816 = vmatprep.subr.mxu0 %v4327_v42 }
0x187a   :  { %4817 = vmatpush3.msra.mxu0 %v4327_v42 }
0x187b   :  { %4818 = vmatprep.subr.mxu0 %v4326_v43 }
0x187c   :  { %4819 = vmatpush3.msra.mxu0 %v4326_v43 }
0x191d   :  { %v4776_v56 = vpop.f32.mrf.mxu0 }
0x191e   :  { %v3707_v58 = vadd.f32 %v4776_v56, %v4311_v55 }
0x191f   :  { %v3701_v60 = vpop.f32.mrf.mxu0 }
0x1920   :  { %v5758_v61 = vadd.f32 %v3707_v58, %v5535_v44  ;;  %v3702_v62 = vadd.f32 %v4311_v55, %v3701_v60 }
0x1922   :  { %v5761_v63 = vadd.f32 %v3702_v62, %v5539_v49  ;;  %v3719_v0 = vsel %vm204_vm4, %v5758_v61, 0.0 }
0x1923   :  { %3720 = vadd.xlane.f32.xlu1 %v3719_v0 }
0x1924   :  { %v3716_v1 = vsel %vm200_vm3, %v5761_v63, 0.0 }
0x1925   :  { %3717 = vadd.xlane.f32.xlu0 %v3716_v1 }
0x19ac   :  { %v3721_v2 = vpop.xlane.xlu1 %3720 }
0x19ad   :  { %v3723_v48 = vmul.f32 0.03125, %v3721_v2 }
0x19ae   :  { %v3718_v3 = vpop.xlane.xlu0 %3717 }
0x19af   :  { %v3722_v46 = vmul.f32 0.03125, %v3718_v3  ;;  %v3725_v4 = vsub.f32 %v5758_v61, %v3723_v48 }
0x19b1   :  { %v3724_v44 = vsub.f32 %v5761_v63, %v3722_v46  ;;  %v3727_v6 = vmul.f32 %v3725_v4, %v3725_v4 }
0x19b3   :  { %v3726_v5 = vmul.f32 %v3724_v44, %v3724_v44  ;;  %v3731_v7 = vsel %vm204_vm4, %v3727_v6, 0.0 }
0x19b5   :  { %v3728_v49 = vsel %vm200_vm3, %v3726_v5, 0.0 }
0x19b6   :  { %3729 = vadd.xlane.f32.xlu0 %v3728_v49 }
0x19ba   :  { %3732 = vadd.xlane.f32.xlu0 %v3731_v7 }
0x1a3f   :  { %v3730_v47 = vpop.xlane.xlu0 %3729 }
0x1a40   :  { %v3734_v9 = vmul.f32 0.03125, %v3730_v47 }
0x1a42   :  { %v3736_v10 = vadd.f32 1e-05, %v3734_v9 }
0x1a43   :  { %v3733_v11 = vpop.xlane.xlu0 %3732 }
0x1a44   :  { %4946 = vrsqrt.f32 %v3736_v10  ;;  %v3735_v12 = vmul.f32 0.03125, %v3733_v11 }
0x1a46   :  { %v3737_v13 = vadd.f32 1e-05, %v3735_v12 }
0x1a48   :  { %4948 = vrsqrt.f32 %v3737_v13 }
0x1a51   :  { %v4947_v14 = vpop.eup %4946 }
0x1a52   :  { %v3740_v17 = vmul.f32 %v4947_v14, %v3724_v44 }
0x1a54   :  { %v3748_v20 = vmul.f32 %v4316_v15, %v3740_v17 }
0x1a55   :  { %v4949_v22 = vpop.eup %4948 }
0x1a56   :  { %v3741_v23 = vmul.f32 %v4949_v22, %v3725_v4  ;;  %v3756_v25 = vadd.f32 %v4317_v19, %v3748_v20 }
0x1a58   :  { %v3749_v26 = vmul.f32 %v4316_v15, %v3741_v23  ;;  %4785 = vmatprep.mubr.msk.f32.mxu1 %vm200_vm3, %v3756_v25 }
0x1a5a   :  { %v3757_v27 = vadd.f32 %v4317_v19, %v3749_v26 }
0x1a5c   :  { %4786 = vmatmul.mubr.msk.f32.vlgmr.msra.gmra.mxu1 %vm200_vm3, %v3757_v27 }
0x1a5d   :  { %4831 = vmatprep.mubr.msk.f32.mxu1 %vm4963_vm5, %v4962_v16 }
0x1b1c   :  { %v4787_v57 = vpop.f32.mrf.mxu1 }
0x1b1d   :  { %v3849_v51 = vadd.f32 %v4787_v57, %v4323_v45 }
0x1b1e   :  { %v3843_v52 = vpop.f32.mrf.mxu1 }
0x1b1f   :  { %v3855_v53 = vmul.f32 0.70710677, %v3849_v51  ;;  %v3844_v59 = vadd.f32 %v4323_v45, %v3843_v52  ;;  %v3853_v36 = vmul.f32 0.5, %v3849_v51 }
0x1b21   :  { %v3861_v54 = vand.u32 2147483647, %v3855_v53  ;;  %v3854_v55 = vmul.f32 0.70710677, %v3844_v59  ;;  %vm3857_vm2 = vcmp.ge.f32.partialorder %v3855_v53, 0.0  ;;  %v3852_v34 = vmul.f32 0.5, %v3844_v59 }
0x1b22   :  { %v3859_v27 = vsel %vm3857_vm2, 1.0, %v4978_v24 }
0x1b23   :  { %v3863_v56 = vmul.f32 0.3275911, %v3861_v54  ;;  %v3860_v58 = vand.u32 2147483647, %v3854_v55  ;;  %v3889_v1 = vsub.f32 0.0, %v3861_v54  ;;  %vm3856_vm6 = vcmp.ge.f32.partialorder %v3854_v55, 0.0 }
0x1b24   :  { %v3858_v31 = vsel %vm3856_vm6, 1.0, %v4978_v24 }
0x1b25   :  { %v3865_v60 = vadd.f32 1.0, %v3863_v56  ;;  %v3862_v62 = vmul.f32 0.3275911, %v3860_v58  ;;  %v3888_v2 = vsub.f32 0.0, %v3860_v58  ;;  %v3891_v48 = vmul.f32 %v3889_v1, %v3861_v54  ;;  %v4015_v1 = vld [vmem:[%s5911_s19 + $0x10] sm:$0xff] }
0x1b27   :  { %4950 = vrcp.f32 %v3865_v60  ;;  %v3864_v0 = vadd.f32 1.0, %v3862_v62  ;;  %v3890_v46 = vmul.f32 %v3888_v2, %v3860_v58  ;;  %v3894_v44 = vmul.f32 1.442695, %v3891_v48  ;;  %v4014_v2 = vld [vmem:[%s5911_s19 + $0x8] sm:$0xff]  ;;  %v4013_v48 = vld [vmem:[%s5911_s19] sm:$0xff] }
0x1b29   :  { %4952 = vrcp.f32 %v3864_v0  ;;  %v3892_v6 = vmul.f32 1.442695, %v3890_v46  ;;  %v4016_v0 = vld [vmem:[%s5911_s19 + $0x18] sm:$0xff] }
0x1b2a   :  { %4954 = vpow2.f32 %v3894_v44  ;;  %4824 = vmatpush3.msra.mxu1 %v4016_v0 }
0x1b2b   :  { %4956 = vpow2.f32 %v3892_v6  ;;  %4825 = vmatprep.subr.mxu1 %v4962_v16  ;;  %v4123_v6 = vlaneseq }
0x1b2c   :  { %4826 = vmatpush3.msra.mxu1 %v4015_v1 }
0x1b2d   :  { %4827 = vmatprep.subr.mxu1 %v4962_v16 }
0x1b2e   :  { %4828 = vmatpush3.msra.mxu1 %v4014_v2 }
0x1b2f   :  { %4829 = vmatprep.subr.mxu1 %v4962_v16 }
0x1b30   :  { %4830 = vmatpush3.msra.mxu1 %v4013_v48 }
0x1b31   :  { %4834 = vmatprep.subr.mxu1 %v4962_v16 }
0x1b34   :  { %v4951_v3 = vpop.eup %4950 }
0x1b35   :  { %v3871_v4 = vmul.f32 1.0614054, %v4951_v3 }
0x1b36   :  { %v4953_v5 = vpop.eup %4952 }
0x1b37   :  { %v3873_v49 = vadd.f32 -1.4531521, %v3871_v4  ;;  %v3870_v7 = vmul.f32 1.0614054, %v4953_v5  ;;  %v4955_v19 = vpop.eup %4954 }
0x1b38   :  { %v4957_v25 = vpop.eup %4956 }
0x1b39   :  { %v3875_v21 = vmul.f32 %v4951_v3, %v3873_v49  ;;  %v3872_v18 = vadd.f32 -1.4531521, %v3870_v7  ;;  %v4124_v7 = vshrl.u32 %v4123_v6, 7 }
0x1b3b   :  { %v3877_v8 = vadd.f32 1.4214138, %v3875_v21  ;;  %v3874_v50 = vmul.f32 %v4953_v5, %v3872_v18  ;;  %v4125_v21 = vsub.s32 0, %v4124_v7  ;;  %v4011_v18 = vld [vmem:[%s5912_s17] sm:$0x1] }
0x1b3d   :  { %v3879_v47 = vmul.f32 %v4951_v3, %v3877_v8  ;;  %v3876_v9 = vadd.f32 1.4214138, %v3874_v50 }
0x1b3f   :  { %v3881_v10 = vadd.f32 -0.28449672, %v3879_v47  ;;  %v3878_v11 = vmul.f32 %v4953_v5, %v3876_v9 }
0x1b41   :  { %v3883_v12 = vmul.f32 %v4951_v3, %v3881_v10  ;;  %v3880_v13 = vadd.f32 -0.28449672, %v3878_v11  ;;  %v4126_v10 = vrot.slane %v4011_v18, %v4125_v21  ;;  %v4012_v11 = vld [vmem:[%s5913_s18] sm:$0x1] }
0x1b43   :  { %v3885_v14 = vadd.f32 0.2548296, %v3883_v12  ;;  %v3882_v15 = vmul.f32 %v4953_v5, %v3880_v13 }
0x1b45   :  { %v3887_v17 = vmul.f32 %v4951_v3, %v3885_v14  ;;  %v3884_v20 = vadd.f32 0.2548296, %v3882_v15  ;;  %v4133_v14 = vrot.slane %v4012_v11, %v4125_v21 }
0x1b47   :  { %v3897_v22 = vmul.f32 %v4955_v19, %v3887_v17  ;;  %v3886_v23 = vmul.f32 %v4953_v5, %v3884_v20  ;;  %v4017_v20 = vld [vmem:[%s5914_s20] sm:$0x1] }
0x1b49   :  { %v3899_v26 = vsub.f32 1.0, %v3897_v22  ;;  %v3896_v28 = vmul.f32 %v4957_v25, %v3886_v23 }
0x1b4b   :  { %v3901_v29 = vmul.f32 %v3899_v26, %v3859_v27  ;;  %v3898_v30 = vsub.f32 1.0, %v3896_v28 }
0x1b4d   :  { %v3900_v32 = vmul.f32 %v3898_v30, %v3858_v31  ;;  %v3903_v33 = vadd.f32 1.0, %v3901_v29 }
0x1b4f   :  { %v3902_v35 = vadd.f32 1.0, %v3900_v32  ;;  %v3905_v38 = vmul.f32 %v3903_v33, %v3853_v36 }
0x1b51   :  { %v3904_v37 = vmul.f32 %v3902_v35, %v3852_v34 }
0x1b53   :  { %4820 = vmatprep.mubr.f32.mxu0 %v3904_v37 }
0x1b54   :  { %4821 = vmatmul.mubr.f32.vlgmr.msra.gmra.mxu0 %v3905_v38 }
0x1c14   :  { %v4822_v40 = vpop.f32.mrf.mxu0 }
0x1c15   :  { %v4003_v41 = vadd.f32 %v4822_v40, %v4343_v39 }
0x1c16   :  { %v3997_v42 = vpop.f32.mrf.mxu0 }
0x1c17   :  { %v4007_v43 = vadd.f32 %v4003_v41, %v5758_v61  ;;  %v3998_v45 = vadd.f32 %v4343_v39, %v3997_v42 }
0x1c19   :  { %4009 = vst.msk [vmem:[#allocation2 + $0x8] sm:$0x3] %vm204_vm4, %v4007_v43  ;;  %v4006_v24 = vadd.f32 %v3998_v45, %v5761_v63 }
0x1c1b   :  { %4008 = vst.msk [vmem:[#allocation2] sm:$0xff] %vm200_vm3, %v4006_v24 }
0x1c22   :  { %v4010_v57 = vld [vmem:[#allocation2] sm:$0xff] }
0x1c23   :  { %v4109_v51 = vsel %vm4108_vm7, %v4010_v57, 0.0  ;;  %v4018_v52 = vsel %vm182_vm0, %v4010_v57, 0.0 }
0x1c24   :  { %4110 = vadd.xlane.f32.xlu1 %v4109_v51  ;;  %4019 = vadd.xlane.f32.xlu0 %v4018_v52 }
0x1cad   :  { %v4111_v53 = vpop.xlane.xlu1 %4110  ;;  %v4020_v59 = vpop.xlane.xlu0 %4019 }
0x1cae   :  { %v4112_v54 = vmul.f32 0.03125, %v4111_v53  ;;  %v4021_v55 = vmul.f32 0.03125, %v4020_v59 }
0x1cb0   :  { %v4113_v56 = vsub.f32 %v4010_v57, %v4112_v54  ;;  %v4022_v61 = vsub.f32 %v4010_v57, %v4021_v55 }
0x1cb2   :  { %v4114_v58 = vmul.f32 %v4113_v56, %v4113_v56  ;;  %v4023_v60 = vmul.f32 %v4022_v61, %v4022_v61 }
0x1cb4   :  { %v4115_v62 = vsel %vm4108_vm7, %v4114_v58, 0.0  ;;  %v4024_v63 = vsel %vm182_vm0, %v4023_v60, 0.0  ;;  %vm4106_vm0 = vcmask 24576  }
0x1cb5   :  { %4116 = vadd.xlane.f32.xlu1 %v4115_v62  ;;  %4025 = vadd.xlane.f32.xlu0 %v4024_v63 }
0x1d3e   :  { %v4117_v3 = vpop.xlane.xlu1 %4116  ;;  %v4026_v46 = vpop.xlane.xlu0 %4025 }
0x1d3f   :  { %v4118_v4 = vmul.f32 0.03125, %v4117_v3  ;;  %v4027_v44 = vmul.f32 0.03125, %v4026_v46 }
0x1d41   :  { %v4119_v5 = vadd.f32 1e-05, %v4118_v4  ;;  %v4028_v49 = vadd.f32 1e-05, %v4027_v44 }
0x1d43   :  { %4958 = vrsqrt.f32 %v4119_v5 }
0x1d44   :  { %4960 = vrsqrt.f32 %v4028_v49 }
0x1d50   :  { %v4959_v8 = vpop.eup %4958 }
0x1d51   :  { %v4961_v50 = vpop.eup %4960  ;;  %v4121_v47 = vmul.f32 %v4959_v8, %v4113_v56 }
0x1d52   :  { %v4030_v9 = vmul.f32 %v4961_v50, %v4022_v61 }
0x1d53   :  { %v4128_v15 = vmul.f32 %v4126_v10, %v4121_v47 }
0x1d54   :  { %v4031_v12 = vmul.f32 %v4030_v9, %v4011_v18 }
0x1d55   :  { %v4135_v17 = vadd.f32 %v4133_v14, %v4128_v15 }
0x1d56   :  { %v4032_v13 = vadd.f32 %v4031_v12, %v4012_v11 }
0x1d57   :  { %v4137_v19 = vrot.slane %v4135_v17, 5 }
0x1d58   :  { %4832 = vmatmul.mubr.msk.f32.vlgmr.msra.gmra.mxu1 %vm200_vm3, %v4032_v13 }
0x1d59   :  { %4835 = vmatpush3.msra.mxu1 %v4016_v0  ;;  %4842 = vmatprep.mubr.msk.f32.mxu1 %vm4963_vm5, %v4962_v16 }
0x1d5a   :  { %4836 = vmatprep.subr.mxu1 %v4962_v16 }
0x1d5b   :  { %4837 = vmatpush3.msra.mxu1 %v4015_v1 }
0x1d5c   :  { %4838 = vmatprep.subr.mxu1 %v4962_v16 }
0x1d5d   :  { %4839 = vmatpush3.msra.mxu1 %v4014_v2 }
0x1d5e   :  { %4840 = vmatprep.subr.mxu1 %v4962_v16 }
0x1d5f   :  { %4841 = vmatpush3.msra.mxu1 %v4013_v48 }
0x1d60   :  { %4843 = vmatmul.mubr.msk.f32.vlgmr.msra.gmra.mxu1 %vm200_vm3, %v4137_v19 }
0x1e18   :  { %v4102_v22 = vpop.f32.mrf.mxu1 }
0x1e19   :  { %v4103_v23 = vadd.f32 %v4102_v22, %v4017_v20 }
0x1e1a   :  { %v4833_v25 = vpop.f32.mrf.mxu1 }
0x1e1b   :  { %4107 = vst.msk [vmem:[%s5915_s21] sm:$0x1] %vm4106_vm0, %v4103_v23 }
0x1e20   :  { %v4206_v26 = vpop.f32.mrf.mxu1 }
0x1e21   :  { %v4207_v27 = vadd.f32 %v4206_v26, %v4017_v20 }
0x1e22   :  { %v4844_v28 = vpop.f32.mrf.mxu1 }
0x1e23   :  { %4210 = vst.msk [vmem:[%s5915_s21 + $0x1] sm:$0x1] %vm4106_vm0, %v4207_v27 }

</bundles_post_ra>
